<compile_context>
chip_gen: v5e
topology: v5e:2x2
jax: 0.10.0
libtpu: 0.0.40
codegen_flags: <defaults>
</compile_context>

<pallas_src>
import functools

import numpy as np

import jax
import jax.numpy as jnp
from jax.experimental import pallas as pl
from jax.experimental.pallas import tpu as pltpu


CIN, CHANS, FC_OUT = 3, 32, 4096      # num_ftrs = CHANS
STEM_K = 32                           # 9*CIN = 27 zero-padded to 32
PAD = 128                             # flat end-pad (>= Wp+1), lane-aligned

_VMEM = pl.BlockSpec(memory_space=pltpu.MemorySpace.VMEM)


# ---------------------------------------------------------------------------
# Fused Pallas kernel (single call, everything resident in VMEM)
# ---------------------------------------------------------------------------
def _embedding_net_kernel(stem_in_ref, w0_ref, b0_ref, w1_ref, b1_ref,
                          w2_ref, b2_ref, wf_ref, bf_ref, mask_ref, pool_ref,
                          out_ref, act0_ref, act1_ref, packed_ref,
                          *, wp, mp):
    """stem -> conv1 -> conv2(+res,+relu) -> global-avg-pool -> fc1.

    stem_in : (32, Mp)       bf16  stem im2col operand (K padded 27 -> 32)
    w0      : (C, 32)        bf16  packed stem weight (BN folded)
    w1, w2  : (C, 9*C)       bf16  packed block conv weights (BN folded)
    b*      : (C, 1)         f32   folded biases
    wf      : (C, 4096)      bf16  fc1 weight (pre-transposed)
    bf      : (1, 4096)      f32
    mask    : (1, Mp)        f32   interior-pixel indicator (padded layout)
    pool    : (B, Mp)        f32   per-batch mean matrix (zero at pad pixels)
    out     : (B, 4096)      f32
    act0/1  : (C, PAD+Mp+PAD) f32  padded activation buffers (scratch)
    packed  : (9*C, Mp)      bf16  packed shifted-tap matmul operand (scratch)
    """
    # Zero padded buffers once: halo / end-pad reads must see genuine zeros.
    act0_ref[...] = jnp.zeros_like(act0_ref)
    act1_ref[...] = jnp.zeros_like(act1_ref)

    mask = mask_ref[...]                                       # (1, Mp)

    # ---- stem: conv3x3(CIN->CHANS) + bias + ReLU (one K=32 bf16 matmul) ----
    a0 = jnp.dot(w0_ref[...], stem_in_ref[...],
                 preferred_element_type=jnp.float32)           # (C, Mp) f32
    a0 = jnp.maximum(a0 + b0_ref[...], 0.0) * mask
    act0_ref[:, PAD:PAD + mp] = a0

    def pack_taps(src_ref):
        # 9 shifted (C, Mp) windows -> one (9*C, Mp) bf16 MXU operand.
        for t in range(9):
            di, dj = divmod(t, 3)
            off = (di - 1) * wp + (dj - 1)
            win = src_ref[:, PAD + off:PAD + off + mp]
            packed_ref[t * CHANS:(t + 1) * CHANS, :] = win.astype(jnp.bfloat16)

    # ---- BasicBlock conv1 + bias + ReLU (one K=288 bf16 matmul) ------------
    pack_taps(act0_ref)
    a1 = jnp.dot(w1_ref[...], packed_ref[...],
                 preferred_element_type=jnp.float32)
    a1 = jnp.maximum(a1 + b1_ref[...], 0.0) * mask
    act1_ref[:, PAD:PAD + mp] = a1

    # ---- BasicBlock conv2 + bias + residual + ReLU + global avg pool -------
    pack_taps(act1_ref)
    a2 = jnp.dot(w2_ref[...], packed_ref[...],
                 preferred_element_type=jnp.float32)
    a2 = jnp.maximum(a2 + b2_ref[...] + act0_ref[:, PAD:PAD + mp], 0.0)
    # feat[b, c] = sum_m pool[b, m] * a2[c, m]  (per-batch mean over interior)
    feat = jax.lax.dot_general(pool_ref[...], a2, (((1,), (1,)), ((), ())),
                               preferred_element_type=jnp.float32)  # (B, C)

    # ---- fc1: (B, C) @ (C, 4096) + bias; lane-dense output store -----------
    y = jnp.dot(feat.astype(jnp.bfloat16), wf_ref[...],
                preferred_element_type=jnp.float32)
    out_ref[...] = y + bf_ref[...]


# ---------------------------------------------------------------------------
# Wrapper
# ---------------------------------------------------------------------------
def _layout_constants(batch, height, width):
    """Interior mask (1, Mp) and pool matrix (B, Mp) for the padded layout."""
    hp, wp = height + 2, width + 2
    m = np.arange(batch * hp * wp)
    b = m // (hp * wp)
    h = (m % (hp * wp)) // wp
    w = m % wp
    interior = ((h >= 1) & (h <= height) & (w >= 1) & (w <= width)).astype(np.float32)
    mask = interior.reshape(1, -1)
    pool = interior[None, :] * (b[None, :] == np.arange(batch)[:, None])
    pool = pool.astype(np.float32) / float(height * width)
    return jnp.asarray(mask), jnp.asarray(pool)


def _stem_operand(x, hp, wp):
    """im2col of the tiny input -> (STEM_K, B*Hp*Wp) bf16 (K padded 27->32)."""
    batch = x.shape[0]
    xp2 = jnp.pad(x, ((0, 0), (0, 0), (2, 2), (2, 2)))
    taps = [xp2[:, :, di:di + hp, dj:dj + wp]
            for di in range(3) for dj in range(3)]                  # 9 x (B,CIN,Hp,Wp)
    op = jnp.stack(taps, 0).transpose(0, 2, 1, 3, 4)                # (9,CIN,B,Hp,Wp)
    op = op.reshape(9 * CIN, batch * hp * wp)
    return jnp.pad(op, ((0, STEM_K - 9 * CIN), (0, 0))).astype(jnp.bfloat16)


def embedding_net_forward(x, params):
    B, _, H, W = x.shape
    hp, wp = H + 2, W + 2
    mp = B * hp * wp
    buf = PAD + mp + PAD

    stem_in = _stem_operand(x, hp, wp)
    mask, pool = _layout_constants(B, H, W)

    w0, b0 = params["stem"]
    w1, b1 = params["blk1"]
    w2, b2 = params["blk2"]
    wf, bf = params["fc1"]

    kernel = functools.partial(_embedding_net_kernel, wp=wp, mp=mp)
    return pl.pallas_call(
        kernel,
        out_shape=jax.ShapeDtypeStruct((B, FC_OUT), jnp.float32),
        in_specs=[_VMEM] * 11,
        out_specs=_VMEM,
        scratch_shapes=[
            pltpu.VMEM((CHANS, buf), jnp.float32),       # stem output / residual
            pltpu.VMEM((CHANS, buf), jnp.float32),       # conv1 output
            pltpu.VMEM((9 * CHANS, mp), jnp.bfloat16),   # packed tap windows
        ],
    )(stem_in, w0, b0.reshape(-1, 1), w1, b1.reshape(-1, 1),
      w2, b2.reshape(-1, 1), wf, bf.reshape(1, -1), mask, pool)


# ---------------------------------------------------------------------------
# Parameters (deterministic, synthetic) and pure-JAX reference
# ---------------------------------------------------------------------------
def init_params(key):
    ks = jax.random.split(key, 8)

    def conv_w(k, cout, cin):
        fan_in = cin * 9
        return jax.random.normal(k, (cout, cin, 3, 3), jnp.float32) / jnp.sqrt(fan_in)

    def bn(k, c):
        k1, k2, k3 = jax.random.split(k, 3)
        gamma = 1.0 + 0.1 * jax.random.normal(k1, (c,), jnp.float32)
        beta = 0.1 * jax.random.normal(k2, (c,), jnp.float32)
        mean = 0.1 * jax.random.normal(k3, (c,), jnp.float32)
        var = jnp.ones((c,), jnp.float32)
        return gamma, beta, mean, var

    def fold_bn(w, gamma, beta, mean, var, eps=1e-5):
        s = gamma / jnp.sqrt(var + eps)
        return w * s[:, None, None, None], beta - mean * s

    def pack(w_oihw, k_pad=None):
        # (Cout, Cin, 3, 3) -> (Cout, 9*Cin), columns ordered (tap, channel).
        cout, cin = w_oihw.shape[:2]
        wp = jnp.transpose(w_oihw, (0, 2, 3, 1)).reshape(cout, 9 * cin)
        if k_pad is not None and k_pad > 9 * cin:
            wp = jnp.pad(wp, ((0, 0), (0, k_pad - 9 * cin)))
        return wp.astype(jnp.bfloat16)

    stem_w, stem_b = fold_bn(conv_w(ks[0], CHANS, CIN), *bn(ks[1], CHANS))
    blk1_w, blk1_b = fold_bn(conv_w(ks[2], CHANS, CHANS), *bn(ks[3], CHANS))
    blk2_w, blk2_b = fold_bn(conv_w(ks[4], CHANS, CHANS), *bn(ks[5], CHANS))
    fc_w = 0.02 * jax.random.normal(ks[6], (FC_OUT, CHANS), jnp.float32)
    fc_b = 0.01 * jax.random.normal(ks[7], (FC_OUT,), jnp.float32)
    return {
        "stem": (pack(stem_w, STEM_K), stem_b),
        "blk1": (pack(blk1_w), blk1_b),
        "blk2": (pack(blk2_w), blk2_b),
        # fc weight pre-transposed to (in_features, out_features), bf16 for MXU
        "fc1": (fc_w.T.astype(jnp.bfloat16), fc_b),
    }


def reference_forward(x, params):
    def conv_ref(x, w_packed, b, relu, cin):
        wpk = w_packed.astype(jnp.float32)[:, :9 * cin]
        cout = wpk.shape[0]
        w = wpk.reshape(cout, 3, 3, cin).transpose(0, 3, 1, 2)     # OIHW
        y = jax.lax.conv_general_dilated(
            x, w, (1, 1), [(1, 1), (1, 1)],
            dimension_numbers=("NCHW", "OIHW", "NCHW"))
        y = y + b[None, :, None, None]
        return jnp.maximum(y, 0.0) if relu else y

    out = conv_ref(x, *params["stem"], True, CIN)
    h = conv_ref(out, *params["blk1"], True, CHANS)
    h = conv_ref(h, *params["blk2"], False, CHANS)
    out = jnp.maximum(h + out, 0.0)
    feat = jnp.mean(out, axis=(2, 3))
    wf, bf = params["fc1"]
    return feat @ wf.astype(jnp.float32) + bf


if __name__ == "__main__":
    key = jax.random.PRNGKey(0)
    kx, kp = jax.random.split(key)
    x = jax.random.normal(kx, (2, CIN, 16, 16), jnp.float32)
    params = init_params(kp)

    forward = jax.jit(embedding_net_forward)
    y = jax.block_until_ready(forward(x, params))
    assert y.shape == (2, FC_OUT), y.shape

    y_ref = jax.block_until_ready(jax.jit(reference_forward)(x, params))
    err = float(jnp.max(jnp.abs(y - y_ref)))
    # bf16 MXU operands (f32 accumulation) => slightly looser tolerance than pure f32
    assert jnp.allclose(y, y_ref, rtol=2e-2, atol=2e-2), err

    print("KERNEL_OK")
</pallas_src>

<mosaic_0001>
module attributes {stable_mosaic.version = 11 : i64} {
  func.func @_embedding_net_kernel(%arg0: memref<32x648xbf16, #tpu.memory_space<vmem>>, %arg1: memref<32x32xbf16, #tpu.memory_space<vmem>>, %arg2: memref<32x1xf32, #tpu.memory_space<vmem>>, %arg3: memref<32x288xbf16, #tpu.memory_space<vmem>>, %arg4: memref<32x1xf32, #tpu.memory_space<vmem>>, %arg5: memref<32x288xbf16, #tpu.memory_space<vmem>>, %arg6: memref<32x1xf32, #tpu.memory_space<vmem>>, %arg7: memref<32x4096xbf16, #tpu.memory_space<vmem>>, %arg8: memref<1x4096xf32, #tpu.memory_space<vmem>>, %arg9: memref<1x648xf32, #tpu.memory_space<vmem>>, %arg10: memref<2x648xf32, #tpu.memory_space<vmem>>, %arg11: memref<2x4096xf32, #tpu.memory_space<vmem>>, %arg12: memref<32x904xf32, #tpu.memory_space<vmem>>, %arg13: memref<32x904xf32, #tpu.memory_space<vmem>>, %arg14: memref<288x648xbf16, #tpu.memory_space<vmem>>) attributes {dimension_semantics = [], scalar_prefetch = 0 : i64, scratch_operands = 3 : i64, tpu.core_type = #tpu.core_type<tc>} {
    %cst = arith.constant 0.000000e+00 : f32
    %0 = vector.broadcast %cst : f32 to vector<32x904xf32>
    %c0 = arith.constant 0 : index
    %c0_0 = arith.constant 0 : index
    %1 = vector.load %arg12[%c0, %c0_0] : memref<32x904xf32, #tpu.memory_space<vmem>>, vector<32x904xf32>
    tpu.vector_store %arg12[%c0, %c0_0], %0 {strides = array<i32>} : memref<32x904xf32, #tpu.memory_space<vmem>>, vector<32x904xf32>,
    %cst_1 = arith.constant 0.000000e+00 : f32
    %2 = vector.broadcast %cst_1 : f32 to vector<32x904xf32>
    %c0_2 = arith.constant 0 : index
    %c0_3 = arith.constant 0 : index
    %3 = vector.load %arg13[%c0_2, %c0_3] : memref<32x904xf32, #tpu.memory_space<vmem>>, vector<32x904xf32>
    tpu.vector_store %arg13[%c0_2, %c0_3], %2 {strides = array<i32>} : memref<32x904xf32, #tpu.memory_space<vmem>>, vector<32x904xf32>,
    %c0_4 = arith.constant 0 : index
    %c0_5 = arith.constant 0 : index
    %4 = vector.load %arg9[%c0_4, %c0_5] : memref<1x648xf32, #tpu.memory_space<vmem>>, vector<1x648xf32>
    %c0_6 = arith.constant 0 : index
    %c0_7 = arith.constant 0 : index
    %5 = vector.load %arg1[%c0_6, %c0_7] : memref<32x32xbf16, #tpu.memory_space<vmem>>, vector<32x32xbf16>
    %c0_8 = arith.constant 0 : index
    %c0_9 = arith.constant 0 : index
    %6 = vector.load %arg0[%c0_8, %c0_9] : memref<32x648xbf16, #tpu.memory_space<vmem>>, vector<32x648xbf16>
    %cst_10 = arith.constant dense<0.000000e+00> : vector<32x648xf32>
    %7 = tpu.matmul %5, %6, %cst_10 {dimension_numbers = #tpu.dot_dimension_numbers<[1], [0], [0], [1], [0, 0, 1, 1], [], []>} : vector<32x32xbf16>, vector<32x648xbf16>, vector<32x648xf32> -> vector<32x648xf32>
    %c0_11 = arith.constant 0 : index
    %c0_12 = arith.constant 0 : index
    %8 = vector.load %arg2[%c0_11, %c0_12] : memref<32x1xf32, #tpu.memory_space<vmem>>, vector<32x1xf32>
    %9 = vector.broadcast %8 : vector<32x1xf32> to vector<32x648xf32>
    %10 = arith.addf %7, %9 : vector<32x648xf32>
    %cst_13 = arith.constant 0.000000e+00 : f32
    %11 = vector.broadcast %cst_13 : f32 to vector<32x648xf32>
    %12 = arith.maximumf %10, %11 : vector<32x648xf32>
    %13 = vector.broadcast %4 : vector<1x648xf32> to vector<32x648xf32>
    %14 = arith.mulf %12, %13 : vector<32x648xf32>
    %c0_14 = arith.constant 0 : index
    %c128 = arith.constant 128 : index
    %15 = vector.load %arg12[%c0_14, %c128] : memref<32x904xf32, #tpu.memory_space<vmem>>, vector<32x648xf32>
    tpu.vector_store %arg12[%c0_14, %c128], %14 {strides = array<i32>} : memref<32x904xf32, #tpu.memory_space<vmem>>, vector<32x648xf32>,
    %c0_15 = arith.constant 0 : index
    %c109 = arith.constant 109 : index
    %16 = vector.load %arg12[%c0_15, %c109] : memref<32x904xf32, #tpu.memory_space<vmem>>, vector<32x648xf32>
    %17 = arith.truncf %16 : vector<32x648xf32> to vector<32x648xbf16>
    %c0_16 = arith.constant 0 : index
    %c0_17 = arith.constant 0 : index
    %18 = vector.load %arg14[%c0_16, %c0_17] : memref<288x648xbf16, #tpu.memory_space<vmem>>, vector<32x648xbf16>
    tpu.vector_store %arg14[%c0_16, %c0_17], %17 {strides = array<i32>} : memref<288x648xbf16, #tpu.memory_space<vmem>>, vector<32x648xbf16>,
    %c0_18 = arith.constant 0 : index
    %c110 = arith.constant 110 : index
    %19 = vector.load %arg12[%c0_18, %c110] : memref<32x904xf32, #tpu.memory_space<vmem>>, vector<32x648xf32>
    %20 = arith.truncf %19 : vector<32x648xf32> to vector<32x648xbf16>
    %c32 = arith.constant 32 : index
    %c0_19 = arith.constant 0 : index
    %21 = vector.load %arg14[%c32, %c0_19] : memref<288x648xbf16, #tpu.memory_space<vmem>>, vector<32x648xbf16>
    tpu.vector_store %arg14[%c32, %c0_19], %20 {strides = array<i32>} : memref<288x648xbf16, #tpu.memory_space<vmem>>, vector<32x648xbf16>,
    %c0_20 = arith.constant 0 : index
    %c111 = arith.constant 111 : index
    %22 = vector.load %arg12[%c0_20, %c111] : memref<32x904xf32, #tpu.memory_space<vmem>>, vector<32x648xf32>
    %23 = arith.truncf %22 : vector<32x648xf32> to vector<32x648xbf16>
    %c64 = arith.constant 64 : index
    %c0_21 = arith.constant 0 : index
    %24 = vector.load %arg14[%c64, %c0_21] : memref<288x648xbf16, #tpu.memory_space<vmem>>, vector<32x648xbf16>
    tpu.vector_store %arg14[%c64, %c0_21], %23 {strides = array<i32>} : memref<288x648xbf16, #tpu.memory_space<vmem>>, vector<32x648xbf16>,
    %c0_22 = arith.constant 0 : index
    %c127 = arith.constant 127 : index
    %25 = vector.load %arg12[%c0_22, %c127] : memref<32x904xf32, #tpu.memory_space<vmem>>, vector<32x648xf32>
    %26 = arith.truncf %25 : vector<32x648xf32> to vector<32x648xbf16>
    %c96 = arith.constant 96 : index
    %c0_23 = arith.constant 0 : index
    %27 = vector.load %arg14[%c96, %c0_23] : memref<288x648xbf16, #tpu.memory_space<vmem>>, vector<32x648xbf16>
    tpu.vector_store %arg14[%c96, %c0_23], %26 {strides = array<i32>} : memref<288x648xbf16, #tpu.memory_space<vmem>>, vector<32x648xbf16>,
    %c0_24 = arith.constant 0 : index
    %c128_25 = arith.constant 128 : index
    %28 = vector.load %arg12[%c0_24, %c128_25] : memref<32x904xf32, #tpu.memory_space<vmem>>, vector<32x648xf32>
    %29 = arith.truncf %28 : vector<32x648xf32> to vector<32x648xbf16>
    %c128_26 = arith.constant 128 : index
    %c0_27 = arith.constant 0 : index
    %30 = vector.load %arg14[%c128_26, %c0_27] : memref<288x648xbf16, #tpu.memory_space<vmem>>, vector<32x648xbf16>
    tpu.vector_store %arg14[%c128_26, %c0_27], %29 {strides = array<i32>} : memref<288x648xbf16, #tpu.memory_space<vmem>>, vector<32x648xbf16>,
    %c0_28 = arith.constant 0 : index
    %c129 = arith.constant 129 : index
    %31 = vector.load %arg12[%c0_28, %c129] : memref<32x904xf32, #tpu.memory_space<vmem>>, vector<32x648xf32>
    %32 = arith.truncf %31 : vector<32x648xf32> to vector<32x648xbf16>
    %c160 = arith.constant 160 : index
    %c0_29 = arith.constant 0 : index
    %33 = vector.load %arg14[%c160, %c0_29] : memref<288x648xbf16, #tpu.memory_space<vmem>>, vector<32x648xbf16>
    tpu.vector_store %arg14[%c160, %c0_29], %32 {strides = array<i32>} : memref<288x648xbf16, #tpu.memory_space<vmem>>, vector<32x648xbf16>,
    %c0_30 = arith.constant 0 : index
    %c145 = arith.constant 145 : index
    %34 = vector.load %arg12[%c0_30, %c145] : memref<32x904xf32, #tpu.memory_space<vmem>>, vector<32x648xf32>
    %35 = arith.truncf %34 : vector<32x648xf32> to vector<32x648xbf16>
    %c192 = arith.constant 192 : index
    %c0_31 = arith.constant 0 : index
    %36 = vector.load %arg14[%c192, %c0_31] : memref<288x648xbf16, #tpu.memory_space<vmem>>, vector<32x648xbf16>
    tpu.vector_store %arg14[%c192, %c0_31], %35 {strides = array<i32>} : memref<288x648xbf16, #tpu.memory_space<vmem>>, vector<32x648xbf16>,
    %c0_32 = arith.constant 0 : index
    %c146 = arith.constant 146 : index
    %37 = vector.load %arg12[%c0_32, %c146] : memref<32x904xf32, #tpu.memory_space<vmem>>, vector<32x648xf32>
    %38 = arith.truncf %37 : vector<32x648xf32> to vector<32x648xbf16>
    %c224 = arith.constant 224 : index
    %c0_33 = arith.constant 0 : index
    %39 = vector.load %arg14[%c224, %c0_33] : memref<288x648xbf16, #tpu.memory_space<vmem>>, vector<32x648xbf16>
    tpu.vector_store %arg14[%c224, %c0_33], %38 {strides = array<i32>} : memref<288x648xbf16, #tpu.memory_space<vmem>>, vector<32x648xbf16>,
    %c0_34 = arith.constant 0 : index
    %c147 = arith.constant 147 : index
    %40 = vector.load %arg12[%c0_34, %c147] : memref<32x904xf32, #tpu.memory_space<vmem>>, vector<32x648xf32>
    %41 = arith.truncf %40 : vector<32x648xf32> to vector<32x648xbf16>
    %c256 = arith.constant 256 : index
    %c0_35 = arith.constant 0 : index
    %42 = vector.load %arg14[%c256, %c0_35] : memref<288x648xbf16, #tpu.memory_space<vmem>>, vector<32x648xbf16>
    tpu.vector_store %arg14[%c256, %c0_35], %41 {strides = array<i32>} : memref<288x648xbf16, #tpu.memory_space<vmem>>, vector<32x648xbf16>,
    %c0_36 = arith.constant 0 : index
    %c0_37 = arith.constant 0 : index
    %43 = vector.load %arg3[%c0_36, %c0_37] : memref<32x288xbf16, #tpu.memory_space<vmem>>, vector<32x288xbf16>
    %c0_38 = arith.constant 0 : index
    %c0_39 = arith.constant 0 : index
    %44 = vector.load %arg14[%c0_38, %c0_39] : memref<288x648xbf16, #tpu.memory_space<vmem>>, vector<288x648xbf16>
    %cst_40 = arith.constant dense<0.000000e+00> : vector<32x648xf32>
    %45 = tpu.matmul %43, %44, %cst_40 {dimension_numbers = #tpu.dot_dimension_numbers<[1], [0], [0], [1], [0, 0, 1, 1], [], []>} : vector<32x288xbf16>, vector<288x648xbf16>, vector<32x648xf32> -> vector<32x648xf32>
    %c0_41 = arith.constant 0 : index
    %c0_42 = arith.constant 0 : index
    %46 = vector.load %arg4[%c0_41, %c0_42] : memref<32x1xf32, #tpu.memory_space<vmem>>, vector<32x1xf32>
    %47 = vector.broadcast %46 : vector<32x1xf32> to vector<32x648xf32>
    %48 = arith.addf %45, %47 : vector<32x648xf32>
    %cst_43 = arith.constant 0.000000e+00 : f32
    %49 = vector.broadcast %cst_43 : f32 to vector<32x648xf32>
    %50 = arith.maximumf %48, %49 : vector<32x648xf32>
    %51 = vector.broadcast %4 : vector<1x648xf32> to vector<32x648xf32>
    %52 = arith.mulf %50, %51 : vector<32x648xf32>
    %c0_44 = arith.constant 0 : index
    %c128_45 = arith.constant 128 : index
    %53 = vector.load %arg13[%c0_44, %c128_45] : memref<32x904xf32, #tpu.memory_space<vmem>>, vector<32x648xf32>
    tpu.vector_store %arg13[%c0_44, %c128_45], %52 {strides = array<i32>} : memref<32x904xf32, #tpu.memory_space<vmem>>, vector<32x648xf32>,
    %c0_46 = arith.constant 0 : index
    %c109_47 = arith.constant 109 : index
    %54 = vector.load %arg13[%c0_46, %c109_47] : memref<32x904xf32, #tpu.memory_space<vmem>>, vector<32x648xf32>
    %55 = arith.truncf %54 : vector<32x648xf32> to vector<32x648xbf16>
    %c0_48 = arith.constant 0 : index
    %c0_49 = arith.constant 0 : index
    %56 = vector.load %arg14[%c0_48, %c0_49] : memref<288x648xbf16, #tpu.memory_space<vmem>>, vector<32x648xbf16>
    tpu.vector_store %arg14[%c0_48, %c0_49], %55 {strides = array<i32>} : memref<288x648xbf16, #tpu.memory_space<vmem>>, vector<32x648xbf16>,
    %c0_50 = arith.constant 0 : index
    %c110_51 = arith.constant 110 : index
    %57 = vector.load %arg13[%c0_50, %c110_51] : memref<32x904xf32, #tpu.memory_space<vmem>>, vector<32x648xf32>
    %58 = arith.truncf %57 : vector<32x648xf32> to vector<32x648xbf16>
    %c32_52 = arith.constant 32 : index
    %c0_53 = arith.constant 0 : index
    %59 = vector.load %arg14[%c32_52, %c0_53] : memref<288x648xbf16, #tpu.memory_space<vmem>>, vector<32x648xbf16>
    tpu.vector_store %arg14[%c32_52, %c0_53], %58 {strides = array<i32>} : memref<288x648xbf16, #tpu.memory_space<vmem>>, vector<32x648xbf16>,
    %c0_54 = arith.constant 0 : index
    %c111_55 = arith.constant 111 : index
    %60 = vector.load %arg13[%c0_54, %c111_55] : memref<32x904xf32, #tpu.memory_space<vmem>>, vector<32x648xf32>
    %61 = arith.truncf %60 : vector<32x648xf32> to vector<32x648xbf16>
    %c64_56 = arith.constant 64 : index
    %c0_57 = arith.constant 0 : index
    %62 = vector.load %arg14[%c64_56, %c0_57] : memref<288x648xbf16, #tpu.memory_space<vmem>>, vector<32x648xbf16>
    tpu.vector_store %arg14[%c64_56, %c0_57], %61 {strides = array<i32>} : memref<288x648xbf16, #tpu.memory_space<vmem>>, vector<32x648xbf16>,
    %c0_58 = arith.constant 0 : index
    %c127_59 = arith.constant 127 : index
    %63 = vector.load %arg13[%c0_58, %c127_59] : memref<32x904xf32, #tpu.memory_space<vmem>>, vector<32x648xf32>
    %64 = arith.truncf %63 : vector<32x648xf32> to vector<32x648xbf16>
    %c96_60 = arith.constant 96 : index
    %c0_61 = arith.constant 0 : index
    %65 = vector.load %arg14[%c96_60, %c0_61] : memref<288x648xbf16, #tpu.memory_space<vmem>>, vector<32x648xbf16>
    tpu.vector_store %arg14[%c96_60, %c0_61], %64 {strides = array<i32>} : memref<288x648xbf16, #tpu.memory_space<vmem>>, vector<32x648xbf16>,
    %c0_62 = arith.constant 0 : index
    %c128_63 = arith.constant 128 : index
    %66 = vector.load %arg13[%c0_62, %c128_63] : memref<32x904xf32, #tpu.memory_space<vmem>>, vector<32x648xf32>
    %67 = arith.truncf %66 : vector<32x648xf32> to vector<32x648xbf16>
    %c128_64 = arith.constant 128 : index
    %c0_65 = arith.constant 0 : index
    %68 = vector.load %arg14[%c128_64, %c0_65] : memref<288x648xbf16, #tpu.memory_space<vmem>>, vector<32x648xbf16>
    tpu.vector_store %arg14[%c128_64, %c0_65], %67 {strides = array<i32>} : memref<288x648xbf16, #tpu.memory_space<vmem>>, vector<32x648xbf16>,
    %c0_66 = arith.constant 0 : index
    %c129_67 = arith.constant 129 : index
    %69 = vector.load %arg13[%c0_66, %c129_67] : memref<32x904xf32, #tpu.memory_space<vmem>>, vector<32x648xf32>
    %70 = arith.truncf %69 : vector<32x648xf32> to vector<32x648xbf16>
    %c160_68 = arith.constant 160 : index
    %c0_69 = arith.constant 0 : index
    %71 = vector.load %arg14[%c160_68, %c0_69] : memref<288x648xbf16, #tpu.memory_space<vmem>>, vector<32x648xbf16>
    tpu.vector_store %arg14[%c160_68, %c0_69], %70 {strides = array<i32>} : memref<288x648xbf16, #tpu.memory_space<vmem>>, vector<32x648xbf16>,
    %c0_70 = arith.constant 0 : index
    %c145_71 = arith.constant 145 : index
    %72 = vector.load %arg13[%c0_70, %c145_71] : memref<32x904xf32, #tpu.memory_space<vmem>>, vector<32x648xf32>
    %73 = arith.truncf %72 : vector<32x648xf32> to vector<32x648xbf16>
    %c192_72 = arith.constant 192 : index
    %c0_73 = arith.constant 0 : index
    %74 = vector.load %arg14[%c192_72, %c0_73] : memref<288x648xbf16, #tpu.memory_space<vmem>>, vector<32x648xbf16>
    tpu.vector_store %arg14[%c192_72, %c0_73], %73 {strides = array<i32>} : memref<288x648xbf16, #tpu.memory_space<vmem>>, vector<32x648xbf16>,
    %c0_74 = arith.constant 0 : index
    %c146_75 = arith.constant 146 : index
    %75 = vector.load %arg13[%c0_74, %c146_75] : memref<32x904xf32, #tpu.memory_space<vmem>>, vector<32x648xf32>
    %76 = arith.truncf %75 : vector<32x648xf32> to vector<32x648xbf16>
    %c224_76 = arith.constant 224 : index
    %c0_77 = arith.constant 0 : index
    %77 = vector.load %arg14[%c224_76, %c0_77] : memref<288x648xbf16, #tpu.memory_space<vmem>>, vector<32x648xbf16>
    tpu.vector_store %arg14[%c224_76, %c0_77], %76 {strides = array<i32>} : memref<288x648xbf16, #tpu.memory_space<vmem>>, vector<32x648xbf16>,
    %c0_78 = arith.constant 0 : index
    %c147_79 = arith.constant 147 : index
    %78 = vector.load %arg13[%c0_78, %c147_79] : memref<32x904xf32, #tpu.memory_space<vmem>>, vector<32x648xf32>
    %79 = arith.truncf %78 : vector<32x648xf32> to vector<32x648xbf16>
    %c256_80 = arith.constant 256 : index
    %c0_81 = arith.constant 0 : index
    %80 = vector.load %arg14[%c256_80, %c0_81] : memref<288x648xbf16, #tpu.memory_space<vmem>>, vector<32x648xbf16>
    tpu.vector_store %arg14[%c256_80, %c0_81], %79 {strides = array<i32>} : memref<288x648xbf16, #tpu.memory_space<vmem>>, vector<32x648xbf16>,
    %c0_82 = arith.constant 0 : index
    %c0_83 = arith.constant 0 : index
    %81 = vector.load %arg5[%c0_82, %c0_83] : memref<32x288xbf16, #tpu.memory_space<vmem>>, vector<32x288xbf16>
    %c0_84 = arith.constant 0 : index
    %c0_85 = arith.constant 0 : index
    %82 = vector.load %arg14[%c0_84, %c0_85] : memref<288x648xbf16, #tpu.memory_space<vmem>>, vector<288x648xbf16>
    %cst_86 = arith.constant dense<0.000000e+00> : vector<32x648xf32>
    %83 = tpu.matmul %81, %82, %cst_86 {dimension_numbers = #tpu.dot_dimension_numbers<[1], [0], [0], [1], [0, 0, 1, 1], [], []>} : vector<32x288xbf16>, vector<288x648xbf16>, vector<32x648xf32> -> vector<32x648xf32>
    %c0_87 = arith.constant 0 : index
    %c0_88 = arith.constant 0 : index
    %84 = vector.load %arg6[%c0_87, %c0_88] : memref<32x1xf32, #tpu.memory_space<vmem>>, vector<32x1xf32>
    %85 = vector.broadcast %84 : vector<32x1xf32> to vector<32x648xf32>
    %86 = arith.addf %83, %85 : vector<32x648xf32>
    %c0_89 = arith.constant 0 : index
    %c128_90 = arith.constant 128 : index
    %87 = vector.load %arg12[%c0_89, %c128_90] : memref<32x904xf32, #tpu.memory_space<vmem>>, vector<32x648xf32>
    %88 = arith.addf %86, %87 : vector<32x648xf32>
    %cst_91 = arith.constant 0.000000e+00 : f32
    %89 = vector.broadcast %cst_91 : f32 to vector<32x648xf32>
    %90 = arith.maximumf %88, %89 : vector<32x648xf32>
    %c0_92 = arith.constant 0 : index
    %c0_93 = arith.constant 0 : index
    %91 = vector.load %arg10[%c0_92, %c0_93] : memref<2x648xf32, #tpu.memory_space<vmem>>, vector<2x648xf32>
    %cst_94 = arith.constant dense<0.000000e+00> : vector<2x32xf32>
    %92 = tpu.matmul %91, %90, %cst_94 {dimension_numbers = #tpu.dot_dimension_numbers<[1], [1], [0], [0], [0, 0, 1, 0], [], []>} : vector<2x648xf32>, vector<32x648xf32>, vector<2x32xf32> -> vector<2x32xf32>
    %93 = arith.truncf %92 : vector<2x32xf32> to vector<2x32xbf16>
    %c0_95 = arith.constant 0 : index
    %c0_96 = arith.constant 0 : index
    %94 = vector.load %arg7[%c0_95, %c0_96] : memref<32x4096xbf16, #tpu.memory_space<vmem>>, vector<32x4096xbf16>
    %cst_97 = arith.constant dense<0.000000e+00> : vector<2x4096xf32>
    %95 = tpu.matmul %93, %94, %cst_97 {dimension_numbers = #tpu.dot_dimension_numbers<[1], [0], [0], [1], [0, 0, 1, 1], [], []>} : vector<2x32xbf16>, vector<32x4096xbf16>, vector<2x4096xf32> -> vector<2x4096xf32>
    %c0_98 = arith.constant 0 : index
    %c0_99 = arith.constant 0 : index
    %96 = vector.load %arg8[%c0_98, %c0_99] : memref<1x4096xf32, #tpu.memory_space<vmem>>, vector<1x4096xf32>
    %97 = vector.broadcast %96 : vector<1x4096xf32> to vector<2x4096xf32>
    %98 = arith.addf %95, %97 : vector<2x4096xf32>
    %c0_100 = arith.constant 0 : index
    %c0_101 = arith.constant 0 : index
    %99 = vector.load %arg11[%c0_100, %c0_101] : memref<2x4096xf32, #tpu.memory_space<vmem>>, vector<2x4096xf32>
    tpu.vector_store %arg11[%c0_100, %c0_101], %98 {strides = array<i32>} : memref<2x4096xf32, #tpu.memory_space<vmem>>, vector<2x4096xf32>,
    return
  }
}

</mosaic_0001>

<bundles_post_ra>
// kernel: embedding_net_forward.1
= control target key start
LH: loop header
LB: loop body
LE: loop exit
PB: predicated region body
PF: predicated region fallthrough
CT: control target
= control target key end

     0   :  { %vm216_vm0 = vcmask 261120   ;;  %v7680_v26 = vmov 0   ;;  %s10518_s0 = inlined_call_operand.vmem [shape: bf16[32,648], index: 0, kind: input, shape index: {}]   ;;  %s10519_s1 = inlined_call_operand.vmem [shape: bf16[32,32], index: 1, kind: input, shape index: {}]   ;;  %s10520_s2 = inlined_call_operand.vmem [shape: f32[32,1], index: 2, kind: input, shape index: {}]   ;;  %s10521_s3 = inlined_call_operand.vmem [shape: bf16[32,288], index: 3, kind: input, shape index: {}]   ;;  %s10522_s4 = inlined_call_operand.vmem [shape: f32[32,1], index: 4, kind: input, shape index: {}]   ;;  %s10523_s5 = inlined_call_operand.vmem [shape: bf16[32,288], index: 5, kind: input, shape index: {}]   ;;  %s10524_s6 = inlined_call_operand.vmem [shape: f32[32,1], index: 6, kind: input, shape index: {}]   ;;  %s10525_s7 = inlined_call_operand.vmem [shape: bf16[32,4096], index: 7, kind: input, shape index: {}]   ;;  %s10526_s8 = inlined_call_operand.vmem [shape: f32[1,4096], index: 8, kind: input, shape index: {}]   ;;  %s10527_s9 = inlined_call_operand.vmem [shape: f32[1,648], index: 9, kind: input, shape index: {}]   ;;  %s10528_s10 = inlined_call_operand.vmem [shape: f32[2,648], index: 10, kind: input, shape index: {}]   ;;  %s10529_s11 = inlined_call_operand.hbm [shape: f32[2,4096], index: 11, kind: output, shape index: {}]  }
   0x1   :  { %v6070_v0 = vld [vmem:[%s10518_s0 + $0x30] sm:$0xf]  ;;  %v7344_v1 = vld [vmem:[%s10518_s0 + $0x44] sm:$0xf0]  ;;  %v7341_v2 = vld [vmem:[%s10518_s0 + $0x34] sm:$0xf]  ;;  %7651 = vset.pattern.permute.xlu1 %v7680_v26  ;;  %7650 = vset.pattern.permute.xlu0 %v7680_v26 }
   0x2   :  { %v6071_v3 = vor.u32 %v7344_v1, %v6070_v0  ;;  %v6072_v4 = vld [vmem:[%s10518_s0 + $0x48] sm:$0xf0]  ;;  %v6078_v5 = vld [vmem:[%s10518_s0 + $0x38] sm:$0xf]  ;;  %v7345_v6 = vld [vmem:[%s10518_s0 + $0x4c] sm:$0xf0]  ;;  %7652 = vset.pattern.permute.xlu2 %v7680_v26 }
   0x3   :  { %v6075_v7 = vor.u32 %v7341_v2, %v6072_v4  ;;  %v6079_v8 = vor.u32 %v7345_v6, %v6078_v5  ;;  %v7342_v9 = vld [vmem:[%s10518_s0 + $0x3c] sm:$0xf]  ;;  %v6080_v10 = vld [vmem:[%s10518_s0 + $0x50] sm:$0xf0]  ;;  %v6046_v11 = vld [vmem:[%s10518_s0] sm:$0xf] }
   0x4   :  { %229 = vmatpush.bf16.msra.mxu0 %v6071_v3  ;;  %v6083_v12 = vor.u32 %v7342_v9, %v6080_v10  ;;  %v7338_v13 = vld [vmem:[%s10518_s0 + $0x14] sm:$0xf0]  ;;  %v7335_v14 = vld [vmem:[%s10518_s0 + $0x4] sm:$0xf]  ;;  %v6048_v15 = vld [vmem:[%s10518_s0 + $0x18] sm:$0xf0] }
   0x5   :  { %248 = vmatpush.bf16.msra.mxu1 %v6075_v7  ;;  %267 = vmatpush.bf16.msra.mxu2 %v6079_v8  ;;  %v6047_v16 = vor.u32 %v7338_v13, %v6046_v11  ;;  %v6051_v17 = vor.u32 %v7335_v14, %v6048_v15  ;;  %v6054_v18 = vld [vmem:[%s10518_s0 + $0x8] sm:$0xf]  ;;  %v7339_v19 = vld [vmem:[%s10518_s0 + $0x1c] sm:$0xf0]  ;;  %v7336_v20 = vld [vmem:[%s10518_s0 + $0xc] sm:$0xf] }
   0x6   :  { %286 = vmatpush.bf16.msra.mxu3 %v6083_v12  ;;  %v6055_v21 = vor.u32 %v7339_v19, %v6054_v18  ;;  %v6056_v22 = vld [vmem:[%s10518_s0 + $0x20] sm:$0xf0]  ;;  %v6086_v27 = vld [vmem:[%s10518_s0 + $0x40] sm:$0xf]  ;;  %v7346_v28 = vld [vmem:[%s10518_s0 + $0x54] sm:$0xf0] }
   0x7   :  { %v122_v23 = vld [vmem:[%s10520_s2] sm:$0xff]  ;;  %v6059_v24 = vor.u32 %v7336_v20, %v6056_v22  ;;  %v6088_v30 = vld [vmem:[%s10518_s0 + $0x58] sm:$0xf0]  ;;  %v6087_v31 = vor.u32 %v7346_v28, %v6086_v27  ;;  %v6062_v33 = vld [vmem:[%s10518_s0 + $0x10] sm:$0xf] }
   0x8   :  { %v7333_v25 = vld [vmem:[%s10519_s1] sm:$0xff]  ;;  %230 = vmatpush.bf16.msra.mxu0 %v6047_v16  ;;  %128 = vperm.xlu1 %7651, %v122_v23   ;;  %v7337_v34 = vld [vmem:[%s10518_s0 + $0x14] sm:$0xf]  ;;  %v7340_v35 = vld [vmem:[%s10518_s0 + $0x24] sm:$0xf0] }
   0x9   :  { %v7343_v29 = vld [vmem:[%s10518_s0 + $0x44] sm:$0xf]  ;;  %249 = vmatpush.bf16.msra.mxu1 %v6051_v17  ;;  %268 = vmatpush.bf16.msra.mxu2 %v6055_v21  ;;  %v6064_v36 = vld [vmem:[%s10518_s0 + $0x28] sm:$0xf0] }
   0xa   :  { %v6091_v32 = vor.u32 %v7343_v29, %v6088_v30  ;;  %287 = vmatpush.bf16.msra.mxu3 %v6059_v24 }
   0xb   :  { %16 = vsyncpa [#allocation6], 0  ;;  %6092 = vmatmul.msk.bf16.vlgmr.msra.gmra.mxu0 %vm216_vm0, %v7333_v25  ;;  %v6067_v37 = vor.u32 %v7337_v34, %v6064_v36  ;;  %v123_v38 = vld [vmem:[%s10520_s2 + $0x8] sm:$0xff]  ;;  %v6063_v39 = vor.u32 %v7340_v35, %v6062_v33  ;;  %v124_v41 = vld [vmem:[%s10520_s2 + $0x10] sm:$0xff]  ;;  %v7681_v43 = vmov 0.0   ;;  %vm47_vm1 = vcmask 64512  }
   0xc   :  { %6094 = vmatmul.msk.bf16.vlgmr.msra.gmra.mxu1 %vm216_vm0, %v7333_v25  ;;  %6096 = vmatmul.msk.bf16.vlgmr.msra.gmra.mxu2 %vm216_vm0, %v7333_v25  ;;  %v7334_v40 = vld [vmem:[%s10519_s1 + $0x8] sm:$0xff]  ;;  %v125_v42 = vld [vmem:[%s10520_s2 + $0x18] sm:$0xff]  ;;  %40 = vst [vmem:[#allocation2] sm:$0xff] %v7681_v43  ;;  %v7867_v45 = vld [vmem:[%s10527_s9] sm:$0x3f]  ;;  %s7682_s9 = smov 1  }
   0xd   :  { %324 = vmatpush.bf16.msrb.mxu1 %v6091_v32  ;;  %6098 = vmatmul.msk.bf16.vlgmr.msra.gmra.mxu3 %vm216_vm0, %v7333_v25  ;;  %46 = vst [vmem:[#allocation2 + $0x30] sm:$0xff] %v7681_v43  ;;  %v7871_v48 = vperm.slane %v7867_v45, 0  ;;  %v7875_v51 = vperm.slane %v7867_v45, 1  ;;  %v7889_v60 = vperm.slane %v7867_v45, 2  ;;  %v7894_v1 = vperm.slane %v7867_v45, 3  ;;  %s7683_s19 = smov 110  }
   0xe   :  { %305 = vmatpush.bf16.msrb.mxu0 %v6087_v31  ;;  %138 = vperm.xlu0 %7650, %v124_v41   ;;  %55 = vst [vmem:[#allocation2 + $0x70] sm:$0xff] %v7681_v43  ;;  %s7684_s20 = smov 111   ;;  %s7685_s21 = smov 127   ;;  %v7947_v36 = vperm.slane %v7867_v45, 4  ;;  %vm506_vm2 = vcmask 1043456   ;;  %vm543_vm3 = vcmask 64516  }
   0xf   :  { %63 = vst [vmem:[#allocation2 + $0xb0] sm:$0xff] %v7681_v43  ;;  %s7686_s22 = smov 17   ;;  %s7687_s23 = smov 18   ;;  %vm8025_vm4 = vmor %vm543_vm3, %vm506_vm2  ;;  %vm1361_vm5 = vcmask 900096   ;;  %vm769_vm6 = vcmask 138240   ;;  %vm1232_vm7 = vcmask 908288  }
  0x10   :  { %133 = vperm.xlu1 %7651, %v123_v38   ;;  %71 = vst [vmem:[#allocation2 + $0xf0] sm:$0xff] %v7681_v43  ;;  %s7688_s24 = smov 109   ;;  %s7689_s25 = smov 19   ;;  %vm1490_vm8 = vcmask 891904   ;;  %vm640_vm9 = vcmask 146432   ;;  %vm922_vm10 = vcmask 7168  }
  0x11   :  { %325 = vmatpush.bf16.msrb.mxu1 %v6067_v37  ;;  %79 = vst [vmem:[#allocation3 + $0x30] sm:$0xff] %v7681_v43  ;;  %vm508_vm11 = vcmask 154624   ;;  %vm1103_vm12 = vcmask 1039360   ;;  %vm5980_vm13 = vcmask 1045508   ;;  %vm5978_vm14 = vcmask 1041408   ;;  %s6027_s1 = sshll.u32 %s10529_s11, 4  ;;  %s6028_s1 = int_to_ptr.hbm [resolvable:$true] %s6027_s1 }
  0x12   :  { %306 = vmatpush.bf16.msrb.mxu0 %v6063_v39  ;;  %87 = vst [vmem:[#allocation3 + $0x70] sm:$0xff] %v7681_v43  ;;  %v7952_v39 = vperm.slane %v7867_v45, 5 }
  0x13   :  { %95 = vst [vmem:[#allocation3 + $0xb0] sm:$0xff] %v7681_v43 }
  0x14   :  { %103 = vst [vmem:[#allocation3 + $0xf0] sm:$0xff] %v7681_v43 }
  0x15   :  { %10584 = vst [vmem:[#allocation8_spill] sm:$0xff] %v7894_v1 }
  0x16   :  { %143 = vperm.xlu0 %7650, %v125_v42   ;;  %10585 = vst [vmem:[#allocation9_spill] sm:$0xff] %v7947_v36 }
  0x17   :  { %10586 = vst [vmem:[#allocation10_spill] sm:$0xff] %v7952_v39 }
  0x1b   :  { %6093 = vmatmul.msk.bf16.gmra.mxu0 %vm216_vm0, %v7334_v40 }
  0x1c   :  { %6095 = vmatmul.msk.bf16.gmra.mxu1 %vm216_vm0, %v7334_v40  ;;  %6097 = vmatmul.msk.bf16.gmra.mxu2 %vm216_vm0, %v7334_v40 }
  0x1d   :  { %6099 = vmatmul.msk.bf16.gmra.mxu3 %vm216_vm0, %v7334_v40 }
  0x2b   :  { %6100 = vmatmul.msk.bf16.vlgmr.msrb.gmra.mxu0 %vm216_vm0, %v7333_v25 }
  0x2c   :  { %6102 = vmatmul.msk.bf16.vlgmr.msrb.gmra.mxu1 %vm216_vm0, %v7333_v25 }
  0x3b   :  { %6101 = vmatmul.msk.bf16.gmra.mxu0 %vm216_vm0, %v7334_v40 }
  0x3c   :  { %6103 = vmatmul.msk.bf16.gmra.mxu1 %vm216_vm0, %v7334_v40 }
  0x7a   :  { %v7862_v44 = vpop.permute.xlu1 %128 }
  0x80   :  { %v7957_v40 = vpop.permute.xlu0 %138 }
  0x82   :  { %v7881_v56 = vpop.permute.xlu1 %133 }
  0x88   :  { %v232_v46 = vpop.f32.mrf.mxu0 }
  0x89   :  { %v233_v47 = vadd.f32 %v232_v46, %v7862_v44  ;;  %v251_v49 = vpop.f32.mrf.mxu1 }
  0x8a   :  { %v252_v50 = vadd.f32 %v251_v49, %v7862_v44 }
  0x8b   :  { %v337_v52 = vmax.f32 %v233_v47, 0.0 }
  0x8c   :  { %v338_v53 = vmax.f32 %v252_v50, 0.0 }
  0x8d   :  { %v374_v54 = vmul.f32 %v7871_v48, %v337_v52 }
  0x8e   :  { %v7879_v55 = vmul.f32 %v7875_v51, %v338_v53 }
  0x8f   :  { %398 = vst [vmem:[#allocation2 + $0x8] sm:$0xff] %v374_v54  ;;  %v270_v57 = vpop.f32.mrf.mxu2  ;;  %v7884_v58 = vpack.c.bf16 %v374_v54, %v7681_v43 }
  0x90   :  { %399 = vst [vmem:[#allocation2 + $0x10] sm:$0xff] %v7879_v55  ;;  %v271_v59 = vadd.f32 %v270_v57, %v7862_v44  ;;  %v289_v61 = vpop.f32.mrf.mxu3  ;;  %v234_v62 = vpop.f32.mrf.mxu0  ;;  %v1300_v63 = vpack.c.bf16 %v7879_v55, %v374_v54 }
  0x91   :  { %v290_v0 = vadd.f32 %v289_v61, %v7862_v44  ;;  %v235_v2 = vadd.f32 %v234_v62, %v7881_v56  ;;  %v253_v3 = vpop.f32.mrf.mxu1  ;;  %873 = vrot.lane.b32.xlu0 %v7884_v58, %s7682_s9 }
  0x92   :  { %v339_v4 = vmax.f32 %v271_v59, 0.0  ;;  %v254_v5 = vadd.f32 %v253_v3, %v7881_v56  ;;  %1324 = vrot.lane.b32.xlu1 %v1300_v63, %s7683_s19  ;;  %1195 = vrot.lane.b32.xlu2 %v1300_v63, %s7684_s20 }
  0x93   :  { %v340_v6 = vmax.f32 %v290_v0, 0.0  ;;  %v343_v7 = vmax.f32 %v235_v2, 0.0 }
  0x94   :  { %v376_v8 = vmul.f32 %v7889_v60, %v339_v4  ;;  %v344_v9 = vmax.f32 %v254_v5, 0.0 }
  0x95   :  { %v7904_v10 = vmul.f32 %v7894_v1, %v340_v6  ;;  %v7907_v11 = vmul.f32 %v7871_v48, %v343_v7  ;;  %v144_v6 = vpop.permute.xlu0 %143 }
  0x96   :  { %400 = vst [vmem:[#allocation2 + $0x18] sm:$0xff] %v376_v8  ;;  %v7910_v12 = vmul.f32 %v7875_v51, %v344_v9  ;;  %v970_v13 = vld [vmem:[#allocation2 + $0x8] sm:$0xff]  ;;  %v580_v33 = vpack.c.bf16 %v376_v8, %v7879_v55 }
  0x97   :  { %401 = vst [vmem:[#allocation2 + $0x20] sm:$0xff] %v7904_v10  ;;  %v272_v14 = vpop.f32.mrf.mxu2  ;;  %v971_v15 = vld [vmem:[#allocation2 + $0x10] sm:$0xff]  ;;  %v7926_v25 = vpack.c.bf16 %v7904_v10, %v376_v8 }
  0x98   :  { %404 = vst [vmem:[#allocation2 + $0x48] sm:$0xff] %v7907_v11  ;;  %v273_v16 = vadd.f32 %v272_v14, %v7881_v56  ;;  %v291_v17 = vpop.f32.mrf.mxu3  ;;  %v237_v18 = vpop.f32.mrf.mxu0  ;;  %v994_v21 = vpack.c.bf16 %v971_v15, %v970_v13 }
  0x99   :  { %405 = vst [vmem:[#allocation2 + $0x50] sm:$0xff] %v7910_v12  ;;  %v292_v19 = vadd.f32 %v291_v17, %v7881_v56  ;;  %v256_v20 = vpop.f32.mrf.mxu1  ;;  %1066 = vrot.lane.b32.xlu0 %v1300_v63, %s7685_s21  ;;  %v238_v46 = vadd.f32 %v237_v18, %v7957_v40 }
  0x9a   :  { %v345_v22 = vmax.f32 %v273_v16, 0.0  ;;  %732 = vrot.lane.b32.xlu1 %v7884_v58, %s7686_s22  ;;  %603 = vrot.lane.b32.xlu2 %v7884_v58, %s7687_s23  ;;  %1006 = vst [vmem:[#allocation4 + $0x180] sm:$0xff] %v994_v21  ;;  %v257_v47 = vadd.f32 %v256_v20, %v7957_v40 }
  0x9b   :  { %v346_v23 = vmax.f32 %v292_v19, 0.0  ;;  %1007 = vst [vmem:[#allocation4 + $0x188] sm:$0xff] %v7926_v25  ;;  %v349_v53 = vmax.f32 %v238_v46, 0.0 }
  0x9c   :  { %v7923_v24 = vmul.f32 %v7889_v60, %v345_v22  ;;  %v350_v54 = vmax.f32 %v257_v47, 0.0 }
  0x9d   :  { %v7929_v26 = vmul.f32 %v7894_v1, %v346_v23  ;;  %v7969_v59 = vmul.f32 %v7871_v48, %v349_v53 }
  0x9e   :  { %406 = vst [vmem:[#allocation2 + $0x58] sm:$0xff] %v7923_v24  ;;  %v7978_v0 = vmul.f32 %v7875_v51, %v350_v54 }
  0x9f   :  { %407 = vst [vmem:[#allocation2 + $0x60] sm:$0xff] %v7929_v26  ;;  %v976_v27 = vld [vmem:[#allocation2 + $0x48] sm:$0xff]  ;;  %v7935_v28 = vpack.c.bf16 %v7929_v26, %v7923_v24  ;;  %v275_v41 = vpop.f32.mrf.mxu2 }
  0xa0   :  { %v239_v29 = vpop.f32.mrf.mxu0  ;;  %v977_v30 = vld [vmem:[#allocation2 + $0x50] sm:$0xff]  ;;  %v276_v49 = vadd.f32 %v275_v41, %v7957_v40  ;;  %v294_v50 = vpop.f32.mrf.mxu3  ;;  %410 = vst [vmem:[#allocation2 + $0x88] sm:$0xff] %v7969_v59 }
  0xa1   :  { %v258_v31 = vpop.f32.mrf.mxu1  ;;  %1197 = vrot.lane.b32.xlu0 %v7926_v25, %s7684_s20  ;;  %v997_v32 = vpack.c.bf16 %v977_v30, %v976_v27  ;;  %1010 = vst [vmem:[#allocation4 + $0x1a0] sm:$0xff] %v7935_v28  ;;  %v295_v45 = vadd.f32 %v294_v50, %v7957_v40  ;;  %v240_v9 = vadd.f32 %v239_v29, %v144_v6 }
  0xa2   :  { %1453 = vrot.lane.b32.xlu1 %v1300_v63, %s7688_s24  ;;  %470 = vrot.lane.b32.xlu2 %v7884_v58, %s7689_s25  ;;  %v351_v55 = vmax.f32 %v276_v49, 0.0  ;;  %411 = vst [vmem:[#allocation2 + $0x90] sm:$0xff] %v7978_v0  ;;  %v259_v13 = vadd.f32 %v258_v31, %v144_v6 }
  0xa3   :  { %1009 = vst [vmem:[#allocation4 + $0x198] sm:$0xff] %v997_v32  ;;  %v352_v58 = vmax.f32 %v295_v45, 0.0  ;;  %v355_v19 = vmax.f32 %v240_v9, 0.0 }
  0xa4   :  { %v7972_v61 = vmul.f32 %v7889_v60, %v351_v55  ;;  %v356_v20 = vmax.f32 %v259_v13, 0.0 }
  0xa5   :  { %v7981_v2 = vmul.f32 %v7894_v1, %v352_v58  ;;  %v8003_v29 = vmul.f32 %v7871_v48, %v355_v19 }
  0xa6   :  { %412 = vst [vmem:[#allocation2 + $0x98] sm:$0xff] %v7972_v61  ;;  %v393_v30 = vmul.f32 %v7875_v51, %v356_v20 }
  0xa7   :  { %v277_v7 = vpop.f32.mrf.mxu2  ;;  %413 = vst [vmem:[#allocation2 + $0xa0] sm:$0xff] %v7981_v2 }
  0xa8   :  { %v308_v34 = vpop.f32.mrf.mxu0  ;;  %v278_v14 = vadd.f32 %v277_v7, %v144_v6  ;;  %v296_v15 = vpop.f32.mrf.mxu3  ;;  %416 = vst [vmem:[#allocation2 + $0xc8] sm:$0xff] %v8003_v29 }
  0xa9   :  { %v309_v35 = vadd.f32 %v308_v34, %v7862_v44  ;;  %v327_v37 = vpop.f32.mrf.mxu1  ;;  %605 = vrot.lane.b32.xlu0 %v580_v33, %s7687_s23  ;;  %v297_v17 = vadd.f32 %v296_v15, %v144_v6  ;;  %417 = vst [vmem:[#allocation2 + $0xd0] sm:$0xff] %v393_v30 }
  0xaa   :  { %v328_v38 = vadd.f32 %v327_v37, %v7862_v44  ;;  %875 = vrot.lane.b32.xlu1 %v580_v33, %s7682_s9  ;;  %1326 = vrot.lane.b32.xlu2 %v7926_v25, %s7683_s19  ;;  %v357_v21 = vmax.f32 %v278_v14, 0.0  ;;  %v983_v14 = vld [vmem:[#allocation2 + $0x90] sm:$0xff] }
  0xab   :  { %v341_v42 = vmax.f32 %v309_v35, 0.0  ;;  %v358_v23 = vmax.f32 %v297_v17, 0.0 }
  0xac   :  { %v342_v44 = vmax.f32 %v328_v38, 0.0  ;;  %v394_v31 = vmul.f32 %v7889_v60, %v357_v21 }
  0xad   :  { %v7964_v52 = vmul.f32 %v7947_v36, %v341_v42  ;;  %v395_v34 = vmul.f32 %v7894_v1, %v358_v23 }
  0xae   :  { %v379_v57 = vmul.f32 %v7952_v39, %v342_v44  ;;  %418 = vst [vmem:[#allocation2 + $0xd8] sm:$0xff] %v394_v31  ;;  %v8060_v7 = vpack.c.bf16 %v394_v31, %v393_v30 }
  0xaf   :  { %402 = vst [vmem:[#allocation2 + $0x28] sm:$0xff] %v7964_v52  ;;  %v843_v62 = vpack.c.bf16 %v7964_v52, %v7904_v10  ;;  %v988_v15 = vld [vmem:[#allocation2 + $0xc8] sm:$0xff] }
  0xb0   :  { %403 = vst.msk [vmem:[#allocation2 + $0x30] sm:$0xff] %vm47_vm1, %v379_v57  ;;  %v310_v63 = vpop.f32.mrf.mxu0  ;;  %v989_v17 = vld [vmem:[#allocation2 + $0xd0] sm:$0xff] }
  0xb1   :  { %v311_v3 = vadd.f32 %v310_v63, %v7881_v56  ;;  %v329_v4 = vpop.f32.mrf.mxu1  ;;  %472 = vrot.lane.b32.xlu0 %v580_v33, %s7689_s25  ;;  %419 = vst [vmem:[#allocation2 + $0xe0] sm:$0xff] %v395_v34  ;;  %v8048_v63 = vpack.c.bf16 %v7981_v2, %v7972_v61  ;;  %v1003_v21 = vpack.c.bf16 %v989_v17, %v988_v15 }
  0xb2   :  { %v330_v5 = vadd.f32 %v329_v4, %v7881_v56  ;;  %1068 = vrot.lane.b32.xlu1 %v7926_v25, %s7685_s21  ;;  %734 = vrot.lane.b32.xlu2 %v580_v33, %s7686_s22  ;;  %v7994_v56 = vpack.c.bf16 %v7910_v12, %v7907_v11 }
  0xb3   :  { %v347_v8 = vmax.f32 %v311_v3, 0.0  ;;  %v8052_v3 = vpack.c.bf16 %v7972_v61, %v7978_v0  ;;  %1013 = vst [vmem:[#allocation4 + $0x1b8] sm:$0xff] %v8048_v63 }
  0xb4   :  { %v348_v16 = vmax.f32 %v330_v5, 0.0  ;;  %v8056_v5 = vpack.c.bf16 %v393_v30, %v8003_v29  ;;  %1015 = vst [vmem:[#allocation4 + $0x1c8] sm:$0xff] %v1003_v21 }
  0xb5   :  { %v7998_v18 = vmul.f32 %v7947_v36, %v347_v8 }
  0xb6   :  { %v385_v22 = vmul.f32 %v7952_v39, %v348_v16  ;;  %v846_v16 = vpack.c.bf16 %v7923_v24, %v7910_v12  ;;  %v1177_v12 = vpack.c.bf16 %v7978_v0, %v7969_v59  ;;  %v585_v24 = vpack.c.bf16 %v7969_v59, %v7681_v43 }
  0xb7   :  { %v975_v27 = vld [vmem:[#allocation2 + $0x30] sm:$0xff]  ;;  %408 = vst [vmem:[#allocation2 + $0x68] sm:$0xff] %v7998_v18  ;;  %v847_v32 = vpack.c.bf16 %v7998_v18, %v7929_v26 }
  0xb8   :  { %409 = vst.msk [vmem:[#allocation2 + $0x70] sm:$0xff] %vm47_vm1, %v385_v22  ;;  %v313_v33 = vpop.f32.mrf.mxu0  ;;  %v8012_v35 = vpack.c.bf16 %v975_v27, %v7964_v52 }
  0xb9   :  { %1330 = vrot.lane.b32.xlu0 %v7994_v56, %s7683_s19  ;;  %v314_v37 = vadd.f32 %v313_v33, %v7957_v40  ;;  %v332_v38 = vpop.f32.mrf.mxu1 }
  0xba   :  { %1201 = vrot.lane.b32.xlu1 %v7994_v56, %s7684_s20  ;;  %1455 = vrot.lane.b32.xlu2 %v7926_v25, %s7688_s24  ;;  %v333_v41 = vadd.f32 %v332_v38, %v7957_v40  ;;  %1008 = vst.msk [vmem:[#allocation4 + $0x190] sm:$0xff] %vm8025_vm4, %v8012_v35  ;;  %v711_v40 = vpack.c.bf16 %v7907_v11, %v7681_v43 }
  0xbb   :  { %v353_v46 = vmax.f32 %v314_v37, 0.0 }
  0xbc   :  { %v354_v47 = vmax.f32 %v333_v41, 0.0 }
  0xbd   :  { %v390_v49 = vmul.f32 %v7947_v36, %v353_v46 }
  0xbe   :  { %v391_v25 = vmul.f32 %v7952_v39, %v354_v47 }
  0xbf   :  { %414 = vst [vmem:[#allocation2 + $0xa8] sm:$0xff] %v390_v49  ;;  %v981_v50 = vld [vmem:[#allocation2 + $0x70] sm:$0xff]  ;;  %v8066_v9 = vpack.c.bf16 %v390_v49, %v7981_v2  ;;  %v982_v2 = vld [vmem:[#allocation2 + $0x88] sm:$0xff] }
  0xc0   :  { %415 = vst.msk [vmem:[#allocation2 + $0xb0] sm:$0xff] %vm47_vm1, %v391_v25  ;;  %v315_v44 = vpop.f32.mrf.mxu0  ;;  %v999_v45 = vpack.c.bf16 %v981_v50, %v7998_v18  ;;  %v1000_v19 = vpack.c.bf16 %v983_v14, %v982_v2 }
  0xc1   :  { %738 = vrot.lane.b32.xlu0 %v711_v40, %s7686_s22  ;;  %v316_v53 = vadd.f32 %v315_v44, %v144_v6  ;;  %v334_v54 = vpop.f32.mrf.mxu1 }
  0xc2   :  { %609 = vrot.lane.b32.xlu1 %v711_v40, %s7687_s23  ;;  %881 = vrot.lane.b32.xlu2 %v711_v40, %s7682_s9  ;;  %v335_v55 = vadd.f32 %v334_v54, %v144_v6  ;;  %1011 = vst.msk [vmem:[#allocation4 + $0x1a8] sm:$0xff] %vm8025_vm4, %v999_v45  ;;  %v8058_v6 = vpack.c.bf16 %v395_v34, %v394_v31 }
  0xc3   :  { %v359_v11 = vmax.f32 %v316_v53, 0.0  ;;  %1012 = vst [vmem:[#allocation4 + $0x1b0] sm:$0xff] %v1000_v19 }
  0xc4   :  { %v360_v57 = vmax.f32 %v335_v55, 0.0  ;;  %1016 = vst [vmem:[#allocation4 + $0x1d0] sm:$0xff] %v8058_v6 }
  0xc5   :  { %v8044_v58 = vmul.f32 %v7947_v36, %v359_v11 }
  0xc6   :  { %v397_v4 = vmul.f32 %v7952_v39, %v360_v57 }
  0xc7   :  { %v8062_v8 = vld [vmem:[#allocation2 + $0xb0] sm:$0xff]  ;;  %420 = vst [vmem:[#allocation2 + $0xe8] sm:$0xff] %v8044_v58  ;;  %v8069_v13 = vpack.c.bf16 %v8044_v58, %v395_v34  ;;  %v853_v34 = vpack.c.bf16 %v8003_v29, %v7681_v43 }
  0xc8   :  { %421 = vst.msk [vmem:[#allocation2 + $0xf0] sm:$0xff] %vm47_vm1, %v397_v4  ;;  %v8073_v61 = vpack.c.bf16 %v8062_v8, %v390_v49 }
  0xc9   :  { %1459 = vrot.lane.b32.xlu0 %v7994_v56, %s7688_s24 }
  0xca   :  { %476 = vrot.lane.b32.xlu1 %v711_v40, %s7689_s25  ;;  %1072 = vrot.lane.b32.xlu2 %v7994_v56, %s7685_s21  ;;  %1014 = vst.msk [vmem:[#allocation4 + $0x1c0] sm:$0xff] %vm8025_vm4, %v8073_v61 }
  0xcf   :  { %v993_v20 = vld [vmem:[#allocation2 + $0xf0] sm:$0xff] }
  0xd0   :  { %v1005_v56 = vpack.c.bf16 %v993_v20, %v8044_v58 }
  0xd1   :  { %883 = vrot.lane.b32.xlu0 %v846_v16, %s7682_s9 }
  0xd2   :  { %1332 = vrot.lane.b32.xlu1 %v7935_v28, %s7683_s19  ;;  %1203 = vrot.lane.b32.xlu2 %v7935_v28, %s7684_s20  ;;  %1017 = vst.msk [vmem:[#allocation4 + $0x1d8] sm:$0xff] %vm8025_vm4, %v1005_v56 }
  0xd9   :  { %1074 = vrot.lane.b32.xlu0 %v7935_v28, %s7685_s21 }
  0xda   :  { %740 = vrot.lane.b32.xlu1 %v846_v16, %s7686_s22  ;;  %611 = vrot.lane.b32.xlu2 %v846_v16, %s7687_s23 }
  0xe1   :  { %1207 = vrot.lane.b32.xlu0 %v1177_v12, %s7684_s20 }
  0xe2   :  { %1461 = vrot.lane.b32.xlu1 %v7935_v28, %s7688_s24  ;;  %478 = vrot.lane.b32.xlu2 %v846_v16, %s7689_s25 }
  0xe9   :  { %615 = vrot.lane.b32.xlu0 %v585_v24, %s7687_s23 }
  0xea   :  { %1078 = vrot.lane.b32.xlu1 %v1177_v12, %s7685_s21  ;;  %889 = vrot.lane.b32.xlu2 %v585_v24, %s7682_s9 }
  0xec   :  { %v1196_v22 = vpop.permute.xlu2 %1195 }
  0xed   :  { %v1219_v40 = vrot.slane %v1196_v22, 4 }
  0xf1   :  { %1465 = vrot.lane.b32.xlu0 %v1177_v12, %s7688_s24 }
  0xf2   :  { %482 = vrot.lane.b32.xlu1 %v585_v24, %s7689_s25  ;;  %1336 = vrot.lane.b32.xlu2 %v1177_v12, %s7683_s19 }
  0xf4   :  { %v604_v0 = vpop.permute.xlu2 %603 }
  0xf5   :  { %v627_v4 = vrot.slane %v604_v0, 4 }
  0xf9   :  { %1338 = vrot.lane.b32.xlu0 %v8048_v63, %s7683_s19 }
  0xfa   :  { %1209 = vrot.lane.b32.xlu1 %v8048_v63, %s7684_s20  ;;  %744 = vrot.lane.b32.xlu2 %v585_v24, %s7686_s22 }
  0xfc   :  { %v8118_v28 = vpop.permute.xlu2 %470 }
  0xfd   :  { %v494_v24 = vrot.slane %v8118_v28, 4 }
 0x101   :  { %746 = vrot.lane.b32.xlu0 %v8052_v3, %s7686_s22 }
 0x102   :  { %617 = vrot.lane.b32.xlu1 %v8052_v3, %s7687_s23  ;;  %891 = vrot.lane.b32.xlu2 %v8052_v3, %s7682_s9 }
 0x103   :  { %v874_v59 = vpop.permute.xlu0 %873 }
 0x104   :  { %v1325_v23 = vpop.permute.xlu1 %1324  ;;  %v8126_v27 = vpop.permute.xlu2 %1326  ;;  %v905_v16 = vrot.slane %v874_v59, 4 }
 0x105   :  { %v1348_v30 = vrot.slane %v1325_v23, 4  ;;  %v1349_v31 = vrot.slane %v8126_v27, 4 }
 0x107   :  { %v1360_v33 = vsel %vm506_vm2, %v1348_v30, %v1349_v31 }
 0x108   :  { %v1362_v37 = vsel %vm1361_vm5, %v1325_v23, %v1360_v33 }
 0x109   :  { %1393 = vst [vmem:[#allocation4 + $0x2a0] sm:$0xff] %v1362_v37  ;;  %897 = vrot.lane.b32.xlu0 %v853_v34, %s7682_s9 }
 0x10a   :  { %1467 = vrot.lane.b32.xlu1 %v8048_v63, %s7688_s24  ;;  %1080 = vrot.lane.b32.xlu2 %v8048_v63, %s7685_s21 }
 0x10b   :  { %v1067_v38 = vpop.permute.xlu0 %1066 }
 0x10c   :  { %v733_v41 = vpop.permute.xlu1 %732  ;;  %v8140_v46 = vpop.permute.xlu2 %734 }
 0x10d   :  { %v756_v47 = vrot.slane %v733_v41, 4  ;;  %v757_v49 = vrot.slane %v8140_v46, 4 }
 0x10f   :  { %v768_v43 = vsel %vm506_vm2, %v756_v47, %v757_v49 }
 0x110   :  { %v770_v29 = vsel %vm769_vm6, %v733_v41, %v768_v43 }
 0x111   :  { %801 = vst [vmem:[#allocation4 + $0xc0] sm:$0xff] %v770_v29  ;;  %1084 = vrot.lane.b32.xlu0 %v8056_v5, %s7685_s21 }
 0x112   :  { %1342 = vrot.lane.b32.xlu1 %v8056_v5, %s7683_s19  ;;  %484 = vrot.lane.b32.xlu2 %v8052_v3, %s7689_s25 }
 0x113   :  { %v8153_v25 = vpop.permute.xlu0 %1197 }
 0x114   :  { %v10539_v50 = vrot.slane %v8153_v25, 4  ;;  %v1454_v44 = vpop.permute.xlu1 %1453  ;;  %v8156_v45 = vpop.permute.xlu2 %1455 }
 0x115   :  { %v1477_v53 = vrot.slane %v1454_v44, 4  ;;  %v10531_v54 = vrot.slane %v8156_v45, 4 }
 0x116   :  { %v1231_v55 = vsel %vm506_vm2, %v1219_v40, %v10539_v50 }
 0x117   :  { %v1233_v11 = vsel %vm1232_vm7, %v1196_v22, %v1231_v55  ;;  %v1489_v57 = vsel %vm506_vm2, %v1477_v53, %v10531_v54 }
 0x118   :  { %1264 = vst [vmem:[#allocation4 + $0x240] sm:$0xff] %v1233_v11  ;;  %v1491_v63 = vsel %vm1490_vm8, %v1454_v44, %v1489_v57 }
 0x119   :  { %1522 = vst [vmem:[#allocation4 + $0x300] sm:$0xff] %v1491_v63  ;;  %488 = vrot.lane.b32.xlu0 %v853_v34, %s7689_s25 }
 0x11a   :  { %750 = vrot.lane.b32.xlu1 %v853_v34, %s7686_s22  ;;  %1213 = vrot.lane.b32.xlu2 %v8056_v5, %s7684_s20 }
 0x11b   :  { %v8171_v3 = vpop.permute.xlu0 %605 }
 0x11c   :  { %v10536_v2 = vrot.slane %v8171_v3, 4  ;;  %v8174_v14 = vpop.permute.xlu1 %875  ;;  %v8176_v15 = vpop.permute.xlu2 %881 }
 0x11d   :  { %v906_v17 = vrot.slane %v8174_v14, 4 }
 0x11e   :  { %v639_v19 = vsel %vm506_vm2, %v627_v4, %v10536_v2 }
 0x11f   :  { %v641_v20 = vsel %vm640_vm9, %v604_v0, %v639_v19  ;;  %v921_v21 = vsel %vm506_vm2, %v905_v16, %v906_v17 }
 0x120   :  { %672 = vst [vmem:[#allocation4 + $0x60] sm:$0xff] %v641_v20  ;;  %v923_v56 = vsel %vm922_vm10, %v874_v59, %v921_v21  ;;  %v1090_v59 = vrot.slane %v1067_v38, 4  ;;  %v8248_v20 = vld [vmem:[#allocation2 + $0x70] sm:$0xff] }
 0x121   :  { %958 = vst [vmem:[#allocation4 + $0x120] sm:$0xff] %v923_v56  ;;  %1215 = vrot.lane.b32.xlu0 %v8058_v6, %s7684_s20  ;;  %v1305_v26 = vpack.c.bf16 %v8248_v20, %v7998_v18 }
 0x122   :  { %899 = vrot.lane.b32.xlu1 %v8060_v7, %s7682_s9  ;;  %621 = vrot.lane.b32.xlu2 %v853_v34, %s7687_s23 }
 0x123   :  { %v8192_v12 = vpop.permute.xlu0 %472 }
 0x124   :  { %v10532_v22 = vrot.slane %v8192_v12, 4  ;;  %v8196_v0 = vpop.permute.xlu1 %1068  ;;  %v8198_v23 = vpop.permute.xlu2 %1072 }
 0x125   :  { %v10535_v30 = vrot.slane %v8196_v0, 4 }
 0x126   :  { %v507_v33 = vsel %vm506_vm2, %v494_v24, %v10532_v22 }
 0x127   :  { %v509_v34 = vsel %vm508_vm11, %v8118_v28, %v507_v33  ;;  %v1102_v37 = vsel %vm506_vm2, %v1090_v59, %v10535_v30 }
 0x128   :  { %540 = vst [vmem:[#allocation4] sm:$0xff] %v509_v34  ;;  %v1104_v41 = vsel %vm1103_vm12, %v1067_v38, %v1102_v37 }
 0x129   :  { %1135 = vst [vmem:[#allocation4 + $0x1e0] sm:$0xff] %v1104_v41  ;;  %623 = vrot.lane.b32.xlu0 %v8060_v7, %s7687_s23 }
 0x12a   :  { %1086 = vrot.lane.b32.xlu1 %v8058_v6, %s7685_s21  ;;  %1471 = vrot.lane.b32.xlu2 %v8056_v5, %s7688_s24 }
 0x12b   :  { %v1331_v47 = vpop.permute.xlu0 %1330 }
 0x12c   :  { %v1202_v43 = vpop.permute.xlu1 %1201  ;;  %v8216_v28 = vpop.permute.xlu2 %1203  ;;  %v1351_v34 = vrot.slane %v1331_v47, 4 }
 0x12d   :  { %v1222_v29 = vrot.slane %v1202_v43, 4  ;;  %v10541_v40 = vrot.slane %v8216_v28, 4 }
 0x12f   :  { %v1237_v38 = vsel %vm506_vm2, %v1222_v29, %v10541_v40 }
 0x130   :  { %v1238_v44 = vsel %vm1232_vm7, %v1202_v43, %v1237_v38  ;;  %v688_v38 = vld [vmem:[#allocation2 + $0x20] sm:$0xff] }
 0x131   :  { %1267 = vst [vmem:[#allocation4 + $0x258] sm:$0xff] %v1238_v44  ;;  %1473 = vrot.lane.b32.xlu0 %v8058_v6, %s7688_s24 }
 0x132   :  { %490 = vrot.lane.b32.xlu1 %v8060_v7, %s7689_s25  ;;  %1344 = vrot.lane.b32.xlu2 %v8058_v6, %s7683_s19 }
 0x133   :  { %v739_v5 = vpop.permute.xlu0 %738 }
 0x134   :  { %v610_v53 = vpop.permute.xlu1 %609  ;;  %v8229_v55 = vpop.permute.xlu2 %611 }
 0x135   :  { %v630_v11 = vrot.slane %v610_v53, 4  ;;  %v10537_v57 = vrot.slane %v8229_v55, 4 }
 0x137   :  { %v645_v63 = vsel %vm506_vm2, %v630_v11, %v10537_v57  ;;  %v1093_v11 = vrot.slane %v8198_v23, 4 }
 0x138   :  { %v646_v4 = vsel %vm640_vm9, %v610_v53, %v645_v63  ;;  %v710_v53 = vpack.c.bf16 %v7964_v52, %v688_v38  ;;  %v759_v52 = vrot.slane %v739_v5, 4 }
 0x139   :  { %675 = vst [vmem:[#allocation4 + $0x78] sm:$0xff] %v646_v4  ;;  %877 = vrot.lane.b32.xlu0 %v843_v62, %s7682_s9 }
 0x13a   :  { %885 = vrot.lane.b32.xlu1 %v847_v32, %s7682_s9  ;;  %752 = vrot.lane.b32.xlu2 %v8060_v7, %s7686_s22  ;;  %v909_v7 = vrot.slane %v8176_v15, 4 }
 0x13b   :  { %v1460_v6 = vpop.permute.xlu0 %1459 }
 0x13c   :  { %v477_v16 = vpop.permute.xlu1 %476  ;;  %v8246_v19 = vpop.permute.xlu2 %478 }
 0x13d   :  { %v497_v21 = vrot.slane %v477_v16, 4  ;;  %v10533_v56 = vrot.slane %v8246_v19, 4 }
 0x13f   :  { %v513_v10 = vsel %vm506_vm2, %v497_v21, %v10533_v56  ;;  %v8293_v21 = vld [vmem:[#allocation2 + $0xf0] sm:$0xff] }
 0x140   :  { %v514_v62 = vsel %vm508_vm11, %v477_v16, %v513_v10 }
 0x141   :  { %546 = vst [vmem:[#allocation4 + $0x18] sm:$0xff] %v514_v62  ;;  %1334 = vrot.lane.b32.xlu0 %v1305_v26, %s7683_s19 }
 0x142   :  { %1340 = vrot.lane.b32.xlu1 %v8073_v61, %s7683_s19  ;;  %1328 = vrot.lane.b32.xlu2 %v8012_v35, %s7683_s19 }
 0x143   :  { %v8262_v32 = vpop.permute.xlu0 %883 }
 0x144   :  { %v910_v24 = vrot.slane %v8262_v32, 4  ;;  %v8266_v59 = vpop.permute.xlu1 %1332  ;;  %v890_v33 = vpop.permute.xlu2 %889 }
 0x145   :  { %v10542_v37 = vrot.slane %v8266_v59, 4  ;;  %v10590_v39 = vrot.slane %v8266_v59, 4 }
 0x146   :  { %v928_v41 = vsel %vm506_vm2, %v909_v7, %v910_v24 }
 0x147   :  { %v929_v43 = vsel %vm922_vm10, %v8176_v15, %v928_v41  ;;  %v1366_v29 = vsel %vm506_vm2, %v1351_v34, %v10542_v37  ;;  %v8306_v34 = vpack.c.bf16 %v8293_v21, %v8044_v58  ;;  %v8319_v58 = vld [vmem:[#allocation2 + $0x60] sm:$0xff] }
 0x148   :  { %961 = vst [vmem:[#allocation4 + $0x138] sm:$0xff] %v929_v43  ;;  %v1367_v44 = vsel %vm1361_vm5, %v1331_v47, %v1366_v29 }
 0x149   :  { %1396 = vst [vmem:[#allocation4 + $0x2b8] sm:$0xff] %v1367_v44  ;;  %1211 = vrot.lane.b32.xlu0 %v8073_v61, %s7684_s20 }
 0x14a   :  { %748 = vrot.lane.b32.xlu1 %v8066_v9, %s7686_s22  ;;  %736 = vrot.lane.b32.xlu2 %v710_v53, %s7686_s22  ;;  %v713_v53 = vpack.c.bf16 %v7998_v18, %v8319_v58 }
 0x14b   :  { %v8284_v15 = vpop.permute.xlu0 %1074 }
 0x14c   :  { %v10534_v63 = vrot.slane %v8284_v15, 4  ;;  %v8288_v4 = vpop.permute.xlu1 %740  ;;  %v8290_v47 = vpop.permute.xlu2 %1336 }
 0x14d   :  { %v10540_v16 = vrot.slane %v8288_v4, 4  ;;  %v1354_v56 = vrot.slane %v8290_v47, 4 }
 0x14e   :  { %v1108_v10 = vsel %vm506_vm2, %v1093_v11, %v10534_v63 }
 0x14f   :  { %v1109_v26 = vsel %vm1103_vm12, %v8198_v23, %v1108_v10  ;;  %v774_v62 = vsel %vm506_vm2, %v759_v52, %v10540_v16 }
 0x150   :  { %1138 = vst [vmem:[#allocation4 + $0x1f8] sm:$0xff] %v1109_v26  ;;  %v775_v7 = vsel %vm769_vm6, %v739_v5, %v774_v62  ;;  %v1480_v5 = vrot.slane %v1460_v6, 4  ;;  %v913_v62 = vrot.slane %v890_v33, 4 }
 0x151   :  { %804 = vst [vmem:[#allocation4 + $0xd8] sm:$0xff] %v775_v7  ;;  %901 = vrot.lane.b32.xlu0 %v8069_v13, %s7682_s9 }
 0x152   :  { %1217 = vrot.lane.b32.xlu1 %v8306_v34, %s7684_s20  ;;  %893 = vrot.lane.b32.xlu2 %v8066_v9, %s7682_s9 }
 0x153   :  { %v1208_v23 = vpop.permute.xlu0 %1207 }
 0x154   :  { %v8314_v41 = vpop.permute.xlu1 %1461  ;;  %v8316_v43 = vpop.permute.xlu2 %744 }
 0x155   :  { %v10530_v29 = vrot.slane %v8314_v41, 4 }
 0x157   :  { %v1495_v44 = vsel %vm506_vm2, %v1480_v5, %v10530_v29  ;;  %v1157_v29 = vld [vmem:[#allocation2 + $0x68] sm:$0xff] }
 0x158   :  { %v1496_v11 = vsel %vm1490_vm8, %v1460_v6, %v1495_v44  ;;  %v1176_v54 = vpack.c.bf16 %v8248_v20, %v1157_v29 }
 0x159   :  { %1525 = vst [vmem:[#allocation4 + $0x318] sm:$0xff] %v1496_v11  ;;  %742 = vrot.lane.b32.xlu0 %v713_v53, %s7686_s22 }
 0x15a   :  { %1199 = vrot.lane.b32.xlu1 %v8012_v35, %s7684_s20  ;;  %1346 = vrot.lane.b32.xlu2 %v8306_v34, %s7683_s19 }
 0x15b   :  { %v616_v52 = vpop.permute.xlu0 %615 }
 0x15c   :  { %v1079_v10 = vpop.permute.xlu1 %1078  ;;  %v8332_v26 = vpop.permute.xlu2 %891 }
 0x15d   :  { %v10543_v7 = vrot.slane %v8332_v26, 4  ;;  %v1096_v53 = vrot.slane %v1079_v10, 4 }
 0x15f   :  { %v934_v18 = vsel %vm506_vm2, %v913_v62, %v10543_v7  ;;  %v560_v62 = vld [vmem:[#allocation2 + $0x28] sm:$0xff] }
 0x160   :  { %v935_v6 = vsel %vm922_vm10, %v890_v33, %v934_v18 }
 0x161   :  { %964 = vst [vmem:[#allocation4 + $0x150] sm:$0xff] %v935_v6  ;;  %619 = vrot.lane.b32.xlu0 %v8066_v9, %s7687_s23  ;;  %v581_v6 = vpack.c.bf16 %v560_v62, %v688_v38  ;;  %v8365_v38 = vld [vmem:[#allocation2 + $0x30] sm:$0xff] }
 0x162   :  { %625 = vrot.lane.b32.xlu1 %v8069_v13, %s7687_s23  ;;  %754 = vrot.lane.b32.xlu2 %v8069_v13, %s7686_s22  ;;  %v1044_v40 = vpack.c.bf16 %v8365_v38, %v560_v62 }
 0x163   :  { %v1466_v35 = vpop.permute.xlu0 %1465 }
 0x164   :  { %v483_v5 = vpop.permute.xlu1 %482  ;;  %v8345_v44 = vpop.permute.xlu2 %1080 }
 0x165   :  { %v10538_v11 = vrot.slane %v8345_v44, 4 }
 0x167   :  { %v1113_v33 = vsel %vm506_vm2, %v1096_v53, %v10538_v11 }
 0x168   :  { %v1114_v18 = vsel %vm1103_vm12, %v1079_v10, %v1113_v33  ;;  %v1225_v33 = vrot.slane %v1208_v23, 4 }
 0x169   :  { %1141 = vst [vmem:[#allocation4 + $0x210] sm:$0xff] %v1114_v18  ;;  %1088 = vrot.lane.b32.xlu0 %v8306_v34, %s7685_s21  ;;  %v500_v18 = vrot.slane %v483_v5, 4 }
 0x16a   :  { %607 = vrot.lane.b32.xlu1 %v581_v6, %s7687_s23  ;;  %1205 = vrot.lane.b32.xlu2 %v1176_v54, %s7684_s20 }
 0x16b   :  { %v8357_v22 = vpop.permute.xlu0 %1338 }
 0x16c   :  { %v10560_v63 = vrot.slane %v8357_v22, 4  ;;  %v8361_v53 = vpop.permute.xlu1 %1209  ;;  %v8363_v10 = vpop.permute.xlu2 %484 }
 0x16d   :  { %v10553_v30 = vrot.slane %v8361_v53, 4  ;;  %v10545_v2 = vrot.slane %v8363_v10, 4 }
 0x16e   :  { %v1371_v57 = vsel %vm506_vm2, %v1354_v56, %v10560_v63  ;;  %v762_v56 = vrot.slane %v8316_v43, 4 }
 0x16f   :  { %v1372_v11 = vsel %vm1361_vm5, %v8290_v47, %v1371_v57  ;;  %v1242_v50 = vsel %vm506_vm2, %v1225_v33, %v10553_v30  ;;  %v518_v16 = vsel %vm506_vm2, %v500_v18, %v10545_v2  ;;  %v584_v33 = vpack.c.bf16 %v1157_v29, %v8319_v58  ;;  %v1650_v2 = vld [vmem:[%s10522_s4] sm:$0xff] }
 0x170   :  { %1399 = vst [vmem:[#allocation4 + $0x2d0] sm:$0xff] %v1372_v11  ;;  %v1243_v37 = vsel %vm1232_vm7, %v1208_v23, %v1242_v50  ;;  %v519_v7 = vsel %vm508_vm11, %v483_v5, %v518_v16  ;;  %v633_v23 = vrot.slane %v616_v52, 4 }
 0x171   :  { %1270 = vst [vmem:[#allocation4 + $0x270] sm:$0xff] %v1243_v37  ;;  %1070 = vrot.lane.b32.xlu0 %v1044_v40, %s7685_s21 }
 0x172   :  { %549 = vst [vmem:[#allocation4 + $0x30] sm:$0xff] %v519_v7  ;;  %1076 = vrot.lane.b32.xlu1 %v1176_v54, %s7685_s21  ;;  %1082 = vrot.lane.b32.xlu2 %v8073_v61, %s7685_s21 }
 0x173   :  { %v8387_v57 = vpop.permute.xlu0 %746 }
 0x174   :  { %v10550_v47 = vrot.slane %v8387_v57, 4  ;;  %v8391_v11 = vpop.permute.xlu1 %617  ;;  %v1214_v50 = vpop.permute.xlu2 %1213 }
 0x175   :  { %v10546_v37 = vrot.slane %v8391_v11, 4 }
 0x176   :  { %v779_v16 = vsel %vm506_vm2, %v762_v56, %v10550_v47 }
 0x177   :  { %v780_v7 = vsel %vm769_vm6, %v8316_v43, %v779_v16  ;;  %v650_v5 = vsel %vm506_vm2, %v633_v23, %v10546_v37  ;;  %v1483_v16 = vrot.slane %v1466_v35, 4 }
 0x178   :  { %807 = vst [vmem:[#allocation4 + $0xf0] sm:$0xff] %v780_v7  ;;  %v651_v62 = vsel %vm640_vm9, %v616_v52, %v650_v5  ;;  %v852_v7 = vpack.c.bf16 %v8062_v8, %v8062_v8  ;;  %v844_v8 = vpack.c.bf16 %v8365_v38, %v8365_v38 }
 0x179   :  { %678 = vst [vmem:[#allocation4 + $0x90] sm:$0xff] %v651_v62  ;;  %492 = vrot.lane.b32.xlu0 %v8069_v13, %s7689_s25 }
 0x17a   :  { %474 = vrot.lane.b32.xlu1 %v581_v6, %s7689_s25  ;;  %613 = vrot.lane.b32.xlu2 %v584_v33, %s7687_s23 }
 0x17b   :  { %v898_v18 = vpop.permute.xlu0 %897 }
 0x17c   :  { %v8408_v56 = vpop.permute.xlu1 %1467  ;;  %v8410_v43 = vpop.permute.xlu2 %621 }
 0x17d   :  { %v10544_v23 = vrot.slane %v8408_v56, 4 }
 0x17f   :  { %v1500_v29 = vsel %vm506_vm2, %v1483_v16, %v10544_v23 }
 0x180   :  { %v1501_v58 = vsel %vm1490_vm8, %v1466_v35, %v1500_v29  ;;  %v1228_v29 = vrot.slane %v1214_v50, 4 }
 0x181   :  { %1528 = vst [vmem:[#allocation4 + $0x330] sm:$0xff] %v1501_v58  ;;  %1469 = vrot.lane.b32.xlu0 %v8073_v61, %s7688_s24 }
 0x182   :  { %1475 = vrot.lane.b32.xlu1 %v8306_v34, %s7688_s24  ;;  %486 = vrot.lane.b32.xlu2 %v8066_v9, %s7689_s25 }
 0x183   :  { %v8423_v13 = vpop.permute.xlu0 %1084 }
 0x184   :  { %v1343_v52 = vpop.permute.xlu1 %1342  ;;  %v8425_v6 = vpop.permute.xlu2 %1471 }
 0x185   :  { %v1357_v9 = vrot.slane %v1343_v52, 4 }
 0x189   :  { %1463 = vrot.lane.b32.xlu0 %v1176_v54, %s7688_s24 }
 0x18a   :  { %895 = vrot.lane.b32.xlu1 %v852_v7, %s7682_s9  ;;  %480 = vrot.lane.b32.xlu2 %v584_v33, %s7689_s25  ;;  %v848_v33 = vpack.c.bf16 %v8248_v20, %v8248_v20 }
 0x18b   :  { %v8432_v61 = vpop.permute.xlu0 %488 }
 0x18c   :  { %v751_v34 = vpop.permute.xlu1 %750  ;;  %v8434_v35 = vpop.permute.xlu2 %1344 }
 0x18d   :  { %v10554_v5 = vrot.slane %v8434_v35, 4 }
 0x18f   :  { %v1376_v62 = vsel %vm506_vm2, %v1357_v9, %v10554_v5  ;;  %v765_v9 = vrot.slane %v751_v34, 4 }
 0x190   :  { %v1377_v54 = vsel %vm1361_vm5, %v1343_v52, %v1376_v62  ;;  %v917_v52 = vrot.slane %v898_v18, 4 }
 0x191   :  { %1402 = vst [vmem:[#allocation4 + $0x2e8] sm:$0xff] %v1377_v54  ;;  %879 = vrot.lane.b32.xlu0 %v844_v8, %s7682_s9 }
 0x192   :  { %887 = vrot.lane.b32.xlu1 %v848_v33, %s7682_s9  ;;  %1457 = vrot.lane.b32.xlu2 %v1044_v40, %s7688_s24  ;;  %v1653_v40 = vld [vmem:[%s10522_s4 + $0x18] sm:$0xff] }
 0x193   :  { %v8448_v16 = vpop.permute.xlu0 %1215 }
 0x194   :  { %v10547_v58 = vrot.slane %v8448_v16, 4  ;;  %v8451_v7 = vpop.permute.xlu1 %899  ;;  %v8453_v38 = vpop.permute.xlu2 %752 }
 0x195   :  { %v10548_v20 = vrot.slane %v8451_v7, 4  ;;  %v10549_v62 = vrot.slane %v8453_v38, 4 }
 0x196   :  { %v1247_v8 = vsel %vm506_vm2, %v1228_v29, %v10547_v58 }
 0x197   :  { %v1248_v54 = vsel %vm1232_vm7, %v1214_v50, %v1247_v8  ;;  %v940_v33 = vsel %vm506_vm2, %v917_v52, %v10548_v20  ;;  %v784_v23 = vsel %vm506_vm2, %v765_v9, %v10549_v62  ;;  %v856_v50 = vpack.c.bf16 %v8293_v21, %v8293_v21  ;;  %v6490_v8 = vld [vmem:[#allocation4 + $0x2d0] sm:$0xf]  ;;  %v7440_v9 = vld [vmem:[#allocation4 + $0x2b4] sm:$0xf0] }
 0x198   :  { %1273 = vst [vmem:[#allocation4 + $0x288] sm:$0xff] %v1248_v54  ;;  %v941_v29 = vsel %vm922_vm10, %v898_v18, %v940_v33  ;;  %v785_v37 = vsel %vm769_vm6, %v751_v34, %v784_v23  ;;  %v7446_v58 = vld [vmem:[#allocation4 + $0x2e4] sm:$0xf0]  ;;  %v636_v18 = vrot.slane %v8410_v43, 4  ;;  %v6466_v54 = vld [vmem:[#allocation4 + $0x2a0] sm:$0xf] }
 0x199   :  { %967 = vst [vmem:[#allocation4 + $0x168] sm:$0xff] %v941_v29  ;;  %1671 = vperm.xlu0 %7650, %v1653_v40   ;;  %v6491_v52 = vor.u32 %v7446_v58, %v6490_v8  ;;  %v1099_v33 = vrot.slane %v8423_v13, 4  ;;  %v6298_v29 = vld [vmem:[#allocation4 + $0x150] sm:$0xf] }
 0x19a   :  { %810 = vst [vmem:[#allocation4 + $0x108] sm:$0xff] %v785_v37  ;;  %1656 = vperm.xlu1 %7651, %v1650_v2   ;;  %903 = vrot.lane.b32.xlu2 %v856_v50, %s7682_s9  ;;  %v6467_v2 = vor.u32 %v7440_v9, %v6466_v54  ;;  %v6442_v62 = vld [vmem:[#allocation4 + $0x270] sm:$0xf]  ;;  %v7395_v9 = vld [vmem:[#allocation4 + $0x154] sm:$0xf] }
 0x19b   :  { %2269 = vmatpush.bf16.msrb.mxu3 %v6491_v52  ;;  %v8478_v20 = vpop.permute.xlu0 %623 }
 0x19c   :  { %v10551_v23 = vrot.slane %v8478_v20, 4  ;;  %v8482_v34 = vpop.permute.xlu1 %1086  ;;  %v1329_v21 = vpop.permute.xlu2 %1328 }
 0x19d   :  { %v10552_v58 = vrot.slane %v8482_v34, 4  ;;  %v1350_v37 = vrot.slane %v1329_v21, 4 }
 0x19e   :  { %v655_v40 = vsel %vm506_vm2, %v636_v18, %v10551_v23 }
 0x19f   :  { %v656_v50 = vsel %vm640_vm9, %v8410_v43, %v655_v40  ;;  %v1118_v8 = vsel %vm506_vm2, %v1099_v33, %v10552_v58  ;;  %v1363_v52 = vsel %vm506_vm2, %v1349_v31, %v1350_v37  ;;  %2270 = vmatpush.bf16.msrb.mxu3 %v6467_v2  ;;  %v7434_v47 = vld [vmem:[#allocation4 + $0x284] sm:$0xf0]  ;;  %v1365_v43 = vsel %vm1361_vm5, %v1329_v21, %v1350_v37  ;;  %v7392_v31 = vld [vmem:[#allocation4 + $0x134] sm:$0xf0]  ;;  %v6274_v37 = vld [vmem:[#allocation4 + $0x120] sm:$0xf] }
 0x1a0   :  { %681 = vst [vmem:[#allocation4 + $0xa8] sm:$0xff] %v656_v50  ;;  %v1119_v18 = vsel %vm1103_vm12, %v8423_v13, %v1118_v8  ;;  %v1364_v54 = vsel %vm1361_vm5, %v8126_v27, %v1363_v52  ;;  %v7398_v40 = vld [vmem:[#allocation4 + $0x164] sm:$0xf0]  ;;  %v6443_v23 = vor.u32 %v7434_v47, %v6442_v62  ;;  %v6300_v33 = vld [vmem:[#allocation4 + $0x168] sm:$0xf0]  ;;  %v1486_v27 = vrot.slane %v8425_v6, 4 }
 0x1a1   :  { %1144 = vst [vmem:[#allocation4 + $0x228] sm:$0xff] %v1119_v18  ;;  %v6299_v58 = vor.u32 %v7398_v40, %v6298_v29  ;;  %v6303_v30 = vor.u32 %v7395_v9, %v6300_v33  ;;  %v7428_v13 = vld [vmem:[#allocation4 + $0x254] sm:$0xf0]  ;;  %v6276_v50 = vld [vmem:[#allocation4 + $0x138] sm:$0xf0]  ;;  %v503_v8 = vrot.slane %v8432_v61, 4 }
 0x1a2   :  { %1394 = vst [vmem:[#allocation4 + $0x2a8] sm:$0xff] %v1364_v54  ;;  %v6418_v29 = vld [vmem:[#allocation4 + $0x240] sm:$0xf]  ;;  %v7389_v9 = vld [vmem:[#allocation4 + $0x124] sm:$0xf] }
 0x1a3   :  { %1395 = vst.msk [vmem:[#allocation4 + $0x2b0] sm:$0xff] %vm8025_vm4, %v1365_v43  ;;  %2250 = vmatpush.bf16.msrb.mxu2 %v6299_v58  ;;  %2271 = vmatpush.bf16.msrb.mxu3 %v6443_v23  ;;  %v8504_v2 = vpop.permute.xlu0 %1473  ;;  %v6275_v23 = vor.u32 %v7392_v31, %v6274_v37  ;;  %v6419_v54 = vor.u32 %v7428_v13, %v6418_v29  ;;  %v7386_v43 = vld [vmem:[#allocation4 + $0x104] sm:$0xf0]  ;;  %v6394_v31 = vld [vmem:[#allocation4 + $0x210] sm:$0xf] }
 0x1a4   :  { %2307 = vmatpush.bf16.msra.mxu1 %v6303_v30  ;;  %v10558_v47 = vrot.slane %v8504_v2, 4  ;;  %v8508_v62 = vpop.permute.xlu1 %490  ;;  %v737_v21 = vpop.permute.xlu2 %736  ;;  %v6279_v30 = vor.u32 %v7389_v9, %v6276_v50  ;;  %v6252_v37 = vld [vmem:[#allocation4 + $0x108] sm:$0xf0] }
 0x1a5   :  { %v10559_v52 = vrot.slane %v8508_v62, 4  ;;  %v758_v58 = vrot.slane %v737_v21, 4 }
 0x1a6   :  { %v1505_v18 = vsel %vm506_vm2, %v1486_v27, %v10558_v47  ;;  %v6250_v27 = vld [vmem:[#allocation4 + $0xf0] sm:$0xf]  ;;  %v6514_v47 = vld [vmem:[#allocation4 + $0x300] sm:$0xf] }
 0x1a7   :  { %v1506_v40 = vsel %vm1490_vm8, %v8425_v6, %v1505_v18  ;;  %v523_v33 = vsel %vm506_vm2, %v503_v8, %v10559_v52  ;;  %v771_v5 = vsel %vm506_vm2, %v757_v49, %v758_v58  ;;  %2251 = vmatpush.bf16.msrb.mxu2 %v6275_v23  ;;  %v773_v6 = vsel %vm769_vm6, %v737_v21, %v758_v58  ;;  %v7383_v49 = vld [vmem:[#allocation4 + $0xf4] sm:$0xf]  ;;  %v7380_v18 = vld [vmem:[#allocation4 + $0xd4] sm:$0xf0] }
 0x1a8   :  { %1531 = vst [vmem:[#allocation4 + $0x348] sm:$0xff] %v1506_v40  ;;  %v524_v13 = vsel %vm508_vm11, %v8432_v61, %v523_v33  ;;  %v772_v50 = vsel %vm769_vm6, %v8140_v46, %v771_v5  ;;  %2272 = vmatpush.bf16.msrb.mxu3 %v6419_v54  ;;  %2308 = vmatpush.bf16.msra.mxu1 %v6279_v30  ;;  %v7422_v29 = vld [vmem:[#allocation4 + $0x224] sm:$0xf0]  ;;  %v7416_v46 = vld [vmem:[#allocation4 + $0x1f4] sm:$0xf0] }
 0x1a9   :  { %552 = vst [vmem:[#allocation4 + $0x48] sm:$0xff] %v524_v13  ;;  %v6251_v8 = vor.u32 %v7386_v43, %v6250_v27  ;;  %v6395_v9 = vor.u32 %v7422_v29, %v6394_v31  ;;  %v6255_v23 = vor.u32 %v7383_v49, %v6252_v37  ;;  %v6228_v5 = vld [vmem:[#allocation4 + $0xd8] sm:$0xf0]  ;;  %v6226_v30 = vld [vmem:[#allocation4 + $0xc0] sm:$0xf] }
 0x1aa   :  { %802 = vst [vmem:[#allocation4 + $0xc8] sm:$0xff] %v772_v50  ;;  %v6227_v33 = vor.u32 %v7380_v18, %v6226_v30  ;;  %v6370_v31 = vld [vmem:[#allocation4 + $0x1e0] sm:$0xf]  ;;  %v7377_v37 = vld [vmem:[#allocation4 + $0xc4] sm:$0xf] }
 0x1ab   :  { %803 = vst.msk [vmem:[#allocation4 + $0xd0] sm:$0xff] %vm8025_vm4, %v773_v6  ;;  %2252 = vmatpush.bf16.msrb.mxu2 %v6251_v8  ;;  %v8530_v61 = vpop.permute.xlu0 %877  ;;  %v6371_v50 = vor.u32 %v7416_v46, %v6370_v31  ;;  %v6231_v6 = vor.u32 %v7377_v37, %v6228_v5  ;;  %v7374_v27 = vld [vmem:[#allocation4 + $0xa4] sm:$0xf0]  ;;  %v6346_v29 = vld [vmem:[#allocation4 + $0x1b0] sm:$0xf] }
 0x1ac   :  { %2273 = vmatpush.bf16.msrb.mxu3 %v6395_v9  ;;  %2309 = vmatpush.bf16.msra.mxu1 %v6255_v23  ;;  %v10556_v21 = vrot.slane %v8530_v61, 4  ;;  %v8533_v58 = vpop.permute.xlu1 %885  ;;  %v8535_v54 = vpop.permute.xlu2 %893  ;;  %v7410_v8 = vld [vmem:[#allocation4 + $0x1c4] sm:$0xf0]  ;;  %v10589_v23 = vrot.slane %v8332_v26, 4  ;;  %v6538_v18 = vld [vmem:[#allocation4 + $0x330] sm:$0xf] }
 0x1ad   :  { %v10555_v43 = vrot.slane %v8533_v58, 4  ;;  %v10557_v40 = vrot.slane %v8535_v54, 4  ;;  %v6204_v5 = vld [vmem:[#allocation4 + $0xa8] sm:$0xf0]  ;;  %v7368_v30 = vld [vmem:[#allocation4 + $0x74] sm:$0xf0] }
 0x1ae   :  { %v924_v13 = vsel %vm506_vm2, %v906_v17, %v10556_v21  ;;  %v7404_v31 = vld [vmem:[#allocation4 + $0x194] sm:$0xf0]  ;;  %v6178_v21 = vld [vmem:[#allocation4 + $0x60] sm:$0xf] }
 0x1af   :  { %v925_v9 = vsel %vm922_vm10, %v8174_v14, %v924_v13  ;;  %v930_v49 = vsel %vm506_vm2, %v910_v24, %v10555_v43  ;;  %v936_v17 = vsel %vm506_vm2, %v10589_v23, %v10557_v40  ;;  %2253 = vmatpush.bf16.msrb.mxu2 %v6227_v33  ;;  %v7458_v46 = vld [vmem:[#allocation4 + $0x344] sm:$0xf0]  ;;  %v6202_v24 = vld [vmem:[#allocation4 + $0x90] sm:$0xf]  ;;  %v6180_v43 = vld [vmem:[#allocation4 + $0x78] sm:$0xf0] }
 0x1b0   :  { %959 = vst [vmem:[#allocation4 + $0x128] sm:$0xff] %v925_v9  ;;  %v931_v14 = vsel %vm922_vm10, %v8262_v32, %v930_v49  ;;  %v937_v37 = vsel %vm922_vm10, %v8332_v26, %v936_v17  ;;  %2274 = vmatpush.bf16.msrb.mxu3 %v6371_v50  ;;  %2310 = vmatpush.bf16.msra.mxu1 %v6231_v6  ;;  %v7371_v33 = vld [vmem:[#allocation4 + $0x94] sm:$0xf]  ;;  %v6322_v40 = vld [vmem:[#allocation4 + $0x180] sm:$0xf] }
 0x1b1   :  { %v6539_v13 = vor.u32 %v7458_v46, %v6538_v18  ;;  %962 = vst [vmem:[#allocation4 + $0x140] sm:$0xff] %v931_v14  ;;  %v6203_v23 = vor.u32 %v7374_v27, %v6202_v24  ;;  %v7452_v52 = vld [vmem:[#allocation4 + $0x314] sm:$0xf0]  ;;  %v6347_v9 = vor.u32 %v7410_v8, %v6346_v29  ;;  %v6207_v63 = vor.u32 %v7371_v33, %v6204_v5  ;;  %v7347_v32 = vld [vmem:[%s10521_s3 + $0x4] sm:$0xf] }
 0x1b2   :  { %965 = vst [vmem:[#allocation4 + $0x158] sm:$0xff] %v937_v37  ;;  %v6108_v26 = vld [vmem:[%s10521_s3 + $0xc] sm:$0xf0]  ;;  %v6540_v6 = vld [vmem:[#allocation4 + $0x348] sm:$0xf0]  ;;  %v6179_v18 = vor.u32 %v7368_v30, %v6178_v21  ;;  %v6323_v46 = vor.u32 %v7404_v31, %v6322_v40  ;;  %v6515_v5 = vor.u32 %v7452_v52, %v6514_v47  ;;  %v10591_v52 = vrot.slane %v8357_v22, 4 }
 0x1b3   :  { %2294 = vmatpush.bf16.msra.mxu0 %v6539_v13  ;;  %2254 = vmatpush.bf16.msrb.mxu2 %v6203_v23  ;;  %v1335_v50 = vpop.permute.xlu0 %1334  ;;  %v6114_v27 = vld [vmem:[%s10521_s3 + $0x8] sm:$0xf]  ;;  %v7349_v29 = vld [vmem:[%s10521_s3 + $0x10] sm:$0xf0]  ;;  %v7365_v14 = vld [vmem:[#allocation4 + $0x64] sm:$0xf]  ;;  %v8572_v33 = vor.u32 %v7347_v32, %v6108_v26 }
 0x1b4   :  { %2275 = vmatpush.bf16.msrb.mxu3 %v6347_v9  ;;  %2311 = vmatpush.bf16.msra.mxu1 %v6207_v63  ;;  %v1353_v8 = vrot.slane %v1335_v50, 4  ;;  %v1341_v49 = vpop.permute.xlu1 %1340  ;;  %v1347_v17 = vpop.permute.xlu2 %1346  ;;  %v6183_v13 = vor.u32 %v7365_v14, %v6180_v43  ;;  %v7455_v23 = vld [vmem:[#allocation4 + $0x334] sm:$0xf]  ;;  %v8578_v1 = vor.u32 %v7349_v29, %v6114_v27  ;;  %v7362_v30 = vld [vmem:[#allocation4 + $0x44] sm:$0xf0] }
 0x1b5   :  { %v1356_v37 = vrot.slane %v1341_v49, 4  ;;  %v1359_v24 = vrot.slane %v1347_v17, 4  ;;  %v6543_v63 = vor.u32 %v7455_v23, %v6540_v6  ;;  %v7449_v32 = vld [vmem:[#allocation4 + $0x304] sm:$0xf]  ;;  %v6516_v26 = vld [vmem:[#allocation4 + $0x318] sm:$0xf0] }
 0x1b6   :  { %v1368_v36 = vsel %vm506_vm2, %v10590_v39, %v1353_v8  ;;  %v1370_v9 = vsel %vm1361_vm5, %v1335_v50, %v1353_v8  ;;  %v10592_v39 = vrot.slane %v8434_v35, 4  ;;  %v7356_v50 = vld [vmem:[#allocation4 + $0x14] sm:$0xf0]  ;;  %v6154_v27 = vld [vmem:[#allocation4 + $0x30] sm:$0xf] }
 0x1b7   :  { %2295 = vmatpush.bf16.msra.mxu0 %v6515_v5  ;;  %v1369_v47 = vsel %vm1361_vm5, %v8266_v59, %v1368_v36  ;;  %1398 = vst.msk [vmem:[#allocation4 + $0x2c8] sm:$0xff] %vm8025_vm4, %v1370_v9  ;;  %v1373_v21 = vsel %vm506_vm2, %v10591_v52, %v1356_v37  ;;  %v1375_v43 = vsel %vm1361_vm5, %v1341_v49, %v1356_v37  ;;  %v6156_v59 = vld [vmem:[#allocation4 + $0x48] sm:$0xf0]  ;;  %v6132_v29 = vld [vmem:[#allocation4 + $0x18] sm:$0xf0] }
 0x1b8   :  { %v1378_v40 = vsel %vm506_vm2, %v10592_v39, %v1359_v24  ;;  %1397 = vst [vmem:[#allocation4 + $0x2c0] sm:$0xff] %v1369_v47  ;;  %v1374_v31 = vsel %vm1361_vm5, %v8357_v22, %v1373_v21  ;;  %2255 = vmatpush.bf16.msrb.mxu2 %v6179_v18  ;;  %2276 = vmatpush.bf16.msrb.mxu3 %v6323_v46  ;;  %v7359_v8 = vld [vmem:[#allocation4 + $0x34] sm:$0xf]  ;;  %v6492_v49 = vld [vmem:[#allocation4 + $0x2e8] sm:$0xf0] }
 0x1b9   :  { %v1379_v36 = vsel %vm1361_vm5, %v8434_v35, %v1378_v40  ;;  %1400 = vst [vmem:[#allocation4 + $0x2d8] sm:$0xff] %v1374_v31  ;;  %v1380_v6 = vsel %vm1361_vm5, %v1347_v17, %v1359_v24  ;;  %2312 = vmatpush.bf16.msra.mxu1 %v6183_v13  ;;  %v6155_v22 = vor.u32 %v7362_v30, %v6154_v27  ;;  %v6106_v17 = vld [vmem:[%s10521_s3] sm:$0xf]  ;;  %v7348_v5 = vld [vmem:[%s10521_s3 + $0x8] sm:$0xf0] }
 0x1ba   :  { %1401 = vst.msk [vmem:[#allocation4 + $0x2e0] sm:$0xff] %vm8025_vm4, %v1375_v43  ;;  %6560 = vmatmul.msk.bf16.vlgmr.msra.gmra.mxu0 %vm216_vm0, %v8578_v1  ;;  %v6159_v35 = vor.u32 %v7359_v8, %v6156_v59  ;;  %v6519_v46 = vor.u32 %v7449_v32, %v6516_v26  ;;  %v6130_v13 = vld [vmem:[#allocation4] sm:$0xf]  ;;  %v7353_v23 = vld [vmem:[#allocation4 + $0x4] sm:$0xf]  ;;  %v10593_v43 = vrot.slane %v8361_v53, 4  ;;  %v8613_v31 = vor.u32 %v7348_v5, %v6106_v17 }
 0x1bb   :  { %1403 = vst [vmem:[#allocation4 + $0x2f0] sm:$0xff] %v1379_v36  ;;  %v1212_v18 = vpop.permute.xlu0 %1211  ;;  %2277 = vmatmul.bf16.vlgmr.msrb.gmra.mxu3 %v8572_v33  ;;  %v6131_v47 = vor.u32 %v7356_v50, %v6130_v13  ;;  %v6135_v52 = vor.u32 %v7353_v23, %v6132_v29  ;;  %v7443_v21 = vld [vmem:[#allocation4 + $0x2d4] sm:$0xf]  ;;  %v10594_v59 = vrot.slane %v8387_v57, 4  ;;  %v10595_v50 = vrot.slane %v8453_v38, 4 }
 0x1bc   :  { %2351 = vmatpush.bf16.msra.mxu3 %v6543_v63  ;;  %1404 = vst.msk [vmem:[#allocation4 + $0x2f8] sm:$0xff] %vm8025_vm4, %v1380_v6  ;;  %2256 = vmatpush.bf16.msrb.mxu2 %v6155_v22  ;;  %v1227_v14 = vrot.slane %v1212_v18, 4  ;;  %v749_v37 = vpop.permute.xlu1 %748  ;;  %v755_v24 = vpop.permute.xlu2 %754  ;;  %v6495_v30 = vor.u32 %v7443_v21, %v6492_v49  ;;  %v6468_v27 = vld [vmem:[#allocation4 + $0x2b8] sm:$0xf0]  ;;  %v7437_v8 = vld [vmem:[#allocation4 + $0x2a4] sm:$0xf] }
 0x1bd   :  { %2313 = vmatpush.bf16.msra.mxu1 %v6159_v35  ;;  %v764_v9 = vrot.slane %v749_v37, 4  ;;  %v767_v63 = vrot.slane %v755_v24, 4  ;;  %v6444_v49 = vld [vmem:[#allocation4 + $0x288] sm:$0xf0] }
 0x1be   :  { %v1244_v39 = vsel %vm506_vm2, %v10593_v43, %v1227_v14  ;;  %v1246_v40 = vsel %vm1232_vm7, %v1212_v18, %v1227_v14  ;;  %v7350_v18 = vld [vmem:[%s10521_s3 + $0x1c] sm:$0xf]  ;;  %v6471_v14 = vor.u32 %v7437_v8, %v6468_v27  ;;  %v6474_v43 = vld [vmem:[#allocation4 + $0x2a8] sm:$0xf] }
 0x1bf   :  { %v1245_v36 = vsel %vm1232_vm7, %v8361_v53, %v1244_v39  ;;  %1272 = vst.msk [vmem:[#allocation4 + $0x280] sm:$0xff] %vm8025_vm4, %v1246_v40  ;;  %v781_v32 = vsel %vm506_vm2, %v10594_v59, %v764_v9  ;;  %v783_v26 = vsel %vm769_vm6, %v749_v37, %v764_v9  ;;  %v786_v6 = vsel %vm506_vm2, %v10595_v50, %v767_v63  ;;  %v7441_v37 = vld [vmem:[#allocation4 + $0x2bc] sm:$0xf0] }
 0x1c0   :  { %2352 = vmatpush.bf16.msra.mxu3 %v6519_v46  ;;  %1271 = vst [vmem:[#allocation4 + $0x278] sm:$0xff] %v1245_v36  ;;  %v782_v29 = vsel %vm769_vm6, %v8387_v57, %v781_v32  ;;  %v787_v53 = vsel %vm769_vm6, %v8453_v38, %v786_v6  ;;  %2257 = vmatpush.bf16.msrb.mxu2 %v6131_v47  ;;  %v6498_v22 = vld [vmem:[#allocation4 + $0x2d8] sm:$0xf]  ;;  %v6120_v57 = vld [vmem:[%s10521_s3 + $0x24] sm:$0xf0]  ;;  %v1652_v47 = vld [vmem:[%s10522_s4 + $0x10] sm:$0xff] }
 0x1c1   :  { %808 = vst [vmem:[#allocation4 + $0xf8] sm:$0xff] %v782_v29  ;;  %v788_v35 = vsel %vm769_vm6, %v755_v24, %v767_v63  ;;  %2314 = vmatpush.bf16.msra.mxu1 %v6135_v52  ;;  %v6126_v46 = vld [vmem:[%s10521_s3 + $0x20] sm:$0xf]  ;;  %v7352_v24 = vld [vmem:[%s10521_s3 + $0x28] sm:$0xf0]  ;;  %v10596_v40 = vrot.slane %v8451_v7, 4  ;;  %v6475_v36 = vor.u32 %v7441_v37, %v6474_v43  ;;  %v8660_v59 = vor.u32 %v7350_v18, %v6120_v57 }
 0x1c2   :  { %809 = vst.msk [vmem:[#allocation4 + $0x100] sm:$0xff] %vm8025_vm4, %v783_v26  ;;  %v7447_v38 = vld [vmem:[#allocation4 + $0x2ec] sm:$0xf0]  ;;  %v7431_v63 = vld [vmem:[#allocation4 + $0x274] sm:$0xf]  ;;  %v8662_v32 = vor.u32 %v7352_v24, %v6126_v46  ;;  %1666 = vperm.xlu2 %7652, %v1652_v47   ;;  %v10597_v50 = vrot.slane %v8448_v16, 4 }
 0x1c3   :  { %811 = vst [vmem:[#allocation4 + $0x110] sm:$0xff] %v787_v53  ;;  %2258 = vmatmul.bf16.vlgmr.msrb.gmra.mxu2 %v8613_v31  ;;  %v6499_v17 = vor.u32 %v7447_v38, %v6498_v22  ;;  %v8643_v5 = vpop.permute.xlu0 %901  ;;  %v6447_v39 = vor.u32 %v7431_v63, %v6444_v49  ;;  %v10598_v29 = vrot.slane %v8216_v28, 4  ;;  %v6420_v49 = vld [vmem:[#allocation4 + $0x258] sm:$0xf0]  ;;  %v6396_v18 = vld [vmem:[#allocation4 + $0x228] sm:$0xf0] }
 0x1c4   :  { %2326 = vmatpush.bf16.msra.mxu2 %v6495_v30  ;;  %812 = vst.msk [vmem:[#allocation4 + $0x118] sm:$0xff] %vm8025_vm4, %v788_v35  ;;  %2315 = vmatmul.bf16.vlgmr.msra.gmra.mxu1 %v8613_v31  ;;  %v919_v13 = vrot.slane %v8643_v5, 4  ;;  %v1218_v23 = vpop.permute.xlu1 %1217  ;;  %v1206_v9 = vpop.permute.xlu2 %1205  ;;  %v7425_v35 = vld [vmem:[#allocation4 + $0x244] sm:$0xf]  ;;  %v7351_v38 = vld [vmem:[%s10521_s3 + $0x20] sm:$0xf0] }
 0x1c5   :  { %2383 = vmatpush.bf16.msrb.mxu1 %v6499_v17  ;;  %v1230_v52 = vrot.slane %v1218_v23, 4  ;;  %v1224_v21 = vrot.slane %v1206_v9, 4  ;;  %v1651_v37 = vld [vmem:[%s10522_s4 + $0x8] sm:$0xff]  ;;  %v10599_v63 = vrot.slane %v8288_v4, 4 }
 0x1c6   :  { %v942_v30 = vsel %vm506_vm2, %v10596_v40, %v919_v13  ;;  %v7396_v40 = vld [vmem:[#allocation4 + $0x15c] sm:$0xf] }
 0x1c7   :  { %v943_v26 = vsel %vm922_vm10, %v8451_v7, %v942_v30  ;;  %v1249_v6 = vsel %vm506_vm2, %v10597_v50, %v1230_v52  ;;  %v1251_v27 = vsel %vm1232_vm7, %v1218_v23, %v1230_v52  ;;  %v1239_v53 = vsel %vm506_vm2, %v10598_v29, %v1224_v21  ;;  %v6372_v30 = vld [vmem:[#allocation4 + $0x1f8] sm:$0xf0] }
 0x1c8   :  { %2327 = vmatpush.bf16.msra.mxu2 %v6471_v14  ;;  %968 = vst [vmem:[#allocation4 + $0x170] sm:$0xff] %v943_v26  ;;  %v1250_v22 = vsel %vm1232_vm7, %v8448_v16, %v1249_v6  ;;  %v1240_v8 = vsel %vm1232_vm7, %v8216_v28, %v1239_v53  ;;  %v1241_v7 = vsel %vm1232_vm7, %v1206_v9, %v1224_v21  ;;  %v6118_v28 = vld [vmem:[%s10521_s3 + $0x18] sm:$0xf]  ;;  %v7419_v9 = vld [vmem:[#allocation4 + $0x214] sm:$0xf]  ;;  %v10600_v26 = vrot.slane %v8153_v25, 4 }
 0x1c9   :  { %1274 = vst [vmem:[#allocation4 + $0x290] sm:$0xff] %v1250_v22  ;;  %2384 = vmatpush.bf16.msrb.mxu1 %v6475_v36  ;;  %v6423_v16 = vor.u32 %v7425_v35, %v6420_v49  ;;  %v6399_v21 = vor.u32 %v7419_v9, %v6396_v18  ;;  %v8698_v43 = vor.u32 %v7351_v38, %v6118_v28  ;;  %v6282_v28 = vld [vmem:[#allocation4 + $0x128] sm:$0xf]  ;;  %v7393_v38 = vld [vmem:[#allocation4 + $0x13c] sm:$0xf0] }
 0x1ca   :  { %1275 = vst.msk [vmem:[#allocation4 + $0x298] sm:$0xff] %vm8025_vm4, %v1251_v27  ;;  %6561 = vmatmul.msk.bf16.gmra.mxu0 %vm216_vm0, %v8662_v32  ;;  %1661 = vperm.xlu2 %7652, %v1651_v37   ;;  %v10601_v27 = vrot.slane %v8345_v44, 4 }
 0x1cb   :  { %1268 = vst [vmem:[#allocation4 + $0x260] sm:$0xff] %v1240_v8  ;;  %v743_v57 = vpop.permute.xlu0 %742  ;;  %2282 = vmatmul.bf16.gmra.mxu3 %v8660_v59 }
 0x1cc   :  { %2328 = vmatpush.bf16.msra.mxu2 %v6447_v39  ;;  %1269 = vst.msk [vmem:[#allocation4 + $0x268] sm:$0xff] %vm8025_vm4, %v1241_v7  ;;  %v761_v46 = vrot.slane %v743_v57, 4  ;;  %v1200_v17 = vpop.permute.xlu1 %1199  ;;  %v1083_v14 = vpop.permute.xlu2 %1082  ;;  %v6306_v39 = vld [vmem:[#allocation4 + $0x158] sm:$0xf] }
 0x1cd   :  { %v1221_v24 = vrot.slane %v1200_v17, 4  ;;  %v1098_v23 = vrot.slane %v1083_v14, 4  ;;  %v6450_v7 = vld [vmem:[#allocation4 + $0x278] sm:$0xf] }
 0x1ce   :  { %v776_v47 = vsel %vm506_vm2, %v10599_v63, %v761_v46  ;;  %v778_v52 = vsel %vm769_vm6, %v743_v57, %v761_v46  ;;  %v7407_v46 = vld [vmem:[#allocation4 + $0x1b4] sm:$0xf] }
 0x1cf   :  { %v777_v36 = vsel %vm769_vm6, %v8288_v4, %v776_v47  ;;  %806 = vst.msk [vmem:[#allocation4 + $0xe8] sm:$0xff] %vm8025_vm4, %v778_v52  ;;  %v1234_v50 = vsel %vm506_vm2, %v10600_v26, %v1221_v24  ;;  %v1236_v6 = vsel %vm1232_vm7, %v1200_v17, %v1221_v24  ;;  %v1115_v29 = vsel %vm506_vm2, %v10601_v27, %v1098_v23  ;;  %v7399_v53 = vld [vmem:[#allocation4 + $0x16c] sm:$0xf0]  ;;  %v6308_v22 = vld [vmem:[#allocation4 + $0x170] sm:$0xf0] }
 0x1d0   :  { %2329 = vmatpush.bf16.msra.mxu2 %v6423_v16  ;;  %805 = vst [vmem:[#allocation4 + $0xe0] sm:$0xff] %v777_v36  ;;  %v1235_v8 = vsel %vm1232_vm7, %v8153_v25, %v1234_v50  ;;  %v1116_v4 = vsel %vm1103_vm12, %v8345_v44, %v1115_v29  ;;  %v6307_v49 = vor.u32 %v7399_v53, %v6306_v39  ;;  %v7435_v35 = vld [vmem:[#allocation4 + $0x28c] sm:$0xf0]  ;;  %v7413_v25 = vld [vmem:[#allocation4 + $0x1e4] sm:$0xf]  ;;  %v10602_v36 = vrot.slane %v8391_v11, 4 }
 0x1d1   :  { %1265 = vst [vmem:[#allocation4 + $0x248] sm:$0xff] %v1235_v8  ;;  %v1117_v18 = vsel %vm1103_vm12, %v1083_v14, %v1098_v23  ;;  %v6451_v57 = vor.u32 %v7435_v35, %v6450_v7  ;;  %v6311_v16 = vor.u32 %v7396_v40, %v6308_v22  ;;  %v6348_v17 = vld [vmem:[#allocation4 + $0x1c8] sm:$0xf0]  ;;  %v6375_v37 = vor.u32 %v7413_v25, %v6372_v30  ;;  %v6284_v14 = vld [vmem:[#allocation4 + $0x140] sm:$0xf0] }
 0x1d2   :  { %1266 = vst.msk [vmem:[#allocation4 + $0x250] sm:$0xff] %vm8025_vm4, %v1236_v6  ;;  %2364 = vmatpush.bf16.msrb.mxu0 %v6307_v49  ;;  %v7390_v24 = vld [vmem:[#allocation4 + $0x12c] sm:$0xf]  ;;  %v6283_v47 = vor.u32 %v7393_v38, %v6282_v28  ;;  %v6258_v39 = vld [vmem:[#allocation4 + $0xf8] sm:$0xf]  ;;  %v6351_v6 = vor.u32 %v7407_v46, %v6348_v17  ;;  %v10603_v53 = vrot.slane %v8478_v20, 4 }
 0x1d3   :  { %1142 = vst [vmem:[#allocation4 + $0x218] sm:$0xff] %v1116_v4  ;;  %2263 = vmatmul.bf16.gmra.mxu2 %v8698_v43  ;;  %2385 = vmatpush.bf16.msrb.mxu1 %v6451_v57  ;;  %v620_v44 = vpop.permute.xlu0 %619  ;;  %v7387_v40 = vld [vmem:[#allocation4 + $0x10c] sm:$0xf0]  ;;  %v6287_v50 = vor.u32 %v7390_v24, %v6284_v14  ;;  %v6324_v27 = vld [vmem:[#allocation4 + $0x198] sm:$0xf0]  ;;  %v10604_v4 = vrot.slane %v8229_v55, 4 }
 0x1d4   :  { %2330 = vmatpush.bf16.msra.mxu2 %v6399_v21  ;;  %1143 = vst.msk [vmem:[#allocation4 + $0x220] sm:$0xff] %vm8025_vm4, %v1117_v18  ;;  %2320 = vmatmul.bf16.gmra.mxu1 %v8698_v43  ;;  %v635_v23 = vrot.slane %v620_v44, 4  ;;  %v626_v9 = vpop.permute.xlu1 %625  ;;  %v614_v63 = vpop.permute.xlu2 %613  ;;  %v7384_v7 = vld [vmem:[#allocation4 + $0xfc] sm:$0xf]  ;;  %v6260_v35 = vld [vmem:[#allocation4 + $0x110] sm:$0xf0]  ;;  %v6259_v57 = vor.u32 %v7387_v40, %v6258_v39 }
 0x1d5   :  { %2421 = vmatpush.bf16.msrb.mxu3 %v6311_v16  ;;  %v638_v52 = vrot.slane %v626_v9, 4  ;;  %v632_v21 = vrot.slane %v614_v63, 4  ;;  %v7429_v28 = vld [vmem:[#allocation4 + $0x25c] sm:$0xf0]  ;;  %v6263_v17 = vor.u32 %v7384_v7, %v6260_v35  ;;  %v10605_v39 = vrot.slane %v8482_v34, 4 }
 0x1d6   :  { %v652_v30 = vsel %vm506_vm2, %v10602_v36, %v635_v23  ;;  %v654_v26 = vsel %vm640_vm9, %v620_v44, %v635_v23  ;;  %2365 = vmatpush.bf16.msrb.mxu0 %v6283_v47  ;;  %v7401_v44 = vld [vmem:[#allocation4 + $0x184] sm:$0xf] }
 0x1d7   :  { %v653_v29 = vsel %vm640_vm9, %v8391_v11, %v652_v30  ;;  %680 = vst.msk [vmem:[#allocation4 + $0xa0] sm:$0xff] %vm8025_vm4, %v654_v26  ;;  %v657_v22 = vsel %vm506_vm2, %v10603_v53, %v638_v52  ;;  %v659_v8 = vsel %vm640_vm9, %v626_v9, %v638_v52  ;;  %v647_v49 = vsel %vm506_vm2, %v10604_v4, %v632_v21  ;;  %v7381_v25 = vld [vmem:[#allocation4 + $0xdc] sm:$0xf0]  ;;  %v6236_v24 = vld [vmem:[#allocation4 + $0xe0] sm:$0xf0] }
 0x1d8   :  { %2331 = vmatpush.bf16.msra.mxu2 %v6375_v37  ;;  %679 = vst [vmem:[#allocation4 + $0x98] sm:$0xff] %v653_v29  ;;  %v658_v18 = vsel %vm640_vm9, %v8478_v20, %v657_v22  ;;  %v648_v11 = vsel %vm640_vm9, %v8229_v55, %v647_v49  ;;  %v6426_v16 = vld [vmem:[#allocation4 + $0x248] sm:$0xf]  ;;  %v649_v38 = vsel %vm640_vm9, %v614_v63, %v632_v21  ;;  %v7378_v21 = vld [vmem:[#allocation4 + $0xcc] sm:$0xf]  ;;  %v10607_v29 = vrot.slane %v8363_v10, 4 }
 0x1d9   :  { %2422 = vmatpush.bf16.msrb.mxu3 %v6287_v50  ;;  %682 = vst [vmem:[#allocation4 + $0xb0] sm:$0xff] %v658_v18  ;;  %v6427_v46 = vor.u32 %v7429_v28, %v6426_v16  ;;  %v6327_v55 = vor.u32 %v7401_v44, %v6324_v27  ;;  %v6234_v37 = vld [vmem:[#allocation4 + $0xc8] sm:$0xf]  ;;  %v6239_v30 = vor.u32 %v7378_v21, %v6236_v24  ;;  %v10606_v50 = vrot.slane %v8171_v3, 4 }
 0x1da   :  { %683 = vst.msk [vmem:[#allocation4 + $0xb8] sm:$0xff] %vm8025_vm4, %v659_v8  ;;  %2366 = vmatpush.bf16.msrb.mxu0 %v6259_v57  ;;  %v6235_v63 = vor.u32 %v7381_v25, %v6234_v37  ;;  %v10609_v37 = vrot.slane %v8284_v15, 4 }
 0x1db   :  { %676 = vst [vmem:[#allocation4 + $0x80] sm:$0xff] %v648_v11  ;;  %2386 = vmatpush.bf16.msrb.mxu1 %v6427_v46  ;;  %v1089_v20 = vpop.permute.xlu0 %1088  ;;  %6562 = vmatmul.msk.bf16.vlgmr.msra.gmra.mxu3 %vm216_vm0, %v8578_v1  ;;  %v10608_v46 = vrot.slane %v8196_v0, 4 }
 0x1dc   :  { %2332 = vmatpush.bf16.msra.mxu2 %v6351_v6  ;;  %677 = vst.msk [vmem:[#allocation4 + $0x88] sm:$0xff] %vm8025_vm4, %v649_v38  ;;  %v1101_v14 = vrot.slane %v1089_v20, 4  ;;  %v608_v23 = vpop.permute.xlu1 %607  ;;  %v487_v9 = vpop.permute.xlu2 %486 }
 0x1dd   :  { %2423 = vmatpush.bf16.msrb.mxu3 %v6263_v17  ;;  %v629_v47 = vrot.slane %v608_v23, 4  ;;  %v502_v52 = vrot.slane %v487_v9, 4 }
 0x1de   :  { %v1120_v40 = vsel %vm506_vm2, %v10605_v39, %v1101_v14  ;;  %v1122_v36 = vsel %vm1103_vm12, %v1089_v20, %v1101_v14  ;;  %2367 = vmatpush.bf16.msrb.mxu0 %v6235_v63  ;;  %v6402_v20 = vld [vmem:[#allocation4 + $0x218] sm:$0xf] }
 0x1df   :  { %v1121_v26 = vsel %vm1103_vm12, %v8482_v34, %v1120_v40  ;;  %1146 = vst.msk [vmem:[#allocation4 + $0x238] sm:$0xff] %vm8025_vm4, %v1122_v36  ;;  %v642_v6 = vsel %vm506_vm2, %v10606_v50, %v629_v47  ;;  %v644_v27 = vsel %vm640_vm9, %v608_v23, %v629_v47  ;;  %v520_v53 = vsel %vm506_vm2, %v10607_v29, %v502_v52  ;;  %v6210_v22 = vld [vmem:[#allocation4 + $0x98] sm:$0xf]  ;;  %v7372_v8 = vld [vmem:[#allocation4 + $0x9c] sm:$0xf] }
 0x1e0   :  { %2333 = vmatpush.bf16.msra.mxu2 %v6327_v55  ;;  %1145 = vst [vmem:[#allocation4 + $0x230] sm:$0xff] %v1121_v26  ;;  %v643_v4 = vsel %vm640_vm9, %v8171_v3, %v642_v6  ;;  %v521_v34 = vsel %vm508_vm11, %v8363_v10, %v520_v53  ;;  %v7375_v49 = vld [vmem:[#allocation4 + $0xac] sm:$0xf0]  ;;  %v6212_v7 = vld [vmem:[#allocation4 + $0xb0] sm:$0xf0]  ;;  %v522_v35 = vsel %vm508_vm11, %v487_v9, %v502_v52  ;;  %v10610_v23 = vrot.slane %v8246_v19, 4 }
 0x1e1   :  { %2424 = vmatpush.bf16.msrb.mxu3 %v6239_v30  ;;  %673 = vst [vmem:[#allocation4 + $0x68] sm:$0xff] %v643_v4  ;;  %v6211_v18 = vor.u32 %v7375_v49, %v6210_v22  ;;  %v6215_v11 = vor.u32 %v7372_v8, %v6212_v7  ;;  %v10611_v53 = vrot.slane %v8508_v62, 4 }
 0x1e2   :  { %674 = vst.msk [vmem:[#allocation4 + $0x70] sm:$0xff] %vm8025_vm4, %v644_v27  ;;  %v7369_v44 = vld [vmem:[#allocation4 + $0x7c] sm:$0xf0]  ;;  %v6188_v47 = vld [vmem:[#allocation4 + $0x80] sm:$0xf0] }
 0x1e3   :  { %550 = vst [vmem:[#allocation4 + $0x38] sm:$0xff] %v521_v34  ;;  %2334 = vmatmul.bf16.vlgmr.msra.gmra.mxu2 %v8572_v33  ;;  %2368 = vmatpush.bf16.msrb.mxu0 %v6211_v18  ;;  %v1071_v57 = vpop.permute.xlu0 %1070  ;;  %v10612_v34 = vrot.slane %v8192_v12, 4 }
 0x1e4   :  { %551 = vst.msk [vmem:[#allocation4 + $0x40] sm:$0xff] %vm8025_vm4, %v522_v35  ;;  %v1092_v3 = vrot.slane %v1071_v57, 4  ;;  %v1077_v10 = vpop.permute.xlu1 %1076  ;;  %v481_v16 = vpop.permute.xlu2 %480  ;;  %v10613_v35 = vrot.slane %v8156_v45, 4 }
 0x1e5   :  { %2425 = vmatpush.bf16.msrb.mxu3 %v6215_v11  ;;  %v1095_v28 = vrot.slane %v1077_v10, 4  ;;  %v499_v38 = vrot.slane %v481_v16, 4 }
 0x1e6   :  { %v1105_v25 = vsel %vm506_vm2, %v10608_v46, %v1092_v3  ;;  %v1107_v17 = vsel %vm1103_vm12, %v1071_v57, %v1092_v3  ;;  %v7411_v46 = vld [vmem:[#allocation4 + $0x1cc] sm:$0xf0] }
 0x1e7   :  { %v1106_v55 = vsel %vm1103_vm12, %v8196_v0, %v1105_v25  ;;  %1137 = vst.msk [vmem:[#allocation4 + $0x1f0] sm:$0xff] %vm8025_vm4, %v1107_v17  ;;  %v1110_v24 = vsel %vm506_vm2, %v10609_v37, %v1095_v28  ;;  %v1112_v14 = vsel %vm1103_vm12, %v1077_v10, %v1095_v28  ;;  %v515_v9 = vsel %vm506_vm2, %v10610_v23, %v499_v38  ;;  %v7423_v63 = vld [vmem:[#allocation4 + $0x22c] sm:$0xf0]  ;;  %v7405_v23 = vld [vmem:[#allocation4 + $0x19c] sm:$0xf0] }
 0x1e8   :  { %1136 = vst [vmem:[#allocation4 + $0x1e8] sm:$0xff] %v1106_v55  ;;  %v1111_v52 = vsel %vm1103_vm12, %v8284_v15, %v1110_v24  ;;  %v516_v0 = vsel %vm508_vm11, %v8246_v19, %v515_v9  ;;  %v6186_v21 = vld [vmem:[#allocation4 + $0x68] sm:$0xf]  ;;  %v6403_v39 = vor.u32 %v7423_v63, %v6402_v20  ;;  %v7366_v40 = vld [vmem:[#allocation4 + $0x6c] sm:$0xf]  ;;  %v517_v36 = vsel %vm508_vm11, %v481_v16, %v499_v38 }
 0x1e9   :  { %1139 = vst [vmem:[#allocation4 + $0x200] sm:$0xff] %v1111_v52  ;;  %v6187_v30 = vor.u32 %v7369_v44, %v6186_v21  ;;  %v6191_v26 = vor.u32 %v7366_v40, %v6188_v47  ;;  %v6354_v38 = vld [vmem:[#allocation4 + $0x1b8] sm:$0xf]  ;;  %v10614_v20 = vrot.slane %v8408_v56, 4  ;;  %v10615_v63 = vrot.slane %v8504_v2, 4 }
 0x1ea   :  { %1140 = vst.msk [vmem:[#allocation4 + $0x208] sm:$0xff] %vm8025_vm4, %v1112_v14  ;;  %2387 = vmatpush.bf16.msrb.mxu1 %v6403_v39  ;;  %v6355_v24 = vor.u32 %v7411_v46, %v6354_v38  ;;  %v6162_v14 = vld [vmem:[#allocation4 + $0x38] sm:$0xf] }
 0x1eb   :  { %547 = vst [vmem:[#allocation4 + $0x20] sm:$0xff] %v516_v0  ;;  %2369 = vmatpush.bf16.msrb.mxu0 %v6187_v30  ;;  %2426 = vmatpush.bf16.msrb.mxu3 %v6191_v26  ;;  %v493_v50 = vpop.permute.xlu0 %492  ;;  %v6330_v30 = vld [vmem:[#allocation4 + $0x188] sm:$0xf]  ;;  %v7360_v26 = vld [vmem:[#allocation4 + $0x3c] sm:$0xf] }
 0x1ec   :  { %548 = vst.msk [vmem:[#allocation4 + $0x28] sm:$0xff] %vm8025_vm4, %v517_v36  ;;  %v505_v19 = vrot.slane %v493_v50, 4  ;;  %v475_v15 = vpop.permute.xlu1 %474  ;;  %v1458_v6 = vpop.permute.xlu2 %1457  ;;  %6563 = vmatmul.msk.bf16.gmra.mxu3 %vm216_vm0, %v8662_v32 }
 0x1ed   :  { %v496_v27 = vrot.slane %v475_v15, 4  ;;  %v1479_v29 = vrot.slane %v1458_v6, 4 }
 0x1ee   :  { %v525_v22 = vsel %vm506_vm2, %v10611_v53, %v505_v19  ;;  %v527_v8 = vsel %vm508_vm11, %v493_v50, %v505_v19  ;;  %v7448_v53 = vld [vmem:[#allocation4 + $0x2f4] sm:$0xf0] }
 0x1ef   :  { %v526_v4 = vsel %vm508_vm11, %v8508_v62, %v525_v22  ;;  %554 = vst.msk [vmem:[#allocation4 + $0x58] sm:$0xff] %vm8025_vm4, %v527_v8  ;;  %v510_v49 = vsel %vm506_vm2, %v10612_v34, %v496_v27  ;;  %v512_v7 = vsel %vm508_vm11, %v475_v15, %v496_v27  ;;  %v1492_v18 = vsel %vm506_vm2, %v10613_v35, %v1479_v29  ;;  %v6378_v11 = vld [vmem:[#allocation4 + $0x1e8] sm:$0xf]  ;;  %v7444_v15 = vld [vmem:[#allocation4 + $0x2dc] sm:$0xf] }
 0x1f0   :  { %553 = vst [vmem:[#allocation4 + $0x50] sm:$0xff] %v526_v4  ;;  %v511_v57 = vsel %vm508_vm11, %v8192_v12, %v510_v49  ;;  %v1493_v62 = vsel %vm1490_vm8, %v8156_v45, %v1492_v18  ;;  %v7417_v3 = vld [vmem:[#allocation4 + $0x1fc] sm:$0xf0]  ;;  %v1494_v10 = vsel %vm1490_vm8, %v1458_v6, %v1479_v29  ;;  %v6500_v29 = vld [vmem:[#allocation4 + $0x2f0] sm:$0xf0]  ;;  %v10616_v35 = vrot.slane %v8314_v41, 4 }
 0x1f1   :  { %541 = vst [vmem:[#allocation4 + $0x8] sm:$0xff] %v511_v57  ;;  %v6379_v16 = vor.u32 %v7417_v3, %v6378_v11  ;;  %v6506_v6 = vld [vmem:[#allocation4 + $0x2e0] sm:$0xf]  ;;  %v6503_v57 = vor.u32 %v7444_v15, %v6500_v29  ;;  %v6476_v3 = vld [vmem:[#allocation4 + $0x2c0] sm:$0xf0] }
 0x1f2   :  { %545 = vst.msk [vmem:[#allocation4 + $0x10] sm:$0xff] %vm8025_vm4, %v512_v7  ;;  %v6140_v34 = vld [vmem:[#allocation4 + $0x20] sm:$0xf0] }
 0x1f3   :  { %1523 = vst [vmem:[#allocation4 + $0x308] sm:$0xff] %v1493_v62  ;;  %2339 = vmatmul.bf16.gmra.mxu2 %v8660_v59  ;;  %2388 = vmatpush.bf16.msrb.mxu1 %v6379_v16  ;;  %v1470_v28 = vpop.permute.xlu0 %1469  ;;  %v6507_v62 = vor.u32 %v7448_v53, %v6506_v6  ;;  %v10619_v6 = vrot.slane %v8533_v58, 4 }
 0x1f4   :  { %1524 = vst.msk [vmem:[#allocation4 + $0x310] sm:$0xff] %vm8025_vm4, %v1494_v10  ;;  %v1485_v12 = vrot.slane %v1470_v28, 4  ;;  %v1476_v45 = vpop.permute.xlu1 %1475  ;;  %v904_v25 = vpop.permute.xlu2 %903  ;;  %v7442_v10 = vld [vmem:[#allocation4 + $0x2c4] sm:$0xf0] }
 0x1f5   :  { %v1488_v17 = vrot.slane %v1476_v45, 4  ;;  %v920_v44 = vrot.slane %v904_v25, 4 }
 0x1f6   :  { %v1502_v55 = vsel %vm506_vm2, %v10614_v20, %v1485_v12  ;;  %v1504_v37 = vsel %vm1490_vm8, %v1470_v28, %v1485_v12  ;;  %v10617_v28 = vrot.slane %v8535_v54, 4  ;;  %v7438_v20 = vld [vmem:[#allocation4 + $0x2ac] sm:$0xf] }
 0x1f7   :  { %v1503_v9 = vsel %vm1490_vm8, %v8408_v56, %v1502_v55  ;;  %1530 = vst.msk [vmem:[#allocation4 + $0x340] sm:$0xff] %vm8025_vm4, %v1504_v37  ;;  %v1507_v47 = vsel %vm506_vm2, %v10615_v63, %v1488_v17  ;;  %v1509_v52 = vsel %vm1490_vm8, %v1476_v45, %v1488_v17  ;;  %v944_v0 = vsel %vm506_vm2, %v919_v13, %v920_v44  ;;  %v7363_v21 = vld [vmem:[#allocation4 + $0x4c] sm:$0xf0]  ;;  %v6164_v39 = vld [vmem:[#allocation4 + $0x50] sm:$0xf0] }
 0x1f8   :  { %1529 = vst [vmem:[#allocation4 + $0x338] sm:$0xff] %v1503_v9  ;;  %v1508_v40 = vsel %vm1490_vm8, %v8504_v2, %v1507_v47  ;;  %v945_v56 = vsel %vm922_vm10, %v8643_v5, %v944_v0  ;;  %2389 = vmatpush.bf16.msrb.mxu1 %v6355_v24  ;;  %v6163_v36 = vor.u32 %v7363_v21, %v6162_v14  ;;  %v6138_v19 = vld [vmem:[#allocation4 + $0x8] sm:$0xf]  ;;  %v7354_v27 = vld [vmem:[#allocation4 + $0xc] sm:$0xf] }
 0x1f9   :  { %1532 = vst [vmem:[#allocation4 + $0x350] sm:$0xff] %v1508_v40  ;;  %v6167_v50 = vor.u32 %v7360_v26, %v6164_v39  ;;  %v6331_v13 = vor.u32 %v7405_v23, %v6330_v30  ;;  %v7357_v5 = vld [vmem:[#allocation4 + $0x1c] sm:$0xf0]  ;;  %v6143_v7 = vor.u32 %v7354_v27, %v6140_v34  ;;  %v6482_v55 = vld [vmem:[#allocation4 + $0x2b0] sm:$0xf]  ;;  %v6479_v37 = vor.u32 %v7438_v20, %v6476_v3 }
 0x1fa   :  { %1533 = vst.msk [vmem:[#allocation4 + $0x358] sm:$0xff] %vm8025_vm4, %v1509_v52  ;;  %2370 = vmatpush.bf16.msrb.mxu0 %v6163_v36  ;;  %v6139_v4 = vor.u32 %v7357_v5, %v6138_v19  ;;  %v6483_v24 = vor.u32 %v7442_v10, %v6482_v55  ;;  %v6452_v14 = vld [vmem:[#allocation4 + $0x290] sm:$0xf0]  ;;  %v7436_v23 = vld [vmem:[#allocation4 + $0x294] sm:$0xf0]  ;;  %v10618_v40 = vrot.slane %v8530_v61, 4 }
 0x1fb   :  { %969 = vst.msk [vmem:[#allocation4 + $0x178] sm:$0xff] %vm8025_vm4, %v945_v56  ;;  %2427 = vmatpush.bf16.msrb.mxu3 %v6167_v50  ;;  %v1464_v2 = vpop.permute.xlu0 %1463  ;;  %v7432_v47 = vld [vmem:[#allocation4 + $0x27c] sm:$0xf]  ;;  %v6458_v52 = vld [vmem:[#allocation4 + $0x280] sm:$0xf] }
 0x1fc   :  { %2390 = vmatpush.bf16.msrb.mxu1 %v6331_v13  ;;  %v1482_v22 = vrot.slane %v1464_v2, 4  ;;  %v896_v8 = vpop.permute.xlu1 %895  ;;  %v7426_v21 = vld [vmem:[#allocation4 + $0x24c] sm:$0xf]  ;;  %v6434_v39 = vld [vmem:[#allocation4 + $0x250] sm:$0xf]  ;;  %v6455_v36 = vor.u32 %v7432_v47, %v6452_v14  ;;  %v6459_v30 = vor.u32 %v7436_v23, %v6458_v52 }
 0x1fd   :  { %v916_v49 = vrot.slane %v896_v8, 4  ;;  %v6522_v26 = vld [vmem:[#allocation4 + $0x308] sm:$0xf]  ;;  %v7450_v50 = vld [vmem:[#allocation4 + $0x30c] sm:$0xf] }
 0x1fe   :  { %v1497_v18 = vsel %vm506_vm2, %v10616_v35, %v1482_v22  ;;  %v1499_v11 = vsel %vm1490_vm8, %v1464_v2, %v1482_v22  ;;  %2371 = vmatpush.bf16.msrb.mxu0 %v6139_v4  ;;  %v6266_v20 = vld [vmem:[#allocation4 + $0x100] sm:$0xf]  ;;  %v7408_v55 = vld [vmem:[#allocation4 + $0x1bc] sm:$0xf]  ;;  %v7385_v14 = vld [vmem:[#allocation4 + $0x104] sm:$0xf] }
 0x1ff   :  { %v1498_v16 = vsel %vm1490_vm8, %v8314_v41, %v1497_v18  ;;  %1527 = vst.msk [vmem:[#allocation4 + $0x328] sm:$0xff] %vm8025_vm4, %v1499_v11  ;;  %v938_v38 = vsel %vm506_vm2, %v10617_v28, %v916_v49  ;;  %2391 = vmatmul.bf16.vlgmr.msrb.gmra.mxu1 %v8572_v33  ;;  %2428 = vmatpush.bf16.msrb.mxu3 %v6143_v7  ;;  %v6546_v46 = vld [vmem:[#allocation4 + $0x338] sm:$0xf]  ;;  %v7456_v12 = vld [vmem:[#allocation4 + $0x33c] sm:$0xf] }
 0x200   :  { %1526 = vst [vmem:[#allocation4 + $0x320] sm:$0xff] %v1498_v16  ;;  %v939_v45 = vsel %vm922_vm10, %v8535_v54, %v938_v38  ;;  %v7459_v25 = vld [vmem:[#allocation4 + $0x34c] sm:$0xf0]  ;;  %v6548_v41 = vld [vmem:[#allocation4 + $0x350] sm:$0xf0] }
 0x201   :  { %966 = vst.msk [vmem:[#allocation4 + $0x160] sm:$0xff] %vm8025_vm4, %v939_v45  ;;  %2372 = vmatmul.bf16.vlgmr.msrb.gmra.mxu0 %v8613_v31  ;;  %v6547_v17 = vor.u32 %v7459_v25, %v6546_v46  ;;  %v6551_v44 = vor.u32 %v7456_v12, %v6548_v41  ;;  %v7430_v49 = vld [vmem:[#allocation4 + $0x264] sm:$0xf0]  ;;  %v7424_v11 = vld [vmem:[#allocation4 + $0x234] sm:$0xf0] }
 0x202   :  { %2440 = vmatpush.bf16.msra.mxu0 %v6503_v57  ;;  %2429 = vmatmul.bf16.vlgmr.msrb.gmra.mxu3 %v8613_v31  ;;  %v7400_v19 = vld [vmem:[#allocation4 + $0x174] sm:$0xf0]  ;;  %v6316_v2 = vld [vmem:[#allocation4 + $0x178] sm:$0xf0]  ;;  %v6435_v18 = vor.u32 %v7430_v49, %v6434_v39  ;;  %v7414_v16 = vld [vmem:[#allocation4 + $0x1ec] sm:$0xf] }
 0x203   :  { %2497 = vmatpush.bf16.msra.mxu3 %v6507_v62  ;;  %2408 = vmatpush.bf16.msrb.mxu2 %v6547_v17  ;;  %v880_v54 = vpop.permute.xlu0 %879  ;;  %v7420_v57 = vld [vmem:[#allocation4 + $0x21c] sm:$0xf]  ;;  %v6410_v62 = vld [vmem:[#allocation4 + $0x220] sm:$0xf]  ;;  %v6380_v28 = vld [vmem:[#allocation4 + $0x200] sm:$0xf0] }
 0x204   :  { %2465 = vmatpush.bf16.msra.mxu1 %v6551_v44  ;;  %v908_v9 = vrot.slane %v880_v54, 4  ;;  %v888_v63 = vpop.permute.xlu1 %887  ;;  %v6411_v10 = vor.u32 %v7424_v11, %v6410_v62  ;;  %v6386_v38 = vld [vmem:[#allocation4 + $0x1f0] sm:$0xf]  ;;  %v7418_v45 = vld [vmem:[#allocation4 + $0x204] sm:$0xf0] }
 0x205   :  { %v912_v0 = vrot.slane %v888_v63, 4  ;;  %v7388_v54 = vld [vmem:[#allocation4 + $0x114] sm:$0xf0]  ;;  %v6268_v23 = vld [vmem:[#allocation4 + $0x118] sm:$0xf0] }
 0x206   :  { %2441 = vmatpush.bf16.msra.mxu0 %v6479_v37  ;;  %v926_v56 = vsel %vm506_vm2, %v10618_v40, %v908_v9  ;;  %v6383_v37 = vor.u32 %v7414_v16, %v6380_v28  ;;  %v6356_v9 = vld [vmem:[#allocation4 + $0x1d0] sm:$0xf0]  ;;  %v6362_v63 = vld [vmem:[#allocation4 + $0x1c0] sm:$0xf]  ;;  %v7412_v47 = vld [vmem:[#allocation4 + $0x1d4] sm:$0xf0]  ;;  %v6267_v52 = vor.u32 %v7388_v54, %v6266_v20 }
 0x207   :  { %2498 = vmatpush.bf16.msra.mxu3 %v6483_v24  ;;  %v927_v15 = vsel %vm922_vm10, %v8530_v61, %v926_v56  ;;  %v932_v13 = vsel %vm506_vm2, %v10619_v6, %v912_v0  ;;  %v7453_v27 = vld [vmem:[#allocation4 + $0x31c] sm:$0xf0]  ;;  %v6524_v29 = vld [vmem:[#allocation4 + $0x320] sm:$0xf0]  ;;  %v6387_v24 = vor.u32 %v7418_v45, %v6386_v38  ;;  %v6271_v0 = vor.u32 %v7385_v14, %v6268_v23  ;;  %v7382_v56 = vld [vmem:[#allocation4 + $0xe4] sm:$0xf0] }
 0x208   :  { %960 = vst.msk [vmem:[#allocation4 + $0x130] sm:$0xff] %vm8025_vm4, %v927_v15  ;;  %v933_v5 = vsel %vm922_vm10, %v8533_v58, %v932_v13  ;;  %v6523_v53 = vor.u32 %v7453_v27, %v6522_v26  ;;  %v6527_v22 = vor.u32 %v7450_v50, %v6524_v29  ;;  %v6314_v8 = vld [vmem:[#allocation4 + $0x160] sm:$0xf]  ;;  %v7397_v4 = vld [vmem:[#allocation4 + $0x164] sm:$0xf]  ;;  %v6359_v39 = vor.u32 %v7408_v55, %v6356_v9 }
 0x209   :  { %963 = vst.msk [vmem:[#allocation4 + $0x148] sm:$0xff] %vm8025_vm4, %v933_v5  ;;  %v6428_v61 = vld [vmem:[#allocation4 + $0x260] sm:$0xf0]  ;;  %v6315_v34 = vor.u32 %v7400_v19, %v6314_v8  ;;  %v6319_v7 = vor.u32 %v7397_v4, %v6316_v2  ;;  %v6404_v58 = vld [vmem:[#allocation4 + $0x230] sm:$0xf0]  ;;  %v6363_v40 = vor.u32 %v7412_v47, %v6362_v63 }
 0x20a   :  { %2442 = vmatpush.bf16.msra.mxu0 %v6455_v36  ;;  %2409 = vmatpush.bf16.msrb.mxu2 %v6523_v53  ;;  %v6431_v35 = vor.u32 %v7426_v21, %v6428_v61  ;;  %v6407_v3 = vor.u32 %v7420_v57, %v6404_v58  ;;  %v6332_v21 = vld [vmem:[#allocation4 + $0x1a0] sm:$0xf0]  ;;  %v6244_v36 = vld [vmem:[#allocation4 + $0xe8] sm:$0xf0]  ;;  %v6242_v26 = vld [vmem:[#allocation4 + $0xd0] sm:$0xf] }
 0x20b   :  { %2499 = vmatpush.bf16.msra.mxu3 %v6459_v30  ;;  %2466 = vmatpush.bf16.msra.mxu1 %v6527_v22  ;;  %v7406_v30 = vld [vmem:[#allocation4 + $0x1a4] sm:$0xf0]  ;;  %v7379_v50 = vld [vmem:[#allocation4 + $0xd4] sm:$0xf]  ;;  %v6554_v19 = vld [vmem:[#allocation4 + $0x340] sm:$0xf]  ;;  %v6243_v27 = vor.u32 %v7382_v56, %v6242_v26 }
 0x20c   :  { %v7460_v15 = vld [vmem:[#allocation4 + $0x354] sm:$0xf0]  ;;  %v7457_v6 = vld [vmem:[#allocation4 + $0x344] sm:$0xf]  ;;  %v6556_v13 = vld [vmem:[#allocation4 + $0x358] sm:$0xf0]  ;;  %v6247_v29 = vor.u32 %v7379_v50, %v6244_v36 }
 0x20d   :  { %6564 = vmatmul.msk.bf16.vlgmr.msrb.gmra.mxu2 %vm216_vm0, %v8578_v1  ;;  %v7402_v2 = vld [vmem:[#allocation4 + $0x18c] sm:$0xf]  ;;  %v6338_v5 = vld [vmem:[#allocation4 + $0x190] sm:$0xf]  ;;  %v6218_v8 = vld [vmem:[#allocation4 + $0xa0] sm:$0xf]  ;;  %v6555_v61 = vor.u32 %v7460_v15, %v6554_v19 }
 0x20e   :  { %2478 = vmatpush.bf16.msra.mxu2 %v6315_v34  ;;  %2443 = vmatpush.bf16.msra.mxu0 %v6431_v35  ;;  %v6335_v53 = vor.u32 %v7402_v2, %v6332_v21  ;;  %v6339_v22 = vor.u32 %v7406_v30, %v6338_v5  ;;  %v7376_v4 = vld [vmem:[#allocation4 + $0xb4] sm:$0xf0]  ;;  %v6559_v34 = vor.u32 %v7457_v6, %v6556_v13  ;;  %v7373_v49 = vld [vmem:[#allocation4 + $0xa4] sm:$0xf]  ;;  %v7454_v35 = vld [vmem:[#allocation4 + $0x324] sm:$0xf0] }
 0x20f   :  { %2535 = vmatpush.bf16.msrb.mxu1 %v6319_v7  ;;  %2500 = vmatpush.bf16.msra.mxu3 %v6435_v18  ;;  %v6290_v46 = vld [vmem:[#allocation4 + $0x130] sm:$0xf]  ;;  %v7391_v12 = vld [vmem:[#allocation4 + $0x134] sm:$0xf]  ;;  %v6220_v7 = vld [vmem:[#allocation4 + $0xb8] sm:$0xf0]  ;;  %v6219_v58 = vor.u32 %v7376_v4, %v6218_v8 }
 0x210   :  { %2396 = vmatmul.bf16.gmra.mxu1 %v8660_v59  ;;  %v7394_v25 = vld [vmem:[#allocation4 + $0x144] sm:$0xf0]  ;;  %v6292_v41 = vld [vmem:[#allocation4 + $0x148] sm:$0xf0]  ;;  %v6223_v11 = vor.u32 %v7373_v49, %v6220_v7  ;;  %v6530_v57 = vld [vmem:[#allocation4 + $0x310] sm:$0xf] }
 0x211   :  { %2377 = vmatmul.bf16.gmra.mxu0 %v8698_v43  ;;  %v6291_v17 = vor.u32 %v7394_v25, %v6290_v46  ;;  %v6295_v44 = vor.u32 %v7391_v12, %v6292_v41  ;;  %v6532_v18 = vld [vmem:[#allocation4 + $0x328] sm:$0xf0]  ;;  %v7451_v62 = vld [vmem:[#allocation4 + $0x314] sm:$0xf]  ;;  %v7370_v38 = vld [vmem:[#allocation4 + $0x84] sm:$0xf0] }
 0x212   :  { %2444 = vmatpush.bf16.msra.mxu0 %v6407_v3  ;;  %2434 = vmatmul.bf16.gmra.mxu3 %v8698_v43  ;;  %v6194_v3 = vld [vmem:[#allocation4 + $0x70] sm:$0xf]  ;;  %v6535_v16 = vor.u32 %v7451_v62, %v6532_v18  ;;  %v7367_v28 = vld [vmem:[#allocation4 + $0x74] sm:$0xf]  ;;  %v6196_v12 = vld [vmem:[#allocation4 + $0x88] sm:$0xf0] }
 0x213   :  { %2501 = vmatpush.bf16.msra.mxu3 %v6411_v10  ;;  %2479 = vmatpush.bf16.msra.mxu2 %v6291_v17  ;;  %v6531_v10 = vor.u32 %v7454_v35, %v6530_v57  ;;  %v6195_v46 = vor.u32 %v7370_v38, %v6194_v3  ;;  %v6199_v45 = vor.u32 %v7367_v28, %v6196_v12  ;;  %v7364_v25 = vld [vmem:[#allocation4 + $0x54] sm:$0xf0]  ;;  %v6172_v41 = vld [vmem:[#allocation4 + $0x58] sm:$0xf0]  ;;  %v6170_v17 = vld [vmem:[#allocation4 + $0x40] sm:$0xf] }
 0x214   :  { %2536 = vmatpush.bf16.msrb.mxu1 %v6295_v44  ;;  %v6171_v44 = vor.u32 %v7364_v25, %v6170_v17  ;;  %v7361_v20 = vld [vmem:[#allocation4 + $0x44] sm:$0xf]  ;;  %v6508_v14 = vld [vmem:[#allocation4 + $0x2f8] sm:$0xf0]  ;;  %v7358_v23 = vld [vmem:[#allocation4 + $0x24] sm:$0xf0] }
 0x215   :  { %v6175_v55 = vor.u32 %v7361_v20, %v6172_v41  ;;  %v7445_v54 = vld [vmem:[#allocation4 + $0x2e4] sm:$0xf]  ;;  %v6148_v63 = vld [vmem:[#allocation4 + $0x28] sm:$0xf0]  ;;  %v7439_v21 = vld [vmem:[#allocation4 + $0x2b4] sm:$0xf] }
 0x216   :  { %2445 = vmatpush.bf16.msra.mxu0 %v6383_v37  ;;  %v6146_v37 = vld [vmem:[#allocation4 + $0x10] sm:$0xf]  ;;  %v7433_v56 = vld [vmem:[#allocation4 + $0x284] sm:$0xf]  ;;  %v7427_v30 = vld [vmem:[#allocation4 + $0x254] sm:$0xf] }
 0x217   :  { %2502 = vmatpush.bf16.msra.mxu3 %v6387_v24  ;;  %2480 = vmatpush.bf16.msra.mxu2 %v6267_v52  ;;  %v7355_v24 = vld [vmem:[#allocation4 + $0x14] sm:$0xf]  ;;  %v6147_v9 = vor.u32 %v7358_v23, %v6146_v37  ;;  %v6511_v52 = vor.u32 %v7445_v54, %v6508_v14  ;;  %v6436_v26 = vld [vmem:[#allocation4 + $0x268] sm:$0xf0]  ;;  %v6412_v19 = vld [vmem:[#allocation4 + $0x238] sm:$0xf0] }
 0x218   :  { %2537 = vmatpush.bf16.msrb.mxu1 %v6271_v0  ;;  %v6151_v47 = vor.u32 %v7355_v24, %v6148_v63  ;;  %v6484_v0 = vld [vmem:[#allocation4 + $0x2c8] sm:$0xf0]  ;;  %v6439_v50 = vor.u32 %v7427_v30, %v6436_v26  ;;  %v7421_v15 = vld [vmem:[#allocation4 + $0x224] sm:$0xf]  ;;  %v7415_v13 = vld [vmem:[#allocation4 + $0x1f4] sm:$0xf] }
 0x219   :  { %v6415_v6 = vor.u32 %v7421_v15, %v6412_v19  ;;  %v7409_v5 = vld [vmem:[#allocation4 + $0x1c4] sm:$0xf]  ;;  %v7403_v49 = vld [vmem:[#allocation4 + $0x194] sm:$0xf] }
 0x21a   :  { %2446 = vmatpush.bf16.msra.mxu0 %v6359_v39  ;;  %v6487_v39 = vor.u32 %v7439_v21, %v6484_v0 }
 0x21b   :  { %2503 = vmatpush.bf16.msra.mxu3 %v6363_v40  ;;  %2481 = vmatpush.bf16.msra.mxu2 %v6243_v27  ;;  %v6460_v40 = vld [vmem:[#allocation4 + $0x298] sm:$0xf0]  ;;  %v6388_v27 = vld [vmem:[#allocation4 + $0x208] sm:$0xf0] }
 0x21c   :  { %2538 = vmatpush.bf16.msrb.mxu1 %v6247_v29  ;;  %v6463_v36 = vor.u32 %v7433_v56, %v6460_v40  ;;  %v6391_v2 = vor.u32 %v7415_v13, %v6388_v27  ;;  %v8901_v8 = vpop.permute.xlu2 %1666 }
 0x21d   :  { %6565 = vmatmul.msk.bf16.gmra.mxu2 %vm216_vm0, %v8662_v32 }
 0x21e   :  { %2447 = vmatpush.bf16.msra.mxu0 %v6335_v53  ;;  %v6364_v53 = vld [vmem:[#allocation4 + $0x1d8] sm:$0xf0] }
 0x21f   :  { %2504 = vmatpush.bf16.msra.mxu3 %v6339_v22  ;;  %2482 = vmatpush.bf16.msra.mxu2 %v6219_v58  ;;  %v6367_v22 = vor.u32 %v7409_v5, %v6364_v53 }
 0x220   :  { %6566 = vmatmul.msk.bf16.vlgmr.msra.gmra.mxu1 %vm216_vm0, %v8578_v1 }
 0x221   :  { %2539 = vmatpush.bf16.msrb.mxu1 %v6223_v11  ;;  %2448 = vmatmul.bf16.vlgmr.msra.gmra.mxu0 %v8572_v33 }
 0x222   :  { %2522 = vmatpush.bf16.msrb.mxu0 %v6555_v61  ;;  %2505 = vmatmul.bf16.vlgmr.msra.gmra.mxu3 %v8572_v33  ;;  %v6340_v61 = vld [vmem:[#allocation4 + $0x1a8] sm:$0xf0] }
 0x223   :  { %2579 = vmatpush.bf16.msrb.mxu3 %v6559_v34  ;;  %2483 = vmatpush.bf16.msra.mxu2 %v6195_v46  ;;  %v8903_v34 = vpop.permute.xlu1 %1656  ;;  %v6343_v35 = vor.u32 %v7403_v49, %v6340_v61  ;;  %v7653_v46 = vld [vmem:[#allocation2] sm:$0xff] }
 0x224   :  { %v8906_v62 = vpop.permute.xlu2 %1661 }
 0x225   :  { %2540 = vmatpush.bf16.msrb.mxu1 %v6199_v45 }
 0x226   :  { %2523 = vmatpush.bf16.msrb.mxu0 %v6531_v10 }
 0x227   :  { %2580 = vmatpush.bf16.msrb.mxu3 %v6535_v16  ;;  %2484 = vmatpush.bf16.msra.mxu2 %v6171_v44 }
 0x229   :  { %2541 = vmatpush.bf16.msrb.mxu1 %v6175_v55 }
 0x22b   :  { %2485 = vmatpush.bf16.msra.mxu2 %v6147_v9 }
 0x22d   :  { %2542 = vmatpush.bf16.msrb.mxu1 %v6151_v47 }
 0x22e   :  { %2486 = vmatmul.bf16.vlgmr.msra.gmra.mxu2 %v8613_v31 }
 0x22f   :  { %2554 = vmatpush.bf16.msrb.mxu2 %v6511_v52 }
 0x230   :  { %6567 = vmatmul.msk.bf16.gmra.mxu1 %vm216_vm0, %v8662_v32 }
 0x231   :  { %2453 = vmatmul.bf16.gmra.mxu0 %v8660_v59 }
 0x232   :  { %2510 = vmatmul.bf16.gmra.mxu3 %v8660_v59 }
 0x233   :  { %2555 = vmatpush.bf16.msrb.mxu2 %v6487_v39 }
 0x237   :  { %2556 = vmatpush.bf16.msrb.mxu2 %v6463_v36  ;;  %v2297_v4 = vpop.f32.mrf.mxu0 }
 0x23b   :  { %2557 = vmatpush.bf16.msrb.mxu2 %v6439_v50 }
 0x23e   :  { %2491 = vmatmul.bf16.gmra.mxu2 %v8698_v43  ;;  %v2278_v29 = vpop.f32.mrf.mxu3 }
 0x23f   :  { %2558 = vmatpush.bf16.msrb.mxu2 %v6415_v6 }
 0x240   :  { %2543 = vmatmul.bf16.vlgmr.msrb.gmra.mxu1 %v8613_v31 }
 0x241   :  { %6568 = vmatmul.msk.bf16.vlgmr.msrb.gmra.mxu0 %vm216_vm0, %v8578_v1 }
 0x242   :  { %6570 = vmatmul.msk.bf16.vlgmr.msrb.gmra.mxu3 %vm216_vm0, %v8578_v1  ;;  %v2299_v1 = vpop.f32.mrf.mxu0 }
 0x243   :  { %2559 = vmatpush.bf16.msrb.mxu2 %v6391_v2 }
 0x246   :  { %v2259_v7 = vpop.f32.mrf.mxu2  ;;  %v2280_v31 = vpop.f32.mrf.mxu3 }
 0x247   :  { %2560 = vmatpush.bf16.msrb.mxu2 %v6367_v22  ;;  %v2260_v18 = vadd.f32 %v2259_v7, %v8903_v34 }
 0x249   :  { %v2279_v58 = vadd.f32 %v2278_v29, %v2260_v18 }
 0x24a   :  { %v2302_v41 = vpop.f32.mrf.mxu0 }
 0x24b   :  { %2561 = vmatpush.bf16.msrb.mxu2 %v6343_v35  ;;  %v2298_v11 = vadd.f32 %v2297_v4, %v2279_v58 }
 0x24d   :  { %v2592_v57 = vmax.f32 %v2298_v11, 0.0 }
 0x24e   :  { %v2261_v3 = vpop.f32.mrf.mxu2  ;;  %2562 = vmatmul.bf16.vlgmr.msrb.gmra.mxu2 %v8572_v33  ;;  %v2283_v10 = vpop.f32.mrf.mxu3 }
 0x24f   :  { %v2616_v16 = vmul.f32 %v2592_v57, %v7871_v48  ;;  %v2262_v28 = vadd.f32 %v2261_v3, %v8906_v62  ;;  %v2316_v33 = vpop.f32.mrf.mxu1 }
 0x250   :  { %2548 = vmatmul.bf16.gmra.mxu1 %v8698_v43  ;;  %v2317_v40 = vadd.f32 %v2316_v33, %v8903_v34 }
 0x251   :  { %v2281_v38 = vadd.f32 %v2280_v31, %v2262_v28  ;;  %v3076_v12 = vpack.c.bf16 %v2616_v16, %v7653_v46  ;;  %6569 = vmatmul.msk.bf16.gmra.mxu0 %vm216_vm0, %v8662_v32 }
 0x252   :  { %6571 = vmatmul.msk.bf16.gmra.mxu3 %vm216_vm0, %v8662_v32  ;;  %v8924_v32 = vpop.permute.xlu0 %1671  ;;  %v2304_v52 = vpop.f32.mrf.mxu0 }
 0x253   :  { %v2300_v45 = vadd.f32 %v2299_v1, %v2281_v38  ;;  %3108 = vrot.lane.b32.xlu2 %v3076_v12, %s7682_s9  ;;  %2968 = vrot.lane.b32.xlu0 %v3076_v12, %s7686_s22 }
 0x254   :  { %2840 = vrot.lane.b32.xlu1 %v3076_v12, %s7687_s23 }
 0x255   :  { %v2598_v25 = vmax.f32 %v2300_v45, 0.0 }
 0x256   :  { %v2264_v43 = vpop.f32.mrf.mxu2  ;;  %v2285_v17 = vpop.f32.mrf.mxu3 }
 0x257   :  { %v2622_v44 = vmul.f32 %v2598_v25, %v7871_v48  ;;  %v2265_v20 = vadd.f32 %v2264_v43, %v8901_v8  ;;  %v2318_v47 = vpop.f32.mrf.mxu1 }
 0x258   :  { %v2319_v13 = vadd.f32 %v2318_v47, %v8906_v62 }
 0x259   :  { %v2284_v55 = vadd.f32 %v2283_v10, %v2265_v20  ;;  %v2947_v37 = vpack.c.bf16 %v2622_v44, %v7653_v46 }
 0x25b   :  { %v2303_v24 = vadd.f32 %v2302_v41, %v2284_v55  ;;  %2974 = vrot.lane.b32.xlu2 %v2947_v37, %s7686_s22  ;;  %2846 = vrot.lane.b32.xlu0 %v2947_v37, %s7687_s23 }
 0x25c   :  { %2712 = vrot.lane.b32.xlu1 %v3076_v12, %s7689_s25 }
 0x25d   :  { %v2604_v54 = vmax.f32 %v2303_v24, 0.0 }
 0x25e   :  { %v2266_v14 = vpop.f32.mrf.mxu2  ;;  %2567 = vmatmul.bf16.gmra.mxu2 %v8660_v59  ;;  %v2354_v23 = vpop.f32.mrf.mxu3 }
 0x25f   :  { %v2628_v9 = vmul.f32 %v2604_v54, %v7871_v48  ;;  %v2267_v63 = vadd.f32 %v2266_v14, %v8924_v32  ;;  %v2321_v15 = vpop.f32.mrf.mxu1 }
 0x260   :  { %v2322_v61 = vadd.f32 %v2321_v15, %v8901_v8 }
 0x261   :  { %v2286_v0 = vadd.f32 %v2285_v17, %v2267_v63  ;;  %v2822_v21 = vpack.c.bf16 %v2628_v9, %v7653_v46 }
 0x263   :  { %v2305_v39 = vadd.f32 %v2304_v52, %v2286_v0  ;;  %2852 = vrot.lane.b32.xlu2 %v2822_v21, %s7687_s23  ;;  %2718 = vrot.lane.b32.xlu0 %v2947_v37, %s7689_s25 }
 0x264   :  { %3116 = vrot.lane.b32.xlu1 %v2947_v37, %s7682_s9 }
 0x265   :  { %v2610_v56 = vmax.f32 %v2305_v39, 0.0 }
 0x266   :  { %v2335_v59 = vpop.f32.mrf.mxu2  ;;  %v2356_v26 = vpop.f32.mrf.mxu3 }
 0x267   :  { %v2634_v36 = vmul.f32 %v2610_v56, %v7871_v48  ;;  %v2336_v30 = vadd.f32 %v2335_v59, %v2317_v40  ;;  %v2323_v4 = vpop.f32.mrf.mxu1 }
 0x268   :  { %v2324_v1 = vadd.f32 %v2323_v4, %v8924_v32 }
 0x269   :  { %v2355_v50 = vadd.f32 %v2354_v23, %v2336_v30  ;;  %v3088_v19 = vpack.c.bf16 %v2634_v36, %v7653_v46 }
 0x26b   :  { %v2593_v6 = vmax.f32 %v2355_v50, 0.0  ;;  %3132 = vrot.lane.b32.xlu2 %v3088_v19, %s7682_s9  ;;  %3124 = vrot.lane.b32.xlu0 %v2822_v21, %s7682_s9 }
 0x26c   :  { %2980 = vrot.lane.b32.xlu1 %v2822_v21, %s7686_s22 }
 0x26d   :  { %v8939_v27 = vmul.f32 %v2593_v6, %v7875_v51 }
 0x26e   :  { %v2337_v29 = vpop.f32.mrf.mxu2 }
 0x26f   :  { %v3228_v48 = vpack.c.bf16 %v8939_v27, %v2616_v16  ;;  %v2338_v2 = vadd.f32 %v2337_v29, %v2319_v13  ;;  %v2359_v53 = vpop.f32.mrf.mxu3 }
 0x271   :  { %3240 = vst [vmem:[#allocation4 + $0x180] sm:$0xff] %v3228_v48  ;;  %v2357_v5 = vadd.f32 %v2356_v26, %v2338_v2 }
 0x273   :  { %v2599_v22 = vmax.f32 %v2357_v5, 0.0  ;;  %2730 = vrot.lane.b32.xlu2 %v3088_v19, %s7689_s25  ;;  %2724 = vrot.lane.b32.xlu0 %v2822_v21, %s7689_s25 }
 0x274   :  { %2858 = vrot.lane.b32.xlu1 %v3088_v19, %s7687_s23 }
 0x275   :  { %v8947_v49 = vmul.f32 %v2599_v22, %v7875_v51 }
 0x276   :  { %v2340_v7 = vpop.f32.mrf.mxu2 }
 0x277   :  { %v3231_v31 = vpack.c.bf16 %v8947_v49, %v2622_v44  ;;  %v2341_v35 = vadd.f32 %v2340_v7, %v2322_v61  ;;  %v2361_v11 = vpop.f32.mrf.mxu3  ;;  %v10620_v61 = vld [vmem:[#allocation8_spill] sm:$0xff] }
 0x279   :  { %3243 = vst [vmem:[#allocation4 + $0x198] sm:$0xff] %v3231_v31  ;;  %v2360_v18 = vadd.f32 %v2359_v53, %v2341_v35 }
 0x27b   :  { %v2605_v58 = vmax.f32 %v2360_v18, 0.0  ;;  %3300 = vrot.lane.b32.xlu2 %v3228_v48, %s7685_s21  ;;  %2986 = vrot.lane.b32.xlu0 %v3088_v19, %s7686_s22 }
 0x27c   :  { %v2392_v57 = vpop.f32.mrf.mxu1  ;;  %3428 = vrot.lane.b32.xlu1 %v3228_v48, %s7684_s20 }
 0x27d   :  { %v8955_v3 = vmul.f32 %v2605_v58, %v7875_v51 }
 0x27e   :  { %v2342_v10 = vpop.f32.mrf.mxu2  ;;  %v2373_v16 = vpop.f32.mrf.mxu0 }
 0x27f   :  { %v3234_v28 = vpack.c.bf16 %v8955_v3, %v2628_v9  ;;  %v2343_v38 = vadd.f32 %v2342_v10, %v2324_v1  ;;  %v2374_v17 = vadd.f32 %v2373_v16, %v8903_v34 }
 0x281   :  { %3246 = vst [vmem:[#allocation4 + $0x1b0] sm:$0xff] %v3234_v28  ;;  %v2362_v46 = vadd.f32 %v2361_v11, %v2343_v38  ;;  %v2393_v37 = vadd.f32 %v2392_v57, %v2374_v17 }
 0x283   :  { %v2611_v12 = vmax.f32 %v2362_v46, 0.0  ;;  %3562 = vrot.lane.b32.xlu2 %v3231_v31, %s7683_s19  ;;  %3556 = vrot.lane.b32.xlu0 %v3228_v48, %s7683_s19 }
 0x284   :  { %v2394_v45 = vpop.f32.mrf.mxu1  ;;  %3306 = vrot.lane.b32.xlu1 %v3231_v31, %s7685_s21 }
 0x285   :  { %v8962_v33 = vmul.f32 %v2611_v12, %v7875_v51  ;;  %v2430_v25 = vpop.f32.mrf.mxu3 }
 0x286   :  { %v2375_v41 = vpop.f32.mrf.mxu0  ;;  %v2431_v30 = vadd.f32 %v2430_v25, %v8903_v34 }
 0x287   :  { %v3237_v43 = vpack.c.bf16 %v8962_v33, %v2634_v36  ;;  %v2376_v54 = vadd.f32 %v2375_v41, %v8906_v62 }
 0x289   :  { %3249 = vst [vmem:[#allocation4 + $0x1c8] sm:$0xff] %v3237_v43  ;;  %v2395_v52 = vadd.f32 %v2394_v45, %v2376_v54 }
 0x28b   :  { %3690 = vrot.lane.b32.xlu2 %v3231_v31, %s7688_s24  ;;  %3684 = vrot.lane.b32.xlu0 %v3228_v48, %s7688_s24 }
 0x28c   :  { %3568 = vrot.lane.b32.xlu1 %v3234_v28, %s7683_s19 }
 0x28d   :  { %v2397_v44 = vpop.f32.mrf.mxu1  ;;  %v2432_v20 = vpop.f32.mrf.mxu3 }
 0x28e   :  { %v2378_v55 = vpop.f32.mrf.mxu0  ;;  %v2433_v4 = vadd.f32 %v2432_v20, %v8906_v62 }
 0x28f   :  { %v2379_v40 = vadd.f32 %v2378_v55, %v8901_v8 }
 0x290   :  { %v2411_v24 = vpop.f32.mrf.mxu2 }
 0x291   :  { %v2412_v51 = vadd.f32 %v2411_v24, %v2393_v37  ;;  %v2398_v19 = vadd.f32 %v2397_v44, %v2379_v40 }
 0x293   :  { %v2594_v14 = vmax.f32 %v2412_v51, 0.0  ;;  %3440 = vrot.lane.b32.xlu2 %v3234_v28, %s7684_s20  ;;  %3434 = vrot.lane.b32.xlu0 %v3231_v31, %s7684_s20 }
 0x294   :  { %3446 = vrot.lane.b32.xlu1 %v3237_v43, %s7684_s20 }
 0x295   :  { %v2399_v23 = vpop.f32.mrf.mxu1  ;;  %v2618_v9 = vmul.f32 %v2594_v14, %v7889_v60  ;;  %v2435_v63 = vpop.f32.mrf.mxu3 }
 0x296   :  { %v2380_v47 = vpop.f32.mrf.mxu0  ;;  %v2436_v46 = vadd.f32 %v2435_v63, %v8901_v8 }
 0x297   :  { %v2945_v29 = vpack.c.bf16 %v2618_v9, %v8939_v27  ;;  %v2381_v48 = vadd.f32 %v2380_v47, %v8924_v32 }
 0x298   :  { %v2413_v0 = vpop.f32.mrf.mxu2 }
 0x299   :  { %v2414_v21 = vadd.f32 %v2413_v0, %v2395_v52  ;;  %v2400_v58 = vadd.f32 %v2399_v23, %v2381_v48 }
 0x29b   :  { %v2600_v39 = vmax.f32 %v2414_v21, 0.0  ;;  %3696 = vrot.lane.b32.xlu2 %v3234_v28, %s7688_s24  ;;  %3312 = vrot.lane.b32.xlu0 %v3234_v28, %s7685_s21 }
 0x29c   :  { %3702 = vrot.lane.b32.xlu1 %v3237_v43, %s7688_s24 }
 0x29d   :  { %v2468_v56 = vpop.f32.mrf.mxu1  ;;  %v2624_v59 = vmul.f32 %v2600_v39, %v7889_v60  ;;  %v2437_v36 = vpop.f32.mrf.mxu3 }
 0x29e   :  { %v2449_v26 = vpop.f32.mrf.mxu0 }
 0x29f   :  { %v2450_v50 = vadd.f32 %v2449_v26, %v2431_v30  ;;  %v2820_v47 = vpack.c.bf16 %v2624_v59, %v8947_v49 }
 0x2a0   :  { %v2416_v15 = vpop.f32.mrf.mxu2 }
 0x2a1   :  { %v2469_v6 = vadd.f32 %v2468_v56, %v2450_v50  ;;  %v2417_v13 = vadd.f32 %v2416_v15, %v2398_v19  ;;  %v10621_v15 = vld [vmem:[#allocation9_spill] sm:$0xff] }
 0x2a3   :  { %3318 = vrot.lane.b32.xlu2 %v3237_v43, %s7685_s21  ;;  %3574 = vrot.lane.b32.xlu0 %v3237_v43, %s7683_s19  ;;  %v2595_v2 = vmax.f32 %v2469_v6, 0.0  ;;  %v2606_v5 = vmax.f32 %v2417_v13, 0.0 }
 0x2a4   :  { %2970 = vrot.lane.b32.xlu1 %v2945_v29, %s7686_s22 }
 0x2a5   :  { %v2470_v53 = vpop.f32.mrf.mxu1  ;;  %v2506_v22 = vpop.f32.mrf.mxu3  ;;  %v8987_v7 = vmul.f32 %v2595_v2, %v10620_v61  ;;  %v8990_v31 = vmul.f32 %v2606_v5, %v7889_v60 }
 0x2a6   :  { %v2451_v27 = vpop.f32.mrf.mxu0 }
 0x2a7   :  { %2643 = vst [vmem:[#allocation3 + $0x20] sm:$0xff] %v8987_v7  ;;  %v3229_v35 = vpack.c.bf16 %v8987_v7, %v2618_v9  ;;  %v2452_v18 = vadd.f32 %v2451_v27, %v2433_v4 }
 0x2a8   :  { %v2418_v11 = vpop.f32.mrf.mxu2 }
 0x2a9   :  { %3241 = vst [vmem:[#allocation4 + $0x188] sm:$0xff] %v3229_v35  ;;  %v2471_v57 = vadd.f32 %v2470_v53, %v2452_v18  ;;  %v2419_v1 = vadd.f32 %v2418_v11, %v2400_v58 }
 0x2ab   :  { %2842 = vrot.lane.b32.xlu2 %v2945_v29, %s7687_s23  ;;  %3110 = vrot.lane.b32.xlu0 %v2945_v29, %s7682_s9  ;;  %v2601_v10 = vmax.f32 %v2471_v57, 0.0  ;;  %v2612_v16 = vmax.f32 %v2419_v1, 0.0 }
 0x2ac   :  { %3558 = vrot.lane.b32.xlu1 %v3229_v35, %s7683_s19 }
 0x2ad   :  { %v8997_v28 = vpop.permute.xlu2 %3108  ;;  %v2508_v38 = vpop.f32.mrf.mxu3  ;;  %v9001_v12 = vmul.f32 %v2601_v10, %v10620_v61  ;;  %v9004_v45 = vmul.f32 %v2612_v16, %v7889_v60  ;;  %v2438_v60 = vadd.f32 %v2437_v36, %v8924_v32 }
 0x2ae   :  { %v2473_v25 = vpop.f32.mrf.mxu1  ;;  %v2454_v41 = vpop.f32.mrf.mxu0 }
 0x2af   :  { %2649 = vst [vmem:[#allocation3 + $0x60] sm:$0xff] %v9001_v12  ;;  %v3232_v43 = vpack.c.bf16 %v9001_v12, %v2624_v59  ;;  %v2455_v17 = vadd.f32 %v2454_v41, %v2436_v46  ;;  %v3085_v41 = vpack.c.bf16 %v8990_v31, %v8955_v3 }
 0x2b1   :  { %v2487_v44 = vpop.f32.mrf.mxu2  ;;  %3244 = vst [vmem:[#allocation4 + $0x1a0] sm:$0xff] %v3232_v43  ;;  %v2474_v20 = vadd.f32 %v2473_v25, %v2455_v17 }
 0x2b2   :  { %v2488_v52 = vadd.f32 %v2487_v44, %v8903_v34 }
 0x2b3   :  { %2714 = vrot.lane.b32.xlu2 %v2945_v29, %s7689_s25  ;;  %3302 = vrot.lane.b32.xlu0 %v3229_v35, %s7685_s21  ;;  %v2607_v55 = vmax.f32 %v2474_v20, 0.0 }
 0x2b4   :  { %3686 = vrot.lane.b32.xlu1 %v3229_v35, %s7688_s24  ;;  %v2507_v40 = vadd.f32 %v2506_v22, %v2488_v52 }
 0x2b5   :  { %v9011_v37 = vpop.permute.xlu2 %2974  ;;  %v9015_v24 = vmul.f32 %v2607_v55, %v10620_v61  ;;  %v2511_v51 = vpop.f32.mrf.mxu3 }
 0x2b6   :  { %v2456_v54 = vpop.f32.mrf.mxu0  ;;  %v2475_v9 = vpop.f32.mrf.mxu1 }
 0x2b7   :  { %v9019_v14 = vpack.c.bf16 %v9015_v24, %v8990_v31  ;;  %v2457_v23 = vadd.f32 %v2456_v54, %v2438_v60 }
 0x2b9   :  { %v2489_v63 = vpop.f32.mrf.mxu2  ;;  %3247 = vst [vmem:[#allocation4 + $0x1b8] sm:$0xff] %v9019_v14  ;;  %v2476_v0 = vadd.f32 %v2475_v9, %v2457_v23 }
 0x2ba   :  { %v2490_v50 = vadd.f32 %v2489_v63, %v8906_v62  ;;  %v10622_v63 = vld [vmem:[#allocation10_spill] sm:$0xff] }
 0x2bb   :  { %3430 = vrot.lane.b32.xlu2 %v3229_v35, %s7684_s20  ;;  %2976 = vrot.lane.b32.xlu0 %v2820_v47, %s7686_s22  ;;  %v2613_v21 = vmax.f32 %v2476_v0, 0.0 }
 0x2bc   :  { %2848 = vrot.lane.b32.xlu1 %v2820_v47, %s7687_s23  ;;  %v2509_v48 = vadd.f32 %v2508_v38, %v2490_v50 }
 0x2bd   :  { %v9027_v39 = vpop.permute.xlu2 %2852  ;;  %v9030_v56 = vmul.f32 %v2613_v21, %v10620_v61  ;;  %v2513_v30 = vpop.f32.mrf.mxu3 }
 0x2be   :  { %v2525_v36 = vpop.f32.mrf.mxu0  ;;  %v2544_v2 = vpop.f32.mrf.mxu1 }
 0x2bf   :  { %v9034_v49 = vpack.c.bf16 %v9030_v56, %v9004_v45  ;;  %v2526_v59 = vadd.f32 %v2525_v36, %v2507_v40  ;;  %v2545_v16 = vadd.f32 %v2544_v2, %v8903_v34 }
 0x2c1   :  { %v2492_v26 = vpop.f32.mrf.mxu2  ;;  %3250 = vst [vmem:[#allocation4 + $0x1d0] sm:$0xff] %v9034_v49  ;;  %v2596_v19 = vmax.f32 %v2526_v59, 0.0 }
 0x2c2   :  { %v2493_v61 = vadd.f32 %v2492_v26, %v8901_v8 }
 0x2c3   :  { %3118 = vrot.lane.b32.xlu2 %v2820_v47, %s7682_s9  ;;  %3564 = vrot.lane.b32.xlu0 %v3232_v43, %s7683_s19  ;;  %v9041_v6 = vmul.f32 %v2596_v19, %v10621_v15 }
 0x2c4   :  { %2720 = vrot.lane.b32.xlu1 %v2820_v47, %s7689_s25  ;;  %v2512_v57 = vadd.f32 %v2511_v51, %v2493_v61 }
 0x2c5   :  { %v9044_v13 = vpop.permute.xlu0 %2968  ;;  %v9046_v29 = vpop.permute.xlu2 %3132 }
 0x2c6   :  { %v9048_v5 = vpop.permute.xlu1 %2840  ;;  %v2527_v53 = vpop.f32.mrf.mxu0 }
 0x2c7   :  { %v2528_v22 = vadd.f32 %v2527_v53, %v2509_v48  ;;  %v2582_v35 = vpop.f32.mrf.mxu3  ;;  %v2546_v38 = vpop.f32.mrf.mxu1 }
 0x2c8   :  { %v2547_v9 = vadd.f32 %v2546_v38, %v8906_v62 }
 0x2c9   :  { %v2494_v4 = vpop.f32.mrf.mxu2  ;;  %v2602_v27 = vmax.f32 %v2528_v22, 0.0 }
 0x2ca   :  { %v2495_v17 = vadd.f32 %v2494_v4, %v8924_v32 }
 0x2cb   :  { %3308 = vrot.lane.b32.xlu2 %v3232_v43, %s7685_s21  ;;  %3692 = vrot.lane.b32.xlu0 %v3232_v43, %s7688_s24  ;;  %v9054_v18 = vmul.f32 %v2602_v27, %v10621_v15 }
 0x2cc   :  { %3436 = vrot.lane.b32.xlu1 %v3232_v43, %s7684_s20  ;;  %v2514_v3 = vadd.f32 %v2513_v30, %v2495_v17 }
 0x2cd   :  { %v9057_v58 = vpop.permute.xlu0 %2846  ;;  %v9059_v11 = vpop.permute.xlu2 %2730 }
 0x2ce   :  { %v9061_v1 = vpop.permute.xlu1 %2712  ;;  %v2530_v10 = vpop.f32.mrf.mxu0 }
 0x2cf   :  { %v2531_v46 = vadd.f32 %v2530_v10, %v2512_v57  ;;  %v2584_v34 = vpop.f32.mrf.mxu3  ;;  %v2549_v21 = vpop.f32.mrf.mxu1 }
 0x2d0   :  { %v2550_v2 = vadd.f32 %v2549_v21, %v8901_v8 }
 0x2d1   :  { %v2563_v25 = vpop.f32.mrf.mxu2  ;;  %v2608_v44 = vmax.f32 %v2531_v46, 0.0 }
 0x2d2   :  { %v2564_v43 = vadd.f32 %v2563_v25, %v2545_v16 }
 0x2d3   :  { %2982 = vrot.lane.b32.xlu2 %v3085_v41, %s7686_s22  ;;  %2854 = vrot.lane.b32.xlu0 %v3085_v41, %s7687_s23  ;;  %v9070_v20 = vmul.f32 %v2608_v44, %v10621_v15 }
 0x2d4   :  { %v2583_v55 = vadd.f32 %v2582_v35, %v2564_v43  ;;  %3126 = vrot.lane.b32.xlu1 %v3085_v41, %s7682_s9 }
 0x2d5   :  { %v9073_v60 = vpop.permute.xlu0 %2718  ;;  %v9075_v51 = vpop.permute.xlu2 %3300 }
 0x2d6   :  { %v2597_v31 = vmax.f32 %v2583_v55, 0.0  ;;  %v9077_v54 = vpop.permute.xlu1 %3116  ;;  %v2532_v23 = vpop.f32.mrf.mxu0 }
 0x2d7   :  { %v2533_v52 = vadd.f32 %v2532_v23, %v2514_v3  ;;  %v2587_v48 = vpop.f32.mrf.mxu3  ;;  %v2551_v8 = vpop.f32.mrf.mxu1 }
 0x2d8   :  { %v2621_v47 = vmul.f32 %v2597_v31, %v10622_v63  ;;  %v2552_v16 = vadd.f32 %v2551_v8, %v8924_v32 }
 0x2d9   :  { %v2565_v0 = vpop.f32.mrf.mxu2  ;;  %v2614_v40 = vmax.f32 %v2533_v52, 0.0 }
 0x2da   :  { %2645 = vst.msk [vmem:[#allocation3 + $0x30] sm:$0xff] %vm47_vm1, %v2621_v47  ;;  %v2566_v36 = vadd.f32 %v2565_v0, %v2547_v9  ;;  %v9167_v0 = vpack.c.bf16 %v9054_v18, %v9001_v12 }
 0x2db   :  { %3570 = vrot.lane.b32.xlu2 %v9019_v14, %s7683_s19  ;;  %3442 = vrot.lane.b32.xlu0 %v9019_v14, %s7684_s20  ;;  %v9087_v59 = vmul.f32 %v2614_v40, %v10621_v15  ;;  %v2826_v15 = vpack.c.bf16 %v9004_v45, %v8962_v33  ;;  %v9175_v40 = vpack.c.bf16 %v9041_v6, %v8987_v7 }
 0x2dc   :  { %v2585_v30 = vadd.f32 %v2584_v34, %v2566_v36  ;;  %2726 = vrot.lane.b32.xlu1 %v3085_v41, %s7689_s25  ;;  %v9194_v7 = vpack.c.bf16 %v9070_v20, %v9015_v24 }
 0x2dd   :  { %v9090_v62 = vpop.permute.xlu0 %3124  ;;  %v9092_v26 = vpop.permute.xlu2 %3562 }
 0x2de   :  { %v2603_v50 = vmax.f32 %v2585_v30, 0.0  ;;  %v9094_v19 = vpop.permute.xlu1 %2980 }
 0x2df   :  { %v2589_v41 = vpop.f32.mrf.mxu3 }
 0x2e0   :  { %v2627_v53 = vmul.f32 %v2603_v50, %v10622_v63 }
 0x2e1   :  { %v9098_v22 = vld [vmem:[#allocation3 + $0x30] sm:$0xff]  ;;  %v2568_v4 = vpop.f32.mrf.mxu2 }
 0x2e2   :  { %v9104_v61 = vpack.c.bf16 %v9098_v22, %v9041_v6  ;;  %2651 = vst.msk [vmem:[#allocation3 + $0x70] sm:$0xff] %vm47_vm1, %v2627_v53  ;;  %v2569_v27 = vadd.f32 %v2568_v4, %v2550_v2 }
 0x2e3   :  { %2860 = vrot.lane.b32.xlu2 %v2826_v15, %s7687_s23  ;;  %3698 = vrot.lane.b32.xlu0 %v9019_v14, %s7688_s24 }
 0x2e4   :  { %3242 = vst.msk [vmem:[#allocation4 + $0x190] sm:$0xff] %vm8025_vm4, %v9104_v61  ;;  %v2588_v35 = vadd.f32 %v2587_v48, %v2569_v27  ;;  %3314 = vrot.lane.b32.xlu1 %v9019_v14, %s7685_s21  ;;  %v2864_v48 = vrot.slane %v9048_v5, 4  ;;  %v2736_v27 = vrot.slane %v9061_v1, 4 }
 0x2e5   :  { %v9115_v33 = vpop.permute.xlu0 %2724  ;;  %v9117_v45 = vpop.permute.xlu2 %3690 }
 0x2e6   :  { %v2609_v57 = vmax.f32 %v2588_v35, 0.0  ;;  %v9119_v10 = vpop.permute.xlu1 %2858 }
 0x2e8   :  { %v2633_v38 = vmul.f32 %v2609_v57, %v10622_v63 }
 0x2e9   :  { %v9123_v46 = vld [vmem:[#allocation3 + $0x70] sm:$0xff]  ;;  %v2570_v25 = vpop.f32.mrf.mxu2 }
 0x2ea   :  { %v9127_v17 = vpack.c.bf16 %v9123_v46, %v9054_v18  ;;  %2657 = vst.msk [vmem:[#allocation3 + $0xb0] sm:$0xff] %vm47_vm1, %v2633_v38  ;;  %v2571_v14 = vadd.f32 %v2570_v25, %v2552_v16  ;;  %v9236_v16 = vpack.c.bf16 %v9087_v59, %v9030_v56 }
 0x2eb   :  { %3448 = vrot.lane.b32.xlu2 %v9034_v49, %s7684_s20  ;;  %3134 = vrot.lane.b32.xlu0 %v2826_v15, %s7682_s9 }
 0x2ec   :  { %3245 = vst.msk [vmem:[#allocation4 + $0x1a8] sm:$0xff] %vm8025_vm4, %v9127_v17  ;;  %v2590_v32 = vadd.f32 %v2589_v41, %v2571_v14  ;;  %2988 = vrot.lane.b32.xlu1 %v2826_v15, %s7686_s22 }
 0x2ed   :  { %v9137_v44 = vpop.permute.xlu0 %2986  ;;  %v9139_v43 = vpop.permute.xlu2 %3440 }
 0x2ee   :  { %v2615_v55 = vmax.f32 %v2590_v32, 0.0  ;;  %v3429_v34 = vpop.permute.xlu1 %3428 }
 0x2ef   :  { %v3452_v41 = vrot.slane %v3429_v34, 4 }
 0x2f0   :  { %v2639_v3 = vmul.f32 %v2615_v55, %v10622_v63 }
 0x2f1   :  { %v9142_v31 = vld [vmem:[#allocation3 + $0xb0] sm:$0xff] }
 0x2f2   :  { %v9146_v23 = vpack.c.bf16 %v9142_v31, %v9070_v20  ;;  %2663 = vst.msk [vmem:[#allocation3 + $0xf0] sm:$0xff] %vm47_vm1, %v2639_v3 }
 0x2f3   :  { %3704 = vrot.lane.b32.xlu2 %v9034_v49, %s7688_s24  ;;  %2732 = vrot.lane.b32.xlu0 %v2826_v15, %s7689_s25 }
 0x2f4   :  { %3248 = vst.msk [vmem:[#allocation4 + $0x1c0] sm:$0xff] %vm8025_vm4, %v9146_v23  ;;  %3576 = vrot.lane.b32.xlu1 %v9034_v49, %s7683_s19 }
 0x2f5   :  { %v9157_v9 = vpop.permute.xlu0 %3556  ;;  %v9159_v63 = vpop.permute.xlu2 %3696 }
 0x2f6   :  { %v9161_v47 = vpop.permute.xlu1 %3306 }
 0x2f9   :  { %v9163_v52 = vld [vmem:[#allocation3 + $0xf0] sm:$0xff] }
 0x2fa   :  { %v9171_v21 = vpack.c.bf16 %v9163_v52, %v9087_v59  ;;  %v2992_v59 = vrot.slane %v9044_v13, 4 }
 0x2fb   :  { %3120 = vrot.lane.b32.xlu2 %v9167_v0, %s7682_s9  ;;  %3320 = vrot.lane.b32.xlu0 %v9034_v49, %s7685_s21 }
 0x2fc   :  { %3251 = vst.msk [vmem:[#allocation4 + $0x1d8] sm:$0xff] %vm8025_vm4, %v9171_v21  ;;  %3112 = vrot.lane.b32.xlu1 %v9175_v40, %s7682_s9 }
 0x2fd   :  { %v9186_v12 = vpop.permute.xlu0 %3684  ;;  %v9188_v36 = vpop.permute.xlu2 %3318 }
 0x2fe   :  { %v9190_v30 = vpop.permute.xlu1 %3568 }
 0x303   :  { %2984 = vrot.lane.b32.xlu2 %v9194_v7, %s7686_s22  ;;  %2972 = vrot.lane.b32.xlu0 %v9175_v40, %s7686_s22 }
 0x304   :  { %2978 = vrot.lane.b32.xlu1 %v9167_v0, %s7686_s22 }
 0x305   :  { %v9202_v49 = vpop.permute.xlu0 %3434  ;;  %v9204_v50 = vpop.permute.xlu2 %2842 }
 0x306   :  { %v9207_v2 = vpop.permute.xlu1 %3446  ;;  %v10569_v24 = vrot.slane %v9204_v50, 4 }
 0x308   :  { %v2876_v20 = vsel %vm506_vm2, %v2864_v48, %v10569_v24 }
 0x309   :  { %v2877_v53 = vsel %vm640_vm9, %v9048_v5, %v2876_v20 }
 0x30a   :  { %2908 = vst [vmem:[#allocation4 + $0x60] sm:$0xff] %v2877_v53 }
 0x30b   :  { %3560 = vrot.lane.b32.xlu2 %v9104_v61, %s7683_s19  ;;  %3128 = vrot.lane.b32.xlu0 %v9194_v7, %s7682_s9 }
 0x30c   :  { %2856 = vrot.lane.b32.xlu1 %v9194_v7, %s7687_s23 }
 0x30d   :  { %v9221_v4 = vpop.permute.xlu0 %3312  ;;  %v9223_v15 = vpop.permute.xlu2 %2714 }
 0x30e   :  { %v9226_v8 = vpop.permute.xlu1 %3702  ;;  %v10567_v5 = vrot.slane %v9223_v15, 4 }
 0x310   :  { %v2748_v35 = vsel %vm506_vm2, %v2736_v27, %v10567_v5  ;;  %v3144_v27 = vrot.slane %v9077_v54, 4 }
 0x311   :  { %v2749_v57 = vsel %vm508_vm11, %v9061_v1, %v2748_v35 }
 0x312   :  { %2780 = vst [vmem:[#allocation4] sm:$0xff] %v2749_v57 }
 0x313   :  { %3438 = vrot.lane.b32.xlu2 %v9127_v17, %s7684_s20  ;;  %2990 = vrot.lane.b32.xlu0 %v9236_v16, %s7686_s22 }
 0x314   :  { %3136 = vrot.lane.b32.xlu1 %v9236_v16, %s7682_s9 }
 0x315   :  { %v9244_v38 = vpop.permute.xlu0 %3574  ;;  %v9246_v25 = vpop.permute.xlu2 %3430 }
 0x316   :  { %v9248_v1 = vpop.permute.xlu1 %2970  ;;  %v10568_v56 = vrot.slane %v9246_v25, 4 }
 0x317   :  { %v10570_v14 = vrot.slane %v9248_v1, 4 }
 0x318   :  { %v3464_v32 = vsel %vm506_vm2, %v3452_v41, %v10568_v56  ;;  %v3580_v41 = vrot.slane %v9157_v9, 4 }
 0x319   :  { %v3004_v55 = vsel %vm506_vm2, %v2992_v59, %v10570_v14  ;;  %v3465_v3 = vsel %vm1232_vm7, %v3429_v34, %v3464_v32  ;;  %v3140_v34 = vrot.slane %v8997_v28, 4 }
 0x31a   :  { %v3005_v48 = vsel %vm769_vm6, %v9044_v13, %v3004_v55  ;;  %3496 = vst [vmem:[#allocation4 + $0x240] sm:$0xff] %v3465_v3 }
 0x31b   :  { %3036 = vst [vmem:[#allocation4 + $0xc0] sm:$0xff] %v3005_v48  ;;  %3316 = vrot.lane.b32.xlu2 %v9146_v23, %s7685_s21  ;;  %3566 = vrot.lane.b32.xlu0 %v9127_v17, %s7683_s19 }
 0x31c   :  { %3432 = vrot.lane.b32.xlu1 %v9104_v61, %s7684_s20 }
 0x31d   :  { %v9268_v20 = vpop.permute.xlu0 %3110  ;;  %v9270_v53 = vpop.permute.xlu2 %3118 }
 0x31e   :  { %v9274_v13 = vpop.permute.xlu1 %3558  ;;  %v10571_v35 = vrot.slane %v9268_v20, 4  ;;  %v3145_v57 = vrot.slane %v9270_v53, 4 }
 0x31f   :  { %v3581_v59 = vrot.slane %v9274_v13, 4 }
 0x320   :  { %v3156_v32 = vsel %vm506_vm2, %v3140_v34, %v10571_v35  ;;  %v3162_v55 = vsel %vm506_vm2, %v3144_v27, %v3145_v57 }
 0x321   :  { %v3592_v3 = vsel %vm506_vm2, %v3580_v41, %v3581_v59  ;;  %v3157_v48 = vsel %vm922_vm10, %v8997_v28, %v3156_v32  ;;  %v3163_v5 = vsel %vm922_vm10, %v9077_v54, %v3162_v55  ;;  %v3324_v54 = vrot.slane %v9075_v51, 4 }
 0x322   :  { %v3593_v56 = vsel %vm1361_vm5, %v9157_v9, %v3592_v3  ;;  %3192 = vst [vmem:[#allocation4 + $0x120] sm:$0xff] %v3157_v48  ;;  %v3327_v9 = vrot.slane %v9161_v47, 4  ;;  %v3708_v32 = vrot.slane %v9186_v12, 4 }
 0x323   :  { %3624 = vst [vmem:[#allocation4 + $0x2a0] sm:$0xff] %v3593_v56  ;;  %3578 = vrot.lane.b32.xlu2 %v9171_v21, %s7683_s19  ;;  %3444 = vrot.lane.b32.xlu0 %v9146_v23, %s7684_s20 }
 0x324   :  { %3195 = vst [vmem:[#allocation4 + $0x138] sm:$0xff] %v3163_v5  ;;  %3572 = vrot.lane.b32.xlu1 %v9146_v23, %s7683_s19 }
 0x325   :  { %v9301_v34 = vpop.permute.xlu0 %3302  ;;  %v9303_v28 = vpop.permute.xlu2 %3308 }
 0x326   :  { %v9307_v27 = vpop.permute.xlu1 %3686  ;;  %v10574_v56 = vrot.slane %v9301_v34, 4  ;;  %v10573_v41 = vrot.slane %v9303_v28, 4 }
 0x327   :  { %v10572_v5 = vrot.slane %v9307_v27, 4 }
 0x328   :  { %v3336_v55 = vsel %vm506_vm2, %v3324_v54, %v10574_v56  ;;  %v3341_v3 = vsel %vm506_vm2, %v3327_v9, %v10573_v41 }
 0x329   :  { %v3720_v48 = vsel %vm506_vm2, %v3708_v32, %v10572_v5  ;;  %v3337_v24 = vsel %vm1103_vm12, %v9075_v51, %v3336_v55  ;;  %v3342_v14 = vsel %vm1103_vm12, %v9161_v47, %v3341_v3  ;;  %v2995_v47 = vrot.slane %v9011_v37, 4 }
 0x32a   :  { %v3721_v35 = vsel %vm1490_vm8, %v9186_v12, %v3720_v48  ;;  %3368 = vst [vmem:[#allocation4 + $0x1e0] sm:$0xff] %v3337_v24  ;;  %v2998_v12 = vrot.slane %v9094_v19, 4  ;;  %v2867_v32 = vrot.slane %v9057_v58, 4 }
 0x32b   :  { %3752 = vst [vmem:[#allocation4 + $0x300] sm:$0xff] %v3721_v35  ;;  %2862 = vrot.lane.b32.xlu2 %v9236_v16, %s7687_s23  ;;  %3304 = vrot.lane.b32.xlu0 %v9104_v61, %s7685_s21 }
 0x32c   :  { %3371 = vst [vmem:[#allocation4 + $0x1f8] sm:$0xff] %v3342_v14  ;;  %3310 = vrot.lane.b32.xlu1 %v9127_v17, %s7685_s21 }
 0x32d   :  { %v9334_v54 = vpop.permute.xlu0 %2976  ;;  %v9336_v51 = vpop.permute.xlu2 %2982 }
 0x32e   :  { %v9340_v24 = vpop.permute.xlu1 %2848  ;;  %v2996_v35 = vrot.slane %v9334_v54, 4  ;;  %v2999_v9 = vrot.slane %v9336_v51, 4 }
 0x32f   :  { %v10575_v14 = vrot.slane %v9340_v24, 4 }
 0x330   :  { %v3009_v55 = vsel %vm506_vm2, %v2995_v47, %v2996_v35  ;;  %v3014_v3 = vsel %vm506_vm2, %v2998_v12, %v2999_v9 }
 0x331   :  { %v2881_v48 = vsel %vm506_vm2, %v2867_v32, %v10575_v14  ;;  %v3010_v5 = vsel %vm769_vm6, %v9011_v37, %v3009_v55  ;;  %v3015_v41 = vsel %vm769_vm6, %v9094_v19, %v3014_v3  ;;  %v3583_v19 = vrot.slane %v9092_v26, 4 }
 0x332   :  { %v2882_v56 = vsel %vm640_vm9, %v9057_v58, %v2881_v48  ;;  %3039 = vst [vmem:[#allocation4 + $0xd8] sm:$0xff] %v3010_v5  ;;  %v3586_v58 = vrot.slane %v9190_v30, 4 }
 0x333   :  { %2911 = vst [vmem:[#allocation4 + $0x78] sm:$0xff] %v2882_v56  ;;  %2844 = vrot.lane.b32.xlu2 %v9175_v40, %s7687_s23  ;;  %2850 = vrot.lane.b32.xlu0 %v9167_v0, %s7687_s23  ;;  %v2739_v0 = vrot.slane %v9073_v60, 4 }
 0x334   :  { %3042 = vst [vmem:[#allocation4 + $0xf0] sm:$0xff] %v3015_v41  ;;  %3450 = vrot.lane.b32.xlu1 %v9171_v21, %s7684_s20 }
 0x335   :  { %v9367_v47 = vpop.permute.xlu0 %3564  ;;  %v9369_v37 = vpop.permute.xlu2 %3570 }
 0x336   :  { %v9373_v5 = vpop.permute.xlu1 %2720  ;;  %v10578_v56 = vrot.slane %v9367_v47, 4  ;;  %v10577_v40 = vrot.slane %v9369_v37, 4 }
 0x337   :  { %v10576_v41 = vrot.slane %v9373_v5, 4 }
 0x338   :  { %v3597_v12 = vsel %vm506_vm2, %v3583_v19, %v10578_v56  ;;  %v3602_v32 = vsel %vm506_vm2, %v3586_v58, %v10577_v40  ;;  %v2674_v40 = vld [vmem:[#allocation3 + $0x60] sm:$0xff] }
 0x339   :  { %v2753_v55 = vsel %vm506_vm2, %v2739_v0, %v10576_v41  ;;  %v3598_v3 = vsel %vm1361_vm5, %v9092_v26, %v3597_v12  ;;  %v3603_v48 = vsel %vm1361_vm5, %v9190_v30, %v3602_v32  ;;  %v2873_v30 = vrot.slane %v9119_v10, 4 }
 0x33a   :  { %v2754_v14 = vsel %vm508_vm11, %v9073_v60, %v2753_v55  ;;  %3627 = vst [vmem:[#allocation4 + $0x2b8] sm:$0xff] %v3598_v3  ;;  %v3711_v60 = vrot.slane %v9117_v45, 4  ;;  %v3455_v0 = vrot.slane %v9202_v49, 4  ;;  %v2668_v55 = vld [vmem:[#allocation3 + $0x20] sm:$0xff] }
 0x33b   :  { %2783 = vst [vmem:[#allocation4 + $0x18] sm:$0xff] %v2754_v14  ;;  %2734 = vrot.lane.b32.xlu2 %v9236_v16, %s7689_s25  ;;  %3322 = vrot.lane.b32.xlu0 %v9171_v21, %s7685_s21  ;;  %v2690_v56 = vpack.c.bf16 %v9041_v6, %v2668_v55  ;;  %v2870_v6 = vrot.slane %v9027_v39, 4 }
 0x33c   :  { %3630 = vst [vmem:[#allocation4 + $0x2d0] sm:$0xff] %v3603_v48  ;;  %2728 = vrot.lane.b32.xlu1 %v9194_v7, %s7689_s25 }
 0x33d   :  { %v9400_v19 = vpop.permute.xlu0 %3692  ;;  %v9402_v26 = vpop.permute.xlu2 %2860 }
 0x33e   :  { %v9406_v58 = vpop.permute.xlu1 %3436  ;;  %v3712_v14 = vrot.slane %v9400_v19, 4  ;;  %v2874_v16 = vrot.slane %v9402_v26, 4 }
 0x33f   :  { %v3456_v12 = vrot.slane %v9406_v58, 4 }
 0x340   :  { %v3725_v7 = vsel %vm506_vm2, %v3711_v60, %v3712_v14  ;;  %v2891_v32 = vsel %vm506_vm2, %v2873_v30, %v2874_v16  ;;  %v2693_v30 = vpack.c.bf16 %v9054_v18, %v2674_v40 }
 0x341   :  { %v3469_v3 = vsel %vm506_vm2, %v3455_v0, %v3456_v12  ;;  %v3726_v48 = vsel %vm1490_vm8, %v9117_v45, %v3725_v7  ;;  %v2892_v41 = vsel %vm640_vm9, %v9119_v10, %v2891_v32 }
 0x342   :  { %v3470_v60 = vsel %vm1232_vm7, %v9202_v49, %v3469_v3  ;;  %3755 = vst [vmem:[#allocation4 + $0x318] sm:$0xff] %v3726_v48  ;;  %v3461_v49 = vrot.slane %v9207_v2, 4 }
 0x343   :  { %3499 = vst [vmem:[#allocation4 + $0x258] sm:$0xff] %v3470_v60  ;;  %3700 = vrot.lane.b32.xlu2 %v9146_v23, %s7688_s24  ;;  %2716 = vrot.lane.b32.xlu0 %v2690_v56, %s7689_s25  ;;  %v3148_v23 = vrot.slane %v9090_v62, 4 }
 0x344   :  { %2917 = vst [vmem:[#allocation4 + $0xa8] sm:$0xff] %v2892_v41  ;;  %2722 = vrot.lane.b32.xlu1 %v2693_v30, %s7689_s25 }
 0x345   :  { %v9433_v45 = vpop.permute.xlu0 %2854  ;;  %v9435_v10 = vpop.permute.xlu2 %3448 }
 0x346   :  { %v9439_v0 = vpop.permute.xlu1 %3126  ;;  %v2871_v18 = vrot.slane %v9433_v45, 4  ;;  %v10582_v40 = vrot.slane %v9435_v10, 4 }
 0x347   :  { %v3149_v56 = vrot.slane %v9439_v0, 4 }
 0x348   :  { %v2886_v41 = vsel %vm506_vm2, %v2870_v6, %v2871_v18  ;;  %v3479_v7 = vsel %vm506_vm2, %v3461_v49, %v10582_v40  ;;  %v6744_v40 = vld [vmem:[#allocation4 + $0x138] sm:$0xf0] }
 0x349   :  { %v3168_v32 = vsel %vm506_vm2, %v3148_v23, %v3149_v56  ;;  %v2887_v55 = vsel %vm640_vm9, %v9027_v39, %v2886_v41  ;;  %v3480_v3 = vsel %vm1232_vm7, %v9207_v2, %v3479_v7  ;;  %v3458_v2 = vrot.slane %v9139_v43, 4 }
 0x34a   :  { %v3169_v48 = vsel %vm922_vm10, %v9090_v62, %v3168_v32  ;;  %2914 = vst [vmem:[#allocation4 + $0x90] sm:$0xff] %v2887_v55  ;;  %v3717_v62 = vrot.slane %v9226_v8, 4  ;;  %v3079_v41 = vpack.c.bf16 %v9098_v22, %v9098_v22  ;;  %v3091_v22 = vpack.c.bf16 %v9163_v52, %v9163_v52 }
 0x34b   :  { %3198 = vst [vmem:[#allocation4 + $0x150] sm:$0xff] %v3169_v48  ;;  %3694 = vrot.lane.b32.xlu2 %v9127_v17, %s7688_s24  ;;  %3706 = vrot.lane.b32.xlu0 %v9171_v21, %s7688_s24  ;;  %v2742_v21 = vrot.slane %v9115_v33, 4 }
 0x34c   :  { %3505 = vst [vmem:[#allocation4 + $0x288] sm:$0xff] %v3480_v3  ;;  %3688 = vrot.lane.b32.xlu1 %v9104_v61, %s7688_s24  ;;  %v3087_v3 = vpack.c.bf16 %v9142_v31, %v9142_v31  ;;  %v3714_v31 = vrot.slane %v9159_v63, 4 }
 0x34d   :  { %v9466_v60 = vpop.permute.xlu0 %3442  ;;  %v9468_v39 = vpop.permute.xlu2 %3704 }
 0x34e   :  { %v9472_v30 = vpop.permute.xlu1 %2726  ;;  %v3459_v6 = vrot.slane %v9466_v60, 4  ;;  %v10580_v17 = vrot.slane %v9468_v39, 4 }
 0x34f   :  { %v10581_v49 = vrot.slane %v9472_v30, 4 }
 0x350   :  { %v3474_v61 = vsel %vm506_vm2, %v3458_v2, %v3459_v6  ;;  %v3735_v23 = vsel %vm506_vm2, %v3717_v62, %v10580_v17  ;;  %v3330_v62 = vrot.slane %v9221_v4, 4 }
 0x351   :  { %v2758_v7 = vsel %vm506_vm2, %v2742_v21, %v10581_v49  ;;  %v3475_v32 = vsel %vm1232_vm7, %v9139_v43, %v3474_v61  ;;  %v3736_v55 = vsel %vm1490_vm8, %v9226_v8, %v3735_v23  ;;  %v7503_v49 = vld [vmem:[#allocation4 + $0x124] sm:$0xf] }
 0x352   :  { %v2759_v48 = vsel %vm508_vm11, %v9115_v33, %v2758_v7  ;;  %3502 = vst [vmem:[#allocation4 + $0x270] sm:$0xff] %v3475_v32 }
 0x353   :  { %2786 = vst [vmem:[#allocation4 + $0x30] sm:$0xff] %v2759_v48  ;;  %3114 = vrot.lane.b32.xlu2 %v3079_v41, %s7682_s9  ;;  %3130 = vrot.lane.b32.xlu0 %v3087_v3, %s7682_s9  ;;  %v3882_v41 = vld [vmem:[%s10524_s6 + $0x10] sm:$0xff]  ;;  %v3883_v3 = vld [vmem:[%s10524_s6 + $0x18] sm:$0xff] }
 0x354   :  { %3761 = vst [vmem:[#allocation4 + $0x348] sm:$0xff] %v3736_v55  ;;  %3138 = vrot.lane.b32.xlu1 %v3091_v22, %s7682_s9  ;;  %v3152_v22 = vrot.slane %v9046_v29, 4 }
 0x355   :  { %v9502_v43 = vpop.permute.xlu0 %3698  ;;  %v9504_v8 = vpop.permute.xlu2 %3120 }
 0x356   :  { %v9507_v2 = vpop.permute.xlu1 %3314  ;;  %v3715_v33 = vrot.slane %v9502_v43, 4  ;;  %v10579_v52 = vrot.slane %v9504_v8, 4 }
 0x357   :  { %v3331_v21 = vrot.slane %v9507_v2, 4 }
 0x358   :  { %v3730_v61 = vsel %vm506_vm2, %v3714_v31, %v3715_v33  ;;  %v3164_v23 = vsel %vm506_vm2, %v3145_v57, %v10579_v52  ;;  %v3083_v57 = vpack.c.bf16 %v9123_v46, %v9123_v46 }
 0x359   :  { %v3346_v7 = vsel %vm506_vm2, %v3330_v62, %v3331_v21  ;;  %v3731_v32 = vsel %vm1490_vm8, %v9159_v63, %v3730_v61  ;;  %v3165_v55 = vsel %vm922_vm10, %v9270_v53, %v3164_v23  ;;  %v3001_v61 = vrot.slane %v9137_v44, 4 }
 0x35a   :  { %v3347_v48 = vsel %vm1103_vm12, %v9221_v4, %v3346_v7  ;;  %3758 = vst [vmem:[#allocation4 + $0x330] sm:$0xff] %v3731_v32  ;;  %v3881_v32 = vld [vmem:[%s10524_s6 + $0x8] sm:$0xff] }
 0x35b   :  { %3374 = vst [vmem:[#allocation4 + $0x210] sm:$0xff] %v3347_v48  ;;  %3896 = vperm.xlu2 %7652, %v3882_v41   ;;  %3122 = vrot.lane.b32.xlu0 %v3083_v57, %s7682_s9 }
 0x35c   :  { %3196 = vst [vmem:[#allocation4 + $0x140] sm:$0xff] %v3165_v55  ;;  %3901 = vperm.xlu1 %7651, %v3883_v3  }
 0x35d   :  { %v9539_v63 = vpop.permute.xlu0 %3134  ;;  %v2985_v53 = vpop.permute.xlu2 %2984 }
 0x35e   :  { %v9542_v31 = vpop.permute.xlu1 %2988  ;;  %v3153_v62 = vrot.slane %v9539_v63, 4  ;;  %v3000_v46 = vrot.slane %v2985_v53, 4 }
 0x35f   :  { %v3002_v4 = vrot.slane %v9542_v31, 4 }
 0x360   :  { %v3174_v23 = vsel %vm506_vm2, %v3152_v22, %v3153_v62  ;;  %v3016_v41 = vsel %vm506_vm2, %v2999_v9, %v3000_v46  ;;  %v3018_v7 = vsel %vm769_vm6, %v2985_v53, %v3000_v46  ;;  %v3880_v9 = vld [vmem:[%s10524_s6] sm:$0xff]  ;;  %v7572_v53 = vld [vmem:[#allocation4 + $0x344] sm:$0xf0] }
 0x361   :  { %v3019_v55 = vsel %vm506_vm2, %v3001_v61, %v3002_v4  ;;  %v3175_v3 = vsel %vm922_vm10, %v9046_v29, %v3174_v23  ;;  %v3017_v57 = vsel %vm769_vm6, %v9336_v51, %v3016_v41  ;;  %3044 = vst.msk [vmem:[#allocation4 + $0x100] sm:$0xff] %vm8025_vm4, %v3018_v7  ;;  %v7006_v48 = vld [vmem:[#allocation4 + $0x330] sm:$0xf]  ;;  %v7566_v29 = vld [vmem:[#allocation4 + $0x314] sm:$0xf0]  ;;  %v2745_v41 = vrot.slane %v9059_v11, 4 }
 0x362   :  { %v3020_v22 = vsel %vm769_vm6, %v9137_v44, %v3019_v55  ;;  %3201 = vst [vmem:[#allocation4 + $0x168] sm:$0xff] %v3175_v3  ;;  %v7007_v46 = vor.u32 %v7572_v53, %v7006_v48  ;;  %v6982_v23 = vld [vmem:[#allocation4 + $0x300] sm:$0xf]  ;;  %v3589_v55 = vrot.slane %v9244_v38, 4  ;;  %v6766_v48 = vld [vmem:[#allocation4 + $0x150] sm:$0xf] }
 0x363   :  { %3045 = vst [vmem:[#allocation4 + $0x108] sm:$0xff] %v3020_v22  ;;  %3891 = vperm.xlu0 %7650, %v3881_v32   ;;  %v6983_v44 = vor.u32 %v7566_v29, %v6982_v23  ;;  %v7509_v53 = vld [vmem:[#allocation4 + $0x154] sm:$0xf] }
 0x364   :  { %3043 = vst [vmem:[#allocation4 + $0xf8] sm:$0xff] %v3017_v57  ;;  %3886 = vperm.xlu1 %7651, %v3880_v9   ;;  %4524 = vmatpush.bf16.msra.mxu2 %v7007_v46 }
 0x365   :  { %v9571_v51 = vpop.permute.xlu0 %2732  ;;  %v3561_v61 = vpop.permute.xlu2 %3560 }
 0x366   :  { %v9574_v7 = vpop.permute.xlu1 %3576  ;;  %v2746_v52 = vrot.slane %v9571_v51, 4  ;;  %v3582_v17 = vrot.slane %v3561_v61, 4 }
 0x367   :  { %v3590_v32 = vrot.slane %v9574_v7, 4 }
 0x368   :  { %v2763_v3 = vsel %vm506_vm2, %v2745_v41, %v2746_v52  ;;  %v3594_v57 = vsel %vm506_vm2, %v3581_v59, %v3582_v17  ;;  %v3596_v9 = vsel %vm1361_vm5, %v3561_v61, %v3582_v17  ;;  %4525 = vmatpush.bf16.msra.mxu2 %v6983_v44  ;;  %v6742_v44 = vld [vmem:[#allocation4 + $0x120] sm:$0xf] }
 0x369   :  { %v3607_v22 = vsel %vm506_vm2, %v3589_v55, %v3590_v32  ;;  %v2764_v46 = vsel %vm508_vm11, %v9059_v11, %v2763_v3  ;;  %v3595_v29 = vsel %vm1361_vm5, %v9274_v13, %v3594_v57  ;;  %3626 = vst.msk [vmem:[#allocation4 + $0x2b0] sm:$0xff] %vm8025_vm4, %v3596_v9  ;;  %v7512_v23 = vld [vmem:[#allocation4 + $0x164] sm:$0xf0]  ;;  %v6768_v59 = vld [vmem:[#allocation4 + $0x168] sm:$0xf0]  ;;  %v3333_v11 = vrot.slane %v9188_v36, 4 }
 0x36a   :  { %v3608_v17 = vsel %vm1361_vm5, %v9244_v38, %v3607_v22  ;;  %2789 = vst [vmem:[#allocation4 + $0x48] sm:$0xff] %v2764_v46  ;;  %v6767_v61 = vor.u32 %v7512_v23, %v6766_v48  ;;  %v6771_v41 = vor.u32 %v7509_v53, %v6768_v59  ;;  %v7506_v55 = vld [vmem:[#allocation4 + $0x134] sm:$0xf0]  ;;  %v6747_v53 = vor.u32 %v7503_v49, %v6744_v40  ;;  %v7500_v46 = vld [vmem:[#allocation4 + $0x104] sm:$0xf0] }
 0x36b   :  { %3633 = vst [vmem:[#allocation4 + $0x2e8] sm:$0xff] %v3608_v17  ;;  %v6743_v48 = vor.u32 %v7506_v55, %v6742_v44  ;;  %v6720_v23 = vld [vmem:[#allocation4 + $0x108] sm:$0xf0]  ;;  %v10623_v40 = vrot.slane %v9268_v20, 4  ;;  %v7497_v44 = vld [vmem:[#allocation4 + $0xf4] sm:$0xf] }
 0x36c   :  { %3625 = vst [vmem:[#allocation4 + $0x2a8] sm:$0xff] %v3595_v29  ;;  %4480 = vmatpush.bf16.msra.mxu0 %v6767_v61  ;;  %4537 = vmatpush.bf16.msra.mxu3 %v6771_v41  ;;  %v7494_v55 = vld [vmem:[#allocation4 + $0xd4] sm:$0xf0] }
 0x36d   :  { %v9598_v13 = vpop.permute.xlu0 %3320  ;;  %v3439_v3 = vpop.permute.xlu2 %3438 }
 0x36e   :  { %v9600_v57 = vpop.permute.xlu1 %3112  ;;  %v3334_v38 = vrot.slane %v9598_v13, 4  ;;  %v3457_v9 = vrot.slane %v3439_v3, 4 }
 0x36f   :  { %v10583_v22 = vrot.slane %v9600_v57, 4 }
 0x370   :  { %v3351_v29 = vsel %vm506_vm2, %v3333_v11, %v3334_v38  ;;  %v3471_v59 = vsel %vm506_vm2, %v3456_v12, %v3457_v9  ;;  %v3473_v17 = vsel %vm1232_vm7, %v3439_v3, %v3457_v9  ;;  %4481 = vmatpush.bf16.msra.mxu0 %v6743_v48  ;;  %4538 = vmatpush.bf16.msra.mxu3 %v6747_v53  ;;  %v6718_v12 = vld [vmem:[#allocation4 + $0xf0] sm:$0xf] }
 0x371   :  { %v3158_v49 = vsel %vm506_vm2, %v10623_v40, %v10583_v22  ;;  %v3352_v61 = vsel %vm1103_vm12, %v9188_v36, %v3351_v29  ;;  %v3472_v41 = vsel %vm1232_vm7, %v9406_v58, %v3471_v59  ;;  %3501 = vst.msk [vmem:[#allocation4 + $0x268] sm:$0xff] %vm8025_vm4, %v3473_v17  ;;  %v6719_v3 = vor.u32 %v7500_v46, %v6718_v12  ;;  %v6958_v9 = vld [vmem:[#allocation4 + $0x2d0] sm:$0xf]  ;;  %v6582_v36 = vld [vmem:[%s10523_s5 + $0x8] sm:$0xf] }
 0x372   :  { %v3159_v11 = vsel %vm922_vm10, %v9268_v20, %v3158_v49  ;;  %3377 = vst [vmem:[#allocation4 + $0x228] sm:$0xff] %v3352_v61  ;;  %v7560_v48 = vld [vmem:[#allocation4 + $0x2e4] sm:$0xf0]  ;;  %v6723_v53 = vor.u32 %v7497_v44, %v6720_v23  ;;  %v7463_v58 = vld [vmem:[%s10523_s5 + $0x10] sm:$0xf0] }
 0x373   :  { %3193 = vst [vmem:[#allocation4 + $0x128] sm:$0xff] %v3159_v11  ;;  %v6959_v40 = vor.u32 %v7560_v48, %v6958_v9  ;;  %v6696_v29 = vld [vmem:[#allocation4 + $0xd8] sm:$0xf0]  ;;  %v9630_v20 = vor.u32 %v7463_v58, %v6582_v36  ;;  %v6694_v23 = vld [vmem:[#allocation4 + $0xc0] sm:$0xf] }
 0x374   :  { %3500 = vst [vmem:[#allocation4 + $0x260] sm:$0xff] %v3472_v41  ;;  %4482 = vmatpush.bf16.msra.mxu0 %v6719_v3  ;;  %4539 = vmatpush.bf16.msra.mxu3 %v6723_v53  ;;  %v7554_v17 = vld [vmem:[#allocation4 + $0x2b4] sm:$0xf0]  ;;  %v6695_v44 = vor.u32 %v7494_v55, %v6694_v23  ;;  %v7491_v11 = vld [vmem:[#allocation4 + $0xc4] sm:$0xf]  ;;  %v10624_v53 = vrot.slane %v9248_v1, 4 }
 0x375   :  { %4499 = vmatpush.bf16.msra.mxu1 %v6959_v40  ;;  %v2973_v46 = vpop.permute.xlu0 %2972  ;;  %v3317_v59 = vpop.permute.xlu2 %3316  ;;  %7028 = vmatmul.msk.bf16.vlgmr.msra.gmra.mxu2 %vm216_vm0, %v9630_v20  ;;  %v6934_v41 = vld [vmem:[#allocation4 + $0x2a0] sm:$0xf]  ;;  %v6699_v3 = vor.u32 %v7491_v11, %v6696_v29  ;;  %v6670_v48 = vld [vmem:[#allocation4 + $0x90] sm:$0xf]  ;;  %v7488_v23 = vld [vmem:[#allocation4 + $0xa4] sm:$0xf0] }
 0x376   :  { %v2979_v49 = vpop.permute.xlu1 %2978  ;;  %v2994_v61 = vrot.slane %v2973_v46, 4  ;;  %v3332_v12 = vrot.slane %v3317_v59, 4  ;;  %v6935_v55 = vor.u32 %v7554_v17, %v6934_v41 }
 0x377   :  { %v2997_v9 = vrot.slane %v2979_v49, 4 }
 0x378   :  { %v3006_v40 = vsel %vm506_vm2, %v10624_v53, %v2994_v61  ;;  %v3008_v36 = vsel %vm769_vm6, %v2973_v46, %v2994_v61  ;;  %v3348_v58 = vsel %vm506_vm2, %v3331_v21, %v3332_v12  ;;  %4483 = vmatpush.bf16.msra.mxu0 %v6695_v44  ;;  %v6910_v46 = vld [vmem:[#allocation4 + $0x270] sm:$0xf]  ;;  %v7485_v61 = vld [vmem:[#allocation4 + $0x94] sm:$0xf]  ;;  %4540 = vmatpush.bf16.msra.mxu3 %v6699_v3  ;;  %v7548_v44 = vld [vmem:[#allocation4 + $0x284] sm:$0xf0] }
 0x379   :  { %v3011_v22 = vsel %vm506_vm2, %v2996_v35, %v2997_v9  ;;  %v3013_v29 = vsel %vm769_vm6, %v2979_v49, %v2997_v9  ;;  %v3007_v11 = vsel %vm769_vm6, %v9248_v1, %v3006_v40  ;;  %3038 = vst.msk [vmem:[#allocation4 + $0xd0] sm:$0xff] %vm8025_vm4, %v3008_v36  ;;  %v3349_v17 = vsel %vm1103_vm12, %v9507_v2, %v3348_v58  ;;  %v7482_v49 = vld [vmem:[#allocation4 + $0x74] sm:$0xf0]  ;;  %v6672_v9 = vld [vmem:[#allocation4 + $0xa8] sm:$0xf0] }
 0x37a   :  { %v3012_v21 = vsel %vm769_vm6, %v9334_v54, %v3011_v22  ;;  %3041 = vst.msk [vmem:[#allocation4 + $0xe8] sm:$0xff] %vm8025_vm4, %v3013_v29  ;;  %4500 = vmatpush.bf16.msra.mxu1 %v6935_v55  ;;  %v6671_v35 = vor.u32 %v7488_v23, %v6670_v48  ;;  %v3350_v1 = vsel %vm1103_vm12, %v3317_v59, %v3332_v12  ;;  %v6648_v54 = vld [vmem:[#allocation4 + $0x78] sm:$0xf0]  ;;  %v6646_v36 = vld [vmem:[#allocation4 + $0x60] sm:$0xf] }
 0x37b   :  { %3040 = vst [vmem:[#allocation4 + $0xe0] sm:$0xff] %v3012_v21  ;;  %v6911_v41 = vor.u32 %v7548_v44, %v6910_v46  ;;  %v6675_v53 = vor.u32 %v7485_v61, %v6672_v9  ;;  %v7542_v2 = vld [vmem:[#allocation4 + $0x254] sm:$0xf0]  ;;  %v6647_v48 = vor.u32 %v7482_v49, %v6646_v36  ;;  %v7479_v58 = vld [vmem:[#allocation4 + $0x64] sm:$0xf] }
 0x37c   :  { %3037 = vst [vmem:[#allocation4 + $0xc8] sm:$0xff] %v3007_v11  ;;  %4484 = vmatpush.bf16.msra.mxu0 %v6671_v35  ;;  %v6886_v23 = vld [vmem:[#allocation4 + $0x240] sm:$0xf]  ;;  %v6651_v29 = vor.u32 %v7479_v58, %v6648_v54  ;;  %v7476_v11 = vld [vmem:[#allocation4 + $0x44] sm:$0xf0] }
 0x37d   :  { %3375 = vst [vmem:[#allocation4 + $0x218] sm:$0xff] %v3349_v17  ;;  %v9656_v22 = vpop.permute.xlu0 %3128  ;;  %v3579_v40 = vpop.permute.xlu2 %3578  ;;  %4541 = vmatpush.bf16.msra.mxu3 %v6675_v53  ;;  %v6887_v17 = vor.u32 %v7542_v2, %v6886_v23  ;;  %v6622_v35 = vld [vmem:[#allocation4 + $0x30] sm:$0xf]  ;;  %v7473_v9 = vld [vmem:[#allocation4 + $0x34] sm:$0xf] }
 0x37e   :  { %3376 = vst.msk [vmem:[#allocation4 + $0x220] sm:$0xff] %vm8025_vm4, %v3350_v1  ;;  %4501 = vmatpush.bf16.msra.mxu1 %v6911_v41  ;;  %v2857_v3 = vpop.permute.xlu1 %2856  ;;  %v3150_v59 = vrot.slane %v9656_v22, 4  ;;  %v3591_v12 = vrot.slane %v3579_v40, 4  ;;  %v7470_v41 = vld [vmem:[#allocation4 + $0x14] sm:$0xf0]  ;;  %v6623_v54 = vor.u32 %v7476_v11, %v6622_v35 }
 0x37f   :  { %v2872_v55 = vrot.slane %v2857_v3, 4  ;;  %v7530_v36 = vld [vmem:[#allocation4 + $0x1f4] sm:$0xf0]  ;;  %v7462_v58 = vld [vmem:[%s10523_s5 + $0x8] sm:$0xf0] }
 0x380   :  { %v3170_v46 = vsel %vm506_vm2, %v3149_v56, %v3150_v59  ;;  %v3609_v61 = vsel %vm506_vm2, %v3590_v32, %v3591_v12  ;;  %v3611_v21 = vsel %vm1361_vm5, %v3579_v40, %v3591_v12  ;;  %4485 = vmatpush.bf16.msra.mxu0 %v6647_v48  ;;  %v7536_v56 = vld [vmem:[#allocation4 + $0x224] sm:$0xf0]  ;;  %v6624_v32 = vld [vmem:[#allocation4 + $0x48] sm:$0xf0]  ;;  %v6838_v40 = vld [vmem:[#allocation4 + $0x1e0] sm:$0xf] }
 0x381   :  { %v2888_v49 = vsel %vm506_vm2, %v2871_v18, %v2872_v55  ;;  %v2890_v1 = vsel %vm640_vm9, %v2857_v3, %v2872_v55  ;;  %v3171_v44 = vsel %vm922_vm10, %v9439_v0, %v3170_v46  ;;  %3635 = vst.msk [vmem:[#allocation4 + $0x2f8] sm:$0xff] %vm8025_vm4, %v3611_v21  ;;  %v3610_v18 = vsel %vm1361_vm5, %v9574_v7, %v3609_v61  ;;  %v6862_v0 = vld [vmem:[#allocation4 + $0x210] sm:$0xf]  ;;  %v6574_v2 = vld [vmem:[%s10523_s5] sm:$0xf] }
 0x382   :  { %v2889_v53 = vsel %vm640_vm9, %v9433_v45, %v2888_v49  ;;  %2916 = vst.msk [vmem:[#allocation4 + $0xa0] sm:$0xff] %vm8025_vm4, %v2890_v1  ;;  %4502 = vmatpush.bf16.msra.mxu1 %v6887_v17  ;;  %4542 = vmatpush.bf16.msra.mxu3 %v6651_v29  ;;  %v6594_v45 = vld [vmem:[%s10523_s5 + $0x20] sm:$0xf]  ;;  %v7466_v3 = vld [vmem:[%s10523_s5 + $0x28] sm:$0xf0]  ;;  %v6863_v7 = vor.u32 %v7536_v56, %v6862_v0 }
 0x383   :  { %2915 = vst [vmem:[#allocation4 + $0x98] sm:$0xff] %v2889_v53  ;;  %v6627_v12 = vor.u32 %v7473_v9, %v6624_v32  ;;  %v6960_v48 = vld [vmem:[#allocation4 + $0x2e8] sm:$0xf0]  ;;  %v9696_v55 = vor.u32 %v7466_v3, %v6594_v45  ;;  %v6598_v11 = vld [vmem:[#allocation4] sm:$0xf]  ;;  %v9701_v32 = vor.u32 %v7462_v58, %v6574_v2 }
 0x384   :  { %3199 = vst [vmem:[#allocation4 + $0x158] sm:$0xff] %v3171_v44  ;;  %4486 = vmatpush.bf16.msra.mxu0 %v6623_v54  ;;  %v6600_v46 = vld [vmem:[#allocation4 + $0x18] sm:$0xf0]  ;;  %v6599_v35 = vor.u32 %v7470_v41, %v6598_v11  ;;  %v7557_v49 = vld [vmem:[#allocation4 + $0x2d4] sm:$0xf]  ;;  %v6839_v44 = vor.u32 %v7530_v36, %v6838_v40 }
 0x385   :  { %3634 = vst [vmem:[#allocation4 + $0x2f0] sm:$0xff] %v3610_v18  ;;  %v2991_v23 = vpop.permute.xlu0 %2990  ;;  %v2863_v29 = vpop.permute.xlu2 %2862  ;;  %v7467_v56 = vld [vmem:[#allocation4 + $0x4] sm:$0xf]  ;;  %v6963_v9 = vor.u32 %v7557_v49, %v6960_v48  ;;  %7029 = vmatmul.msk.bf16.gmra.mxu2 %vm216_vm0, %v9696_v55  ;;  %v6936_v0 = vld [vmem:[#allocation4 + $0x2b8] sm:$0xf0] }
 0x386   :  { %4503 = vmatpush.bf16.msra.mxu1 %v6863_v7  ;;  %4543 = vmatpush.bf16.msra.mxu3 %v6627_v12  ;;  %v9698_v61 = vpop.permute.xlu1 %3136  ;;  %v3003_v21 = vrot.slane %v2991_v23, 4  ;;  %v2875_v17 = vrot.slane %v2863_v29, 4  ;;  %v6603_v54 = vor.u32 %v7467_v56, %v6600_v46  ;;  %v6790_v12 = vld [vmem:[#allocation4 + $0x180] sm:$0xf]  ;;  %v7545_v48 = vld [vmem:[#allocation4 + $0x274] sm:$0xf] }
 0x387   :  { %v3154_v1 = vrot.slane %v9698_v61, 4 }
 0x388   :  { %v3021_v53 = vsel %vm506_vm2, %v3002_v4, %v3003_v21  ;;  %v3023_v18 = vsel %vm769_vm6, %v2991_v23, %v3003_v21  ;;  %v2893_v41 = vsel %vm506_vm2, %v2874_v16, %v2875_v17  ;;  %4487 = vmatpush.bf16.msra.mxu0 %v6599_v35  ;;  %v7524_v16 = vld [vmem:[#allocation4 + $0x1c4] sm:$0xf0]  ;;  %v2895_v45 = vsel %vm640_vm9, %v2863_v29, %v2875_v17  ;;  %v6912_v23 = vld [vmem:[#allocation4 + $0x288] sm:$0xf0]  ;;  %v7569_v29 = vld [vmem:[#allocation4 + $0x334] sm:$0xf] }
 0x389   :  { %v3176_v40 = vsel %vm506_vm2, %v3153_v62, %v3154_v1  ;;  %v3022_v36 = vsel %vm769_vm6, %v9542_v31, %v3021_v53  ;;  %3047 = vst.msk [vmem:[#allocation4 + $0x118] sm:$0xff] %vm8025_vm4, %v3023_v18  ;;  %v2894_v4 = vsel %vm640_vm9, %v9402_v26, %v2893_v41  ;;  %v7551_v62 = vld [vmem:[#allocation4 + $0x2a4] sm:$0xf]  ;;  %v6814_v31 = vld [vmem:[#allocation4 + $0x1b0] sm:$0xf]  ;;  %v6915_v56 = vor.u32 %v7545_v48, %v6912_v23 }
 0x38a   :  { %v3177_v2 = vsel %vm922_vm10, %v9539_v63, %v3176_v40  ;;  %3046 = vst [vmem:[#allocation4 + $0x110] sm:$0xff] %v3022_v36  ;;  %4504 = vmatpush.bf16.msra.mxu1 %v6839_v44  ;;  %4544 = vmatpush.bf16.msra.mxu3 %v6603_v54  ;;  %v6939_v3 = vor.u32 %v7551_v62, %v6936_v0  ;;  %v7518_v26 = vld [vmem:[#allocation4 + $0x194] sm:$0xf0]  ;;  %v7461_v17 = vld [vmem:[%s10523_s5 + $0x4] sm:$0xf]  ;;  %v10625_v53 = vrot.slane %v9367_v47, 4 }
 0x38b   :  { %3202 = vst [vmem:[#allocation4 + $0x170] sm:$0xff] %v3177_v2  ;;  %4488 = vmatmul.bf16.vlgmr.msra.gmra.mxu0 %v9701_v32  ;;  %v6815_v7 = vor.u32 %v7524_v16, %v6814_v31  ;;  %v6576_v35 = vld [vmem:[%s10523_s5 + $0xc] sm:$0xf0]  ;;  %v6791_v44 = vor.u32 %v7518_v26, %v6790_v12  ;;  %v10626_v54 = vrot.slane %v9204_v50, 4  ;;  %v10627_v36 = vrot.slane %v9246_v25, 4 }
 0x38c   :  { %4556 = vmatpush.bf16.msrb.mxu0 %v6963_v9  ;;  %2918 = vst [vmem:[#allocation4 + $0xb0] sm:$0xff] %v2894_v4  ;;  %v7008_v9 = vld [vmem:[#allocation4 + $0x348] sm:$0xf0]  ;;  %v7539_v62 = vld [vmem:[#allocation4 + $0x244] sm:$0xf] }
 0x38d   :  { %2919 = vst.msk [vmem:[#allocation4 + $0xb8] sm:$0xff] %vm8025_vm4, %v2895_v45  ;;  %4545 = vmatmul.bf16.vlgmr.msra.gmra.mxu3 %v9701_v32  ;;  %v3567_v63 = vpop.permute.xlu0 %3566  ;;  %v2845_v58 = vpop.permute.xlu2 %2844  ;;  %v7011_v40 = vor.u32 %v7569_v29, %v7008_v9  ;;  %v9751_v45 = vor.u32 %v7461_v17, %v6576_v35  ;;  %v6888_v31 = vld [vmem:[#allocation4 + $0x258] sm:$0xf0]  ;;  %v7563_v48 = vld [vmem:[#allocation4 + $0x304] sm:$0xf] }
 0x38e   :  { %4505 = vmatpush.bf16.msra.mxu1 %v6815_v7  ;;  %v3433_v11 = vpop.permute.xlu1 %3432  ;;  %v3585_v46 = vrot.slane %v3567_v63, 4  ;;  %v2866_v21 = vrot.slane %v2845_v58, 4  ;;  %v7510_v35 = vld [vmem:[#allocation4 + $0x15c] sm:$0xf] }
 0x38f   :  { %v3454_v49 = vrot.slane %v3433_v11, 4 }
 0x390   :  { %4557 = vmatpush.bf16.msrb.mxu0 %v6939_v3  ;;  %v3599_v18 = vsel %vm506_vm2, %v10625_v53, %v3585_v46  ;;  %v3601_v41 = vsel %vm1361_vm5, %v3567_v63, %v3585_v46  ;;  %v2878_v0 = vsel %vm506_vm2, %v10626_v54, %v2866_v21  ;;  %v6984_v3 = vld [vmem:[#allocation4 + $0x318] sm:$0xf0]  ;;  %v2880_v63 = vsel %vm640_vm9, %v2845_v58, %v2866_v21  ;;  %v6586_v46 = vld [vmem:[%s10523_s5 + $0x18] sm:$0xf]  ;;  %v7507_v54 = vld [vmem:[#allocation4 + $0x13c] sm:$0xf0] }
 0x391   :  { %v3466_v4 = vsel %vm506_vm2, %v10627_v36, %v3454_v49  ;;  %v3468_v16 = vsel %vm1232_vm7, %v3433_v11, %v3454_v49  ;;  %v3600_v2 = vsel %vm1361_vm5, %v9367_v47, %v3599_v18  ;;  %3629 = vst.msk [vmem:[#allocation4 + $0x2c8] sm:$0xff] %vm8025_vm4, %v3601_v41  ;;  %v2879_v12 = vsel %vm640_vm9, %v9204_v50, %v2878_v0  ;;  %v6774_v47 = vld [vmem:[#allocation4 + $0x158] sm:$0xf]  ;;  %v6864_v11 = vld [vmem:[#allocation4 + $0x228] sm:$0xf0] }
 0x392   :  { %v3467_v7 = vsel %vm1232_vm7, %v9246_v25, %v3466_v4  ;;  %3498 = vst.msk [vmem:[#allocation4 + $0x250] sm:$0xff] %vm8025_vm4, %v3468_v16  ;;  %4506 = vmatpush.bf16.msra.mxu1 %v6791_v44  ;;  %v7513_v26 = vld [vmem:[#allocation4 + $0x16c] sm:$0xf0]  ;;  %v6776_v29 = vld [vmem:[#allocation4 + $0x170] sm:$0xf0]  ;;  %v6891_v25 = vor.u32 %v7539_v62, %v6888_v31  ;;  %v6987_v58 = vor.u32 %v7563_v48, %v6984_v3 }
 0x393   :  { %3497 = vst [vmem:[#allocation4 + $0x248] sm:$0xff] %v3467_v7  ;;  %v6775_v23 = vor.u32 %v7513_v26, %v6774_v47  ;;  %v7465_v50 = vld [vmem:[%s10523_s5 + $0x20] sm:$0xf0]  ;;  %v6750_v49 = vld [vmem:[#allocation4 + $0x128] sm:$0xf]  ;;  %v6779_v53 = vor.u32 %v7510_v35, %v6776_v29  ;;  %v10628_v7 = vrot.slane %v9369_v37, 4 }
 0x394   :  { %4558 = vmatpush.bf16.msrb.mxu0 %v6915_v56  ;;  %3628 = vst [vmem:[#allocation4 + $0x2c0] sm:$0xff] %v3600_v2  ;;  %v7533_v18 = vld [vmem:[#allocation4 + $0x214] sm:$0xf]  ;;  %v9769_v36 = vor.u32 %v7465_v50, %v6586_v46  ;;  %v6751_v62 = vor.u32 %v7507_v54, %v6750_v49  ;;  %v7527_v31 = vld [vmem:[#allocation4 + $0x1e4] sm:$0xf] }
 0x395   :  { %2909 = vst [vmem:[#allocation4 + $0x68] sm:$0xff] %v2879_v12  ;;  %4507 = vmatmul.bf16.vlgmr.msra.gmra.mxu1 %v9751_v45  ;;  %4594 = vmatpush.bf16.msrb.mxu2 %v6775_v23  ;;  %v3445_v17 = vpop.permute.xlu0 %3444  ;;  %v2735_v21 = vpop.permute.xlu2 %2734  ;;  %v6867_v0 = vor.u32 %v7533_v18, %v6864_v11  ;;  %v6840_v3 = vld [vmem:[#allocation4 + $0x1f8] sm:$0xf0]  ;;  %v7501_v48 = vld [vmem:[#allocation4 + $0x10c] sm:$0xf0] }
 0x396   :  { %4581 = vmatpush.bf16.msrb.mxu1 %v7011_v40  ;;  %2910 = vst.msk [vmem:[#allocation4 + $0x70] sm:$0xff] %vm8025_vm4, %v2880_v63  ;;  %v3573_v44 = vpop.permute.xlu1 %3572  ;;  %v3460_v56 = vrot.slane %v3445_v17, 4  ;;  %v2747_v9 = vrot.slane %v2735_v21, 4  ;;  %v7504_v40 = vld [vmem:[#allocation4 + $0x12c] sm:$0xf]  ;;  %v6843_v46 = vor.u32 %v7527_v31, %v6840_v3  ;;  %v10630_v3 = vrot.slane %v9303_v28, 4 }
 0x397   :  { %v3588_v41 = vrot.slane %v3573_v44, 4  ;;  %v6816_v29 = vld [vmem:[#allocation4 + $0x1c8] sm:$0xf0]  ;;  %v6726_v11 = vld [vmem:[#allocation4 + $0xf8] sm:$0xf] }
 0x398   :  { %4559 = vmatpush.bf16.msrb.mxu0 %v6891_v25  ;;  %v3476_v4 = vsel %vm506_vm2, %v3459_v6, %v3460_v56  ;;  %v3478_v16 = vsel %vm1232_vm7, %v3445_v17, %v3460_v56  ;;  %v2765_v2 = vsel %vm506_vm2, %v2746_v52, %v2747_v9  ;;  %v6752_v6 = vld [vmem:[#allocation4 + $0x140] sm:$0xf0]  ;;  %v6728_v25 = vld [vmem:[#allocation4 + $0x110] sm:$0xf0]  ;;  %v7498_v50 = vld [vmem:[#allocation4 + $0xfc] sm:$0xf] }
 0x399   :  { %v3604_v12 = vsel %vm506_vm2, %v10628_v7, %v3588_v41  ;;  %v3606_v47 = vsel %vm1361_vm5, %v3573_v44, %v3588_v41  ;;  %v3477_v26 = vsel %vm1232_vm7, %v9466_v60, %v3476_v4  ;;  %3504 = vst.msk [vmem:[#allocation4 + $0x280] sm:$0xff] %vm8025_vm4, %v3478_v16  ;;  %v2766_v63 = vsel %vm508_vm11, %v9571_v51, %v2765_v2  ;;  %v7495_v17 = vld [vmem:[#allocation4 + $0xdc] sm:$0xf0]  ;;  %v6702_v49 = vld [vmem:[#allocation4 + $0xc8] sm:$0xf] }
 0x39a   :  { %4582 = vmatpush.bf16.msrb.mxu1 %v6987_v58  ;;  %v3605_v52 = vsel %vm1361_vm5, %v9369_v37, %v3604_v12  ;;  %3632 = vst.msk [vmem:[#allocation4 + $0x2e0] sm:$0xff] %vm8025_vm4, %v3606_v47  ;;  %4595 = vmatpush.bf16.msrb.mxu2 %v6751_v62  ;;  %v6755_v23 = vor.u32 %v7504_v40, %v6752_v6  ;;  %v7521_v58 = vld [vmem:[#allocation4 + $0x1b4] sm:$0xf]  ;;  %v6588_v18 = vld [vmem:[%s10523_s5 + $0x24] sm:$0xf0]  ;;  %v10629_v4 = vrot.slane %v9301_v34, 4 }
 0x39b   :  { %3631 = vst [vmem:[#allocation4 + $0x2d8] sm:$0xff] %v3605_v52  ;;  %v2767_v60 = vsel %vm508_vm11, %v2735_v21, %v2747_v9  ;;  %4493 = vmatmul.bf16.gmra.mxu0 %v9769_v36  ;;  %v6727_v37 = vor.u32 %v7501_v48, %v6726_v11  ;;  %v7464_v21 = vld [vmem:[%s10523_s5 + $0x1c] sm:$0xf]  ;;  %v6819_v54 = vor.u32 %v7521_v58, %v6816_v29  ;;  %v6704_v40 = vld [vmem:[#allocation4 + $0xe0] sm:$0xf0] }
 0x39c   :  { %4560 = vmatpush.bf16.msrb.mxu0 %v6867_v0  ;;  %3503 = vst [vmem:[#allocation4 + $0x278] sm:$0xff] %v3477_v26  ;;  %v7492_v0 = vld [vmem:[#allocation4 + $0xcc] sm:$0xf]  ;;  %v6703_v31 = vor.u32 %v7495_v17, %v6702_v49  ;;  %v9818_v26 = vor.u32 %v7464_v21, %v6588_v18  ;;  %v7489_v6 = vld [vmem:[#allocation4 + $0xac] sm:$0xf0] }
 0x39d   :  { %2790 = vst [vmem:[#allocation4 + $0x50] sm:$0xff] %v2766_v63  ;;  %4550 = vmatmul.bf16.gmra.mxu3 %v9769_v36  ;;  %v3305_v51 = vpop.permute.xlu0 %3304  ;;  %v3701_v35 = vpop.permute.xlu2 %3700  ;;  %v7515_v48 = vld [vmem:[#allocation4 + $0x184] sm:$0xf]  ;;  %v6792_v52 = vld [vmem:[#allocation4 + $0x198] sm:$0xf0] }
 0x39e   :  { %4651 = vmatpush.bf16.msra.mxu1 %v6779_v53  ;;  %2791 = vst.msk [vmem:[#allocation4 + $0x58] sm:$0xff] %vm8025_vm4, %v2767_v60  ;;  %4596 = vmatpush.bf16.msrb.mxu2 %v6727_v37  ;;  %v3311_v44 = vpop.permute.xlu1 %3310  ;;  %v3326_v56 = vrot.slane %v3305_v51, 4  ;;  %v3716_v9 = vrot.slane %v3701_v35, 4  ;;  %v6731_v53 = vor.u32 %v7498_v50, %v6728_v25  ;;  %v7561_v29 = vld [vmem:[#allocation4 + $0x2ec] sm:$0xf0] }
 0x39f   :  { %v3329_v41 = vrot.slane %v3311_v44, 4  ;;  %v6678_v11 = vld [vmem:[#allocation4 + $0x98] sm:$0xf]  ;;  %v6680_v37 = vld [vmem:[#allocation4 + $0xb0] sm:$0xf0] }
 0x3a0   :  { %4561 = vmatpush.bf16.msrb.mxu0 %v6843_v46  ;;  %v3338_v16 = vsel %vm506_vm2, %v10629_v4, %v3326_v56  ;;  %v3340_v2 = vsel %vm1103_vm12, %v3305_v51, %v3326_v56  ;;  %v3732_v62 = vsel %vm506_vm2, %v3715_v33, %v3716_v9  ;;  %v3734_v60 = vsel %vm1490_vm8, %v3701_v35, %v3716_v9  ;;  %v7486_v17 = vld [vmem:[#allocation4 + $0x9c] sm:$0xf]  ;;  %v7555_v58 = vld [vmem:[#allocation4 + $0x2bc] sm:$0xf0]  ;;  %v6942_v56 = vld [vmem:[#allocation4 + $0x2a8] sm:$0xf] }
 0x3a1   :  { %v3343_v7 = vsel %vm506_vm2, %v10630_v3, %v3329_v41  ;;  %v3345_v12 = vsel %vm1103_vm12, %v3311_v44, %v3329_v41  ;;  %v3339_v47 = vsel %vm1103_vm12, %v9301_v34, %v3338_v16  ;;  %3370 = vst.msk [vmem:[#allocation4 + $0x1f0] sm:$0xff] %vm8025_vm4, %v3340_v2  ;;  %v3733_v63 = vsel %vm1490_vm8, %v9502_v43, %v3732_v62 }
 0x3a2   :  { %4652 = vmatpush.bf16.msra.mxu1 %v6755_v23  ;;  %v3344_v33 = vsel %vm1103_vm12, %v9303_v28, %v3343_v7  ;;  %3373 = vst.msk [vmem:[#allocation4 + $0x208] sm:$0xff] %vm8025_vm4, %v3345_v12  ;;  %4597 = vmatpush.bf16.msrb.mxu2 %v6703_v31  ;;  %v6707_v34 = vor.u32 %v7492_v0, %v6704_v40  ;;  %v6966_v23 = vld [vmem:[#allocation4 + $0x2d8] sm:$0xf]  ;;  %v10631_v9 = vrot.slane %v9340_v24, 4  ;;  %v10632_v0 = vrot.slane %v9435_v10, 4 }
 0x3a3   :  { %3372 = vst [vmem:[#allocation4 + $0x200] sm:$0xff] %v3344_v33  ;;  %v6967_v25 = vor.u32 %v7561_v29, %v6966_v23  ;;  %v6679_v28 = vor.u32 %v7489_v6, %v6678_v11  ;;  %v6795_v46 = vor.u32 %v7515_v48, %v6792_v52  ;;  %v6683_v21 = vor.u32 %v7486_v17, %v6680_v37  ;;  %v6654_v23 = vld [vmem:[#allocation4 + $0x68] sm:$0xf]  ;;  %v6918_v11 = vld [vmem:[#allocation4 + $0x278] sm:$0xf] }
 0x3a4   :  { %4562 = vmatpush.bf16.msrb.mxu0 %v6819_v54  ;;  %3369 = vst [vmem:[#allocation4 + $0x1e8] sm:$0xff] %v3339_v47  ;;  %v6943_v54 = vor.u32 %v7555_v58, %v6942_v56  ;;  %v10633_v6 = vrot.slane %v9600_v57, 4  ;;  %v10634_v52 = vrot.slane %v9472_v30, 4  ;;  %v7543_v58 = vld [vmem:[#allocation4 + $0x25c] sm:$0xf0]  ;;  %v10636_v56 = vrot.slane %v9373_v5, 4 }
 0x3a5   :  { %3759 = vst [vmem:[#allocation4 + $0x338] sm:$0xff] %v3733_v63  ;;  %4512 = vmatmul.bf16.gmra.mxu1 %v9818_v26  ;;  %4613 = vmatpush.bf16.msrb.mxu3 %v6967_v25  ;;  %v2851_v43 = vpop.permute.xlu0 %2850  ;;  %v3695_v50 = vpop.permute.xlu2 %3694 }
 0x3a6   :  { %4653 = vmatpush.bf16.msra.mxu1 %v6731_v53  ;;  %3760 = vst.msk [vmem:[#allocation4 + $0x340] sm:$0xff] %vm8025_vm4, %v3734_v60  ;;  %4598 = vmatpush.bf16.msrb.mxu2 %v6679_v28  ;;  %v3451_v51 = vpop.permute.xlu1 %3450  ;;  %v2869_v35 = vrot.slane %v2851_v43, 4  ;;  %v3713_v49 = vrot.slane %v3695_v50, 4 }
 0x3a7   :  { %v3463_v44 = vrot.slane %v3451_v51, 4 }
 0x3a8   :  { %4563 = vmatpush.bf16.msrb.mxu0 %v6795_v46  ;;  %v2883_v53 = vsel %vm506_vm2, %v10631_v9, %v2869_v35  ;;  %v2885_v18 = vsel %vm640_vm9, %v2851_v43, %v2869_v35  ;;  %v3727_v41 = vsel %vm506_vm2, %v3712_v14, %v3713_v49  ;;  %v3729_v62 = vsel %vm1490_vm8, %v3695_v50, %v3713_v49  ;;  %v6894_v50 = vld [vmem:[#allocation4 + $0x248] sm:$0xf] }
 0x3a9   :  { %v3481_v40 = vsel %vm506_vm2, %v10632_v0, %v3463_v44  ;;  %v3483_v4 = vsel %vm1232_vm7, %v3451_v51, %v3463_v44  ;;  %v2884_v16 = vsel %vm640_vm9, %v9340_v24, %v2883_v53  ;;  %2913 = vst.msk [vmem:[#allocation4 + $0x88] sm:$0xff] %vm8025_vm4, %v2885_v18  ;;  %v3728_v14 = vsel %vm1490_vm8, %v9400_v19, %v3727_v41  ;;  %v7477_v41 = vld [vmem:[#allocation4 + $0x4c] sm:$0xf0] }
 0x3aa   :  { %4654 = vmatpush.bf16.msra.mxu1 %v6707_v34  ;;  %v3482_v2 = vsel %vm1232_vm7, %v9435_v10, %v3481_v40  ;;  %3507 = vst.msk [vmem:[#allocation4 + $0x298] sm:$0xff] %vm8025_vm4, %v3483_v4  ;;  %4614 = vmatpush.bf16.msrb.mxu3 %v6943_v54  ;;  %v6895_v35 = vor.u32 %v7543_v58, %v6894_v50  ;;  %v10635_v49 = vrot.slane %v9223_v15, 4  ;;  %v6632_v54 = vld [vmem:[#allocation4 + $0x50] sm:$0xf0] }
 0x3ab   :  { %3506 = vst [vmem:[#allocation4 + $0x290] sm:$0xff] %v3482_v2  ;;  %4564 = vmatmul.bf16.vlgmr.msrb.gmra.mxu0 %v9751_v45  ;;  %v6870_v2 = vld [vmem:[#allocation4 + $0x218] sm:$0xf] }
 0x3ac   :  { %2912 = vst [vmem:[#allocation4 + $0x80] sm:$0xff] %v2884_v16 }
 0x3ad   :  { %3756 = vst [vmem:[#allocation4 + $0x320] sm:$0xff] %v3728_v14  ;;  %v3323_v24 = vpop.permute.xlu0 %3322  ;;  %v3115_v31 = vpop.permute.xlu2 %3114 }
 0x3ae   :  { %4655 = vmatpush.bf16.msra.mxu1 %v6683_v21  ;;  %3757 = vst.msk [vmem:[#allocation4 + $0x328] sm:$0xff] %vm8025_vm4, %v3729_v62  ;;  %v2729_v10 = vpop.permute.xlu1 %2728  ;;  %v3335_v3 = vrot.slane %v3323_v24, 4  ;;  %v3143_v7 = vrot.slane %v3115_v31, 4  ;;  %v6846_v31 = vld [vmem:[#allocation4 + $0x1e8] sm:$0xf] }
 0x3af   :  { %v2744_v12 = vrot.slane %v2729_v10, 4 }
 0x3b0   :  { %v3353_v19 = vsel %vm506_vm2, %v3334_v38, %v3335_v3  ;;  %v3355_v47 = vsel %vm1103_vm12, %v3323_v24, %v3335_v3  ;;  %v3160_v48 = vsel %vm506_vm2, %v10633_v6, %v3143_v7  ;;  %v7480_v38 = vld [vmem:[#allocation4 + $0x6c] sm:$0xf] }
 0x3b1   :  { %v2760_v33 = vsel %vm506_vm2, %v10634_v52, %v2744_v12  ;;  %v2762_v63 = vsel %vm508_vm11, %v2729_v10, %v2744_v12  ;;  %v3354_v34 = vsel %vm1103_vm12, %v9598_v13, %v3353_v19  ;;  %3379 = vst.msk [vmem:[#allocation4 + $0x238] sm:$0xff] %vm8025_vm4, %v3355_v47  ;;  %v3161_v60 = vsel %vm922_vm10, %v9600_v57, %v3160_v48  ;;  %v7531_v10 = vld [vmem:[#allocation4 + $0x1fc] sm:$0xf0]  ;;  %v7525_v48 = vld [vmem:[#allocation4 + $0x1cc] sm:$0xf0] }
 0x3b2   :  { %v2761_v29 = vsel %vm508_vm11, %v9472_v30, %v2760_v33  ;;  %2788 = vst.msk [vmem:[#allocation4 + $0x40] sm:$0xff] %vm8025_vm4, %v2762_v63  ;;  %v7549_v25 = vld [vmem:[#allocation4 + $0x28c] sm:$0xf0]  ;;  %v10637_v12 = vrot.slane %v9468_v39, 4  ;;  %v6847_v6 = vor.u32 %v7531_v10, %v6846_v31  ;;  %v10638_v52 = vrot.slane %v9307_v27, 4 }
 0x3b3   :  { %2787 = vst [vmem:[#allocation4 + $0x38] sm:$0xff] %v2761_v29  ;;  %v7483_v37 = vld [vmem:[#allocation4 + $0x7c] sm:$0xf0]  ;;  %v6919_v28 = vor.u32 %v7549_v25, %v6918_v11  ;;  %v6656_v13 = vld [vmem:[#allocation4 + $0x80] sm:$0xf0] }
 0x3b4   :  { %3378 = vst [vmem:[#allocation4 + $0x230] sm:$0xff] %v3354_v34  ;;  %v6655_v46 = vor.u32 %v7483_v37, %v6654_v23  ;;  %v6659_v43 = vor.u32 %v7480_v38, %v6656_v13  ;;  %v6822_v23 = vld [vmem:[#allocation4 + $0x1b8] sm:$0xf]  ;;  %v7558_v38 = vld [vmem:[#allocation4 + $0x2dc] sm:$0xf] }
 0x3b5   :  { %3194 = vst.msk [vmem:[#allocation4 + $0x130] sm:$0xff] %vm8025_vm4, %v3161_v60  ;;  %7030 = vmatmul.msk.bf16.vlgmr.msrb.gmra.mxu1 %vm216_vm0, %v9630_v20  ;;  %4615 = vmatpush.bf16.msrb.mxu3 %v6919_v28  ;;  %v2717_v30 = vpop.permute.xlu0 %2716  ;;  %v6974_v29 = vld [vmem:[#allocation4 + $0x2e0] sm:$0xf]  ;;  %v6823_v13 = vor.u32 %v7525_v48, %v6822_v23  ;;  %v6902_v48 = vld [vmem:[#allocation4 + $0x250] sm:$0xf] }
 0x3b6   :  { %4599 = vmatpush.bf16.msrb.mxu2 %v6655_v46  ;;  %4656 = vmatpush.bf16.msra.mxu1 %v6659_v43  ;;  %v2723_v57 = vpop.permute.xlu1 %2722  ;;  %v2738_v17 = vrot.slane %v2717_v30, 4  ;;  %v6968_v43 = vld [vmem:[#allocation4 + $0x2f0] sm:$0xf0]  ;;  %v6926_v10 = vld [vmem:[#allocation4 + $0x280] sm:$0xf] }
 0x3b7   :  { %v2741_v51 = vrot.slane %v2723_v57, 4  ;;  %v6896_v23 = vld [vmem:[#allocation4 + $0x260] sm:$0xf0] }
 0x3b8   :  { %v2750_v21 = vsel %vm506_vm2, %v10635_v49, %v2738_v17  ;;  %v2752_v44 = vsel %vm508_vm11, %v2717_v30, %v2738_v17  ;;  %v6971_v30 = vor.u32 %v7558_v38, %v6968_v43  ;;  %v7544_v38 = vld [vmem:[#allocation4 + $0x264] sm:$0xf0] }
 0x3b9   :  { %v2755_v9 = vsel %vm506_vm2, %v10636_v56, %v2741_v51  ;;  %v2757_v53 = vsel %vm508_vm11, %v2723_v57, %v2741_v51  ;;  %v2751_v18 = vsel %vm508_vm11, %v9223_v15, %v2750_v21  ;;  %2782 = vst.msk [vmem:[#allocation4 + $0x10] sm:$0xff] %vm8025_vm4, %v2752_v44  ;;  %4616 = vmatpush.bf16.msrb.mxu3 %v6895_v35  ;;  %v7519_v57 = vld [vmem:[#allocation4 + $0x19c] sm:$0xf0]  ;;  %v6944_v35 = vld [vmem:[#allocation4 + $0x2c0] sm:$0xf0] }
 0x3ba   :  { %v2756_v0 = vsel %vm508_vm11, %v9373_v5, %v2755_v9  ;;  %2785 = vst.msk [vmem:[#allocation4 + $0x28] sm:$0xff] %vm8025_vm4, %v2757_v53  ;;  %v6630_v40 = vld [vmem:[#allocation4 + $0x38] sm:$0xf]  ;;  %v7474_v4 = vld [vmem:[#allocation4 + $0x3c] sm:$0xf] }
 0x3bb   :  { %2784 = vst [vmem:[#allocation4 + $0x20] sm:$0xff] %v2756_v0  ;;  %4569 = vmatmul.bf16.gmra.mxu0 %v9818_v26  ;;  %v6631_v16 = vor.u32 %v7477_v41, %v6630_v40  ;;  %v7537_v15 = vld [vmem:[#allocation4 + $0x22c] sm:$0xf0]  ;;  %v6635_v14 = vor.u32 %v7474_v4, %v6632_v54  ;;  %v6798_v21 = vld [vmem:[#allocation4 + $0x188] sm:$0xf] }
 0x3bc   :  { %2781 = vst [vmem:[#allocation4 + $0x8] sm:$0xff] %v2751_v18  ;;  %v6871_v62 = vor.u32 %v7537_v15, %v6870_v2  ;;  %v7556_v44 = vld [vmem:[#allocation4 + $0x2c4] sm:$0xf0]  ;;  %v6799_v9 = vor.u32 %v7519_v57, %v6798_v21  ;;  %v7552_v53 = vld [vmem:[#allocation4 + $0x2ac] sm:$0xf] }
 0x3bd   :  { %4600 = vmatpush.bf16.msrb.mxu2 %v6631_v16  ;;  %4657 = vmatpush.bf16.msra.mxu1 %v6635_v14  ;;  %v3707_v24 = vpop.permute.xlu0 %3706  ;;  %v6947_v54 = vor.u32 %v7552_v53, %v6944_v35  ;;  %v6950_v0 = vld [vmem:[#allocation4 + $0x2b0] sm:$0xf]  ;;  %v7014_v40 = vld [vmem:[#allocation4 + $0x338] sm:$0xf]  ;;  %v7570_v4 = vld [vmem:[#allocation4 + $0x33c] sm:$0xf] }
 0x3be   :  { %4617 = vmatpush.bf16.msrb.mxu3 %v6871_v62  ;;  %v3689_v5 = vpop.permute.xlu1 %3688  ;;  %v3719_v3 = vrot.slane %v3707_v24, 4  ;;  %v6920_v2 = vld [vmem:[#allocation4 + $0x290] sm:$0xf0]  ;;  %v7550_v15 = vld [vmem:[#allocation4 + $0x294] sm:$0xf0] }
 0x3bf   :  { %v3710_v7 = vrot.slane %v3689_v5, 4  ;;  %v7528_v57 = vld [vmem:[#allocation4 + $0x1ec] sm:$0xf]  ;;  %v6758_v35 = vld [vmem:[#allocation4 + $0x130] sm:$0xf] }
 0x3c0   :  { %v3737_v19 = vsel %vm506_vm2, %v10637_v12, %v3719_v3  ;;  %v3739_v47 = vsel %vm1490_vm8, %v3707_v24, %v3719_v3  ;;  %v7546_v24 = vld [vmem:[#allocation4 + $0x27c] sm:$0xf]  ;;  %v6927_v12 = vor.u32 %v7550_v15, %v6926_v10  ;;  %v6806_v10 = vld [vmem:[#allocation4 + $0x190] sm:$0xf] }
 0x3c1   :  { %v3722_v33 = vsel %vm506_vm2, %v10638_v52, %v3710_v7  ;;  %v3724_v63 = vsel %vm1490_vm8, %v3689_v5, %v3710_v7  ;;  %v3738_v34 = vsel %vm1490_vm8, %v9468_v39, %v3737_v19  ;;  %3763 = vst.msk [vmem:[#allocation4 + $0x358] sm:$0xff] %vm8025_vm4, %v3739_v47  ;;  %v6923_v31 = vor.u32 %v7546_v24, %v6920_v2  ;;  %v7540_v19 = vld [vmem:[#allocation4 + $0x24c] sm:$0xf]  ;;  %v7567_v47 = vld [vmem:[#allocation4 + $0x31c] sm:$0xf0] }
 0x3c2   :  { %v3723_v60 = vsel %vm1490_vm8, %v9307_v27, %v3722_v33  ;;  %3754 = vst.msk [vmem:[#allocation4 + $0x310] sm:$0xff] %vm8025_vm4, %v3724_v63  ;;  %4618 = vmatpush.bf16.msrb.mxu3 %v6847_v6  ;;  %v7471_v11 = vld [vmem:[#allocation4 + $0x1c] sm:$0xf0]  ;;  %v6608_v25 = vld [vmem:[#allocation4 + $0x20] sm:$0xf0]  ;;  %v10639_v52 = vrot.slane %v9504_v8, 4 }
 0x3c3   :  { %3753 = vst [vmem:[#allocation4 + $0x308] sm:$0xff] %v3723_v60  ;;  %v6606_v37 = vld [vmem:[#allocation4 + $0x8] sm:$0xf]  ;;  %v7468_v28 = vld [vmem:[#allocation4 + $0xc] sm:$0xf]  ;;  %v6899_v60 = vor.u32 %v7540_v19, %v6896_v23 }
 0x3c4   :  { %3762 = vst [vmem:[#allocation4 + $0x350] sm:$0xff] %v3738_v34  ;;  %v6607_v39 = vor.u32 %v7471_v11, %v6606_v37  ;;  %v6611_v46 = vor.u32 %v7468_v28, %v6608_v25  ;;  %v7562_v27 = vld [vmem:[#allocation4 + $0x2f4] sm:$0xf0]  ;;  %v6992_v6 = vld [vmem:[#allocation4 + $0x320] sm:$0xf0]  ;;  %v6903_v28 = vor.u32 %v7544_v38, %v6902_v48 }
 0x3c5   :  { %7031 = vmatmul.msk.bf16.gmra.mxu1 %vm216_vm0, %v9696_v55  ;;  %v3131_v50 = vpop.permute.xlu0 %3130  ;;  %v6975_v51 = vor.u32 %v7562_v27, %v6974_v29  ;;  %v6872_v37 = vld [vmem:[#allocation4 + $0x230] sm:$0xf0]  ;;  %v6878_v27 = vld [vmem:[#allocation4 + $0x220] sm:$0xf]  ;;  %v6736_v2 = vld [vmem:[#allocation4 + $0x118] sm:$0xf0] }
 0x3c6   :  { %4601 = vmatpush.bf16.msrb.mxu2 %v6607_v39  ;;  %4619 = vmatpush.bf16.msrb.mxu3 %v6823_v13  ;;  %v3139_v17 = vpop.permute.xlu1 %3138  ;;  %v3151_v58 = vrot.slane %v3131_v50, 4  ;;  %v7538_v50 = vld [vmem:[#allocation4 + $0x234] sm:$0xf0]  ;;  %v7496_v19 = vld [vmem:[#allocation4 + $0xe4] sm:$0xf0] }
 0x3c7   :  { %4658 = vmatpush.bf16.msra.mxu1 %v6611_v46  ;;  %v3155_v49 = vrot.slane %v3139_v17, 4  ;;  %v6879_v42 = vor.u32 %v7538_v50, %v6878_v27  ;;  %v6848_v17 = vld [vmem:[#allocation4 + $0x200] sm:$0xf0]  ;;  %v6662_v27 = vld [vmem:[#allocation4 + $0x70] sm:$0xf] }
 0x3c8   :  { %v3172_v56 = vsel %vm506_vm2, %v3150_v59, %v3151_v58  ;;  %v6951_v59 = vor.u32 %v7556_v44, %v6950_v0  ;;  %v6854_v58 = vld [vmem:[#allocation4 + $0x1f0] sm:$0xf]  ;;  %v7505_v44 = vld [vmem:[#allocation4 + $0x134] sm:$0xf]  ;;  %v7502_v0 = vld [vmem:[#allocation4 + $0x114] sm:$0xf0] }
 0x3c9   :  { %v3178_v18 = vsel %vm506_vm2, %v3154_v1, %v3155_v49  ;;  %v3173_v41 = vsel %vm922_vm10, %v9656_v22, %v3172_v56  ;;  %4602 = vmatmul.bf16.vlgmr.msrb.gmra.mxu2 %v9701_v32  ;;  %v6851_v49 = vor.u32 %v7528_v57, %v6848_v17  ;;  %v7574_v24 = vld [vmem:[#allocation4 + $0x354] sm:$0xf0]  ;;  %v7571_v48 = vld [vmem:[#allocation4 + $0x344] sm:$0xf]  ;;  %v7565_v38 = vld [vmem:[#allocation4 + $0x314] sm:$0xf] }
 0x3ca   :  { %4670 = vmatpush.bf16.msra.mxu2 %v6971_v30  ;;  %v3179_v16 = vsel %vm922_vm10, %v9698_v61, %v3178_v18  ;;  %3200 = vst.msk [vmem:[#allocation4 + $0x160] sm:$0xff] %vm8025_vm4, %v3173_v41  ;;  %4620 = vmatpush.bf16.msrb.mxu3 %v6799_v9  ;;  %v6990_v5 = vld [vmem:[#allocation4 + $0x308] sm:$0xf]  ;;  %v7564_v3 = vld [vmem:[#allocation4 + $0x30c] sm:$0xf] }
 0x3cb   :  { %4727 = vmatpush.bf16.msrb.mxu1 %v6975_v51  ;;  %3203 = vst.msk [vmem:[#allocation4 + $0x178] sm:$0xff] %vm8025_vm4, %v3179_v16  ;;  %v7573_v22 = vld [vmem:[#allocation4 + $0x34c] sm:$0xf0]  ;;  %v7016_v1 = vld [vmem:[#allocation4 + $0x350] sm:$0xf0]  ;;  %v6991_v63 = vor.u32 %v7567_v47, %v6990_v5  ;;  %v6995_v34 = vor.u32 %v7564_v3, %v6992_v6 }
 0x3cc   :  { %v7015_v14 = vor.u32 %v7573_v22, %v7014_v40  ;;  %v7019_v62 = vor.u32 %v7570_v4, %v7016_v1  ;;  %v7534_v30 = vld [vmem:[#allocation4 + $0x21c] sm:$0xf]  ;;  %v7532_v51 = vld [vmem:[#allocation4 + $0x204] sm:$0xf0]  ;;  %v6824_v41 = vld [vmem:[#allocation4 + $0x1d0] sm:$0xf0] }
 0x3cd   :  { %4621 = vmatmul.bf16.vlgmr.msrb.gmra.mxu3 %v9751_v45  ;;  %v3123_v61 = vpop.permute.xlu0 %3122  ;;  %v6855_v9 = vor.u32 %v7532_v51, %v6854_v58  ;;  %v7522_v40 = vld [vmem:[#allocation4 + $0x1bc] sm:$0xf]  ;;  %v6830_v16 = vld [vmem:[#allocation4 + $0x1c0] sm:$0xf]  ;;  %v6800_v1 = vld [vmem:[#allocation4 + $0x1a0] sm:$0xf0] }
 0x3ce   :  { %4671 = vmatpush.bf16.msra.mxu2 %v6947_v54  ;;  %4638 = vmatpush.bf16.msra.mxu0 %v7015_v14  ;;  %v3147_v7 = vrot.slane %v3123_v61, 4  ;;  %v7526_v54 = vld [vmem:[#allocation4 + $0x1d4] sm:$0xf0]  ;;  %v6827_v4 = vor.u32 %v7522_v40, %v6824_v41  ;;  %v7499_v14 = vld [vmem:[#allocation4 + $0x104] sm:$0xf] }
 0x3cf   :  { %4728 = vmatpush.bf16.msrb.mxu1 %v6951_v59  ;;  %4695 = vmatpush.bf16.msra.mxu3 %v7019_v62  ;;  %v6734_v59 = vld [vmem:[#allocation4 + $0x100] sm:$0xf]  ;;  %v6831_v15 = vor.u32 %v7526_v54, %v6830_v16  ;;  %v7520_v62 = vld [vmem:[#allocation4 + $0x1a4] sm:$0xf0]  ;;  %v6739_v61 = vor.u32 %v7499_v14, %v6736_v2  ;;  %v7024_v5 = vld [vmem:[#allocation4 + $0x358] sm:$0xf0] }
 0x3d0   :  { %v3166_v33 = vsel %vm506_vm2, %v10639_v52, %v3147_v7  ;;  %v6735_v22 = vor.u32 %v7502_v0, %v6734_v59  ;;  %v7022_v7 = vld [vmem:[#allocation4 + $0x340] sm:$0xf]  ;;  %v6807_v47 = vor.u32 %v7520_v62, %v6806_v10  ;;  %v7493_v52 = vld [vmem:[#allocation4 + $0xd4] sm:$0xf]  ;;  %v7475_v51 = vld [vmem:[#allocation4 + $0x44] sm:$0xf] }
 0x3d1   :  { %v3167_v29 = vsel %vm922_vm10, %v9504_v8, %v3166_v33  ;;  %v6782_v11 = vld [vmem:[#allocation4 + $0x160] sm:$0xf]  ;;  %v7511_v25 = vld [vmem:[#allocation4 + $0x164] sm:$0xf]  ;;  %v6875_v8 = vor.u32 %v7534_v30, %v6872_v37  ;;  %v7023_v6 = vor.u32 %v7574_v24, %v7022_v7  ;;  %v6712_v33 = vld [vmem:[#allocation4 + $0xe8] sm:$0xf0] }
 0x3d2   :  { %4672 = vmatpush.bf16.msra.mxu2 %v6923_v31  ;;  %3197 = vst.msk [vmem:[#allocation4 + $0x148] sm:$0xff] %vm8025_vm4, %v3167_v29  ;;  %4639 = vmatpush.bf16.msra.mxu0 %v6991_v63  ;;  %v7514_v39 = vld [vmem:[#allocation4 + $0x174] sm:$0xf0]  ;;  %v6784_v13 = vld [vmem:[#allocation4 + $0x178] sm:$0xf0]  ;;  %v7027_v63 = vor.u32 %v7571_v48, %v7024_v5  ;;  %v6715_v29 = vor.u32 %v7493_v52, %v6712_v33 }
 0x3d3   :  { %4729 = vmatpush.bf16.msrb.mxu1 %v6927_v12  ;;  %4696 = vmatpush.bf16.msra.mxu3 %v6995_v34  ;;  %v6783_v46 = vor.u32 %v7514_v39, %v6782_v11  ;;  %v6787_v43 = vor.u32 %v7511_v25, %v6784_v13  ;;  %v7516_v31 = vld [vmem:[#allocation4 + $0x18c] sm:$0xf]  ;;  %v6710_v12 = vld [vmem:[#allocation4 + $0xd0] sm:$0xf]  ;;  %v7490_v11 = vld [vmem:[#allocation4 + $0xb4] sm:$0xf0] }
 0x3d4   :  { %v6803_v3 = vor.u32 %v7516_v31, %v6800_v1  ;;  %v6998_v34 = vld [vmem:[#allocation4 + $0x310] sm:$0xf]  ;;  %v6711_v23 = vor.u32 %v7496_v19, %v6710_v12  ;;  %v7000_v37 = vld [vmem:[#allocation4 + $0x328] sm:$0xf0]  ;;  %v6686_v13 = vld [vmem:[#allocation4 + $0xa0] sm:$0xf] }
 0x3d5   :  { %7032 = vmatmul.msk.bf16.vlgmr.msra.gmra.mxu0 %vm216_vm0, %v9630_v20  ;;  %4659 = vmatmul.bf16.vlgmr.msra.gmra.mxu1 %v9701_v32  ;;  %v7003_v39 = vor.u32 %v7565_v38, %v7000_v37  ;;  %v7484_v30 = vld [vmem:[#allocation4 + $0x84] sm:$0xf0]  ;;  %v7481_v57 = vld [vmem:[#allocation4 + $0x74] sm:$0xf]  ;;  %v6638_v58 = vld [vmem:[#allocation4 + $0x40] sm:$0xf]  ;;  %v9965_v37 = vpop.permute.xlu1 %3901 }
 0x3d6   :  { %4673 = vmatpush.bf16.msra.mxu2 %v6899_v60  ;;  %4708 = vmatpush.bf16.msrb.mxu0 %v6783_v46  ;;  %v7568_v60 = vld [vmem:[#allocation4 + $0x324] sm:$0xf0]  ;;  %v6687_v46 = vor.u32 %v7490_v11, %v6686_v13  ;;  %v7559_v41 = vld [vmem:[#allocation4 + $0x2e4] sm:$0xf]  ;;  %v6976_v0 = vld [vmem:[#allocation4 + $0x2f8] sm:$0xf0] }
 0x3d7   :  { %4730 = vmatpush.bf16.msrb.mxu1 %v6903_v28  ;;  %4765 = vmatpush.bf16.msrb.mxu3 %v6787_v43  ;;  %v6999_v25 = vor.u32 %v7568_v60, %v6998_v34  ;;  %v6688_v28 = vld [vmem:[#allocation4 + $0xb8] sm:$0xf0]  ;;  %v7487_v43 = vld [vmem:[#allocation4 + $0xa4] sm:$0xf]  ;;  %v6952_v16 = vld [vmem:[#allocation4 + $0x2c8] sm:$0xf0] }
 0x3d8   :  { %v6691_v50 = vor.u32 %v7487_v43, %v6688_v28  ;;  %v7553_v59 = vld [vmem:[#allocation4 + $0x2b4] sm:$0xf]  ;;  %v6904_v62 = vld [vmem:[#allocation4 + $0x268] sm:$0xf0]  ;;  %v7535_v31 = vld [vmem:[#allocation4 + $0x224] sm:$0xf]  ;;  %v9967_v28 = vpop.permute.xlu2 %3896 }
 0x3d9   :  { %4607 = vmatmul.bf16.gmra.mxu2 %v9769_v36  ;;  %v7508_v21 = vld [vmem:[#allocation4 + $0x144] sm:$0xf0]  ;;  %v6760_v56 = vld [vmem:[#allocation4 + $0x148] sm:$0xf0]  ;;  %v6955_v2 = vor.u32 %v7553_v59, %v6952_v16  ;;  %v7541_v14 = vld [vmem:[#allocation4 + $0x254] sm:$0xf] }
 0x3da   :  { %4674 = vmatpush.bf16.msra.mxu2 %v6875_v8  ;;  %v6759_v53 = vor.u32 %v7508_v21, %v6758_v35  ;;  %v6763_v18 = vor.u32 %v7505_v44, %v6760_v56  ;;  %v6664_v8 = vld [vmem:[#allocation4 + $0x88] sm:$0xf0]  ;;  %v7478_v35 = vld [vmem:[#allocation4 + $0x54] sm:$0xf0]  ;;  %v6640_v21 = vld [vmem:[#allocation4 + $0x58] sm:$0xf0]  ;;  %v6907_v24 = vor.u32 %v7541_v14, %v6904_v62 }
 0x3db   :  { %4731 = vmatpush.bf16.msrb.mxu1 %v6879_v42  ;;  %v6663_v42 = vor.u32 %v7484_v30, %v6662_v27  ;;  %v6667_v17 = vor.u32 %v7481_v57, %v6664_v8  ;;  %v6643_v44 = vor.u32 %v7475_v51, %v6640_v21  ;;  %v6614_v56 = vld [vmem:[#allocation4 + $0x10] sm:$0xf]  ;;  %v7529_v5 = vld [vmem:[#allocation4 + $0x1f4] sm:$0xf]  ;;  %v6832_v19 = vld [vmem:[#allocation4 + $0x1d8] sm:$0xf0] }
 0x3dc   :  { %4709 = vmatpush.bf16.msrb.mxu0 %v6759_v53  ;;  %4766 = vmatpush.bf16.msrb.mxu3 %v6763_v18  ;;  %v7469_v53 = vld [vmem:[#allocation4 + $0x14] sm:$0xf]  ;;  %v6616_v18 = vld [vmem:[#allocation4 + $0x28] sm:$0xf0] }
 0x3dd   :  { %4626 = vmatmul.bf16.gmra.mxu3 %v9818_v26  ;;  %v6619_v40 = vor.u32 %v7469_v53, %v6616_v18  ;;  %v6808_v52 = vld [vmem:[#allocation4 + $0x1a8] sm:$0xf0] }
 0x3de   :  { %4675 = vmatpush.bf16.msra.mxu2 %v6851_v49  ;;  %v6639_v49 = vor.u32 %v7478_v35, %v6638_v58  ;;  %v4828_v18 = vld [vmem:[#allocation2 + $0x48] sm:$0xff] }
 0x3df   :  { %4732 = vmatpush.bf16.msrb.mxu1 %v6855_v9  ;;  %v7472_v9 = vld [vmem:[#allocation4 + $0x24] sm:$0xf0] }
 0x3e0   :  { %4710 = vmatpush.bf16.msrb.mxu0 %v6735_v22  ;;  %4767 = vmatpush.bf16.msrb.mxu3 %v6739_v61  ;;  %v6615_v54 = vor.u32 %v7472_v9, %v6614_v56  ;;  %v7547_v22 = vld [vmem:[#allocation4 + $0x284] sm:$0xf]  ;;  %v6880_v61 = vld [vmem:[#allocation4 + $0x238] sm:$0xf0] }
 0x3e1   :  { %v6883_v10 = vor.u32 %v7535_v31, %v6880_v61 }
 0x3e2   :  { %4676 = vmatpush.bf16.msra.mxu2 %v6827_v4  ;;  %v6979_v4 = vor.u32 %v7559_v41, %v6976_v0 }
 0x3e3   :  { %4733 = vmatpush.bf16.msrb.mxu1 %v6831_v15  ;;  %v6928_v15 = vld [vmem:[#allocation4 + $0x298] sm:$0xf0] }
 0x3e4   :  { %4711 = vmatpush.bf16.msrb.mxu0 %v6711_v23  ;;  %4768 = vmatpush.bf16.msrb.mxu3 %v6715_v29  ;;  %v6931_v1 = vor.u32 %v7547_v22, %v6928_v15 }
 0x3e5   :  { %7033 = vmatmul.msk.bf16.gmra.mxu0 %vm216_vm0, %v9696_v55  ;;  %4664 = vmatmul.bf16.gmra.mxu1 %v9769_v36 }
 0x3e6   :  { %4677 = vmatpush.bf16.msra.mxu2 %v6803_v3  ;;  %v6856_v3 = vld [vmem:[#allocation4 + $0x208] sm:$0xf0] }
 0x3e7   :  { %4734 = vmatpush.bf16.msrb.mxu1 %v6807_v47  ;;  %v6859_v12 = vor.u32 %v7529_v5, %v6856_v3  ;;  %v7523_v47 = vld [vmem:[#allocation4 + $0x1c4] sm:$0xf] }
 0x3e8   :  { %4712 = vmatpush.bf16.msrb.mxu0 %v6687_v46  ;;  %4769 = vmatpush.bf16.msrb.mxu3 %v6691_v50  ;;  %v6835_v48 = vor.u32 %v7523_v47, %v6832_v19  ;;  %v9972_v46 = vpop.permute.xlu0 %3891  ;;  %v4841_v19 = vld [vmem:[#allocation2 + $0xd0] sm:$0xff] }
 0x3e9   :  { %4678 = vmatmul.bf16.vlgmr.msra.gmra.mxu2 %v9751_v45 }
 0x3ea   :  { %4752 = vmatpush.bf16.msrb.mxu2 %v7023_v6 }
 0x3eb   :  { %4809 = vmatpush.bf16.msra.mxu1 %v7027_v63  ;;  %v7517_v63 = vld [vmem:[#allocation4 + $0x194] sm:$0xf] }
 0x3ec   :  { %4713 = vmatpush.bf16.msrb.mxu0 %v6663_v42  ;;  %4770 = vmatpush.bf16.msrb.mxu3 %v6667_v17  ;;  %v6811_v34 = vor.u32 %v7517_v63, %v6808_v52  ;;  %v9977_v17 = vpop.permute.xlu1 %3886  ;;  %v4835_v52 = vld [vmem:[#allocation2 + $0x90] sm:$0xff] }
 0x3ed   :  { %7034 = vmatmul.msk.bf16.vlgmr.msra.gmra.mxu3 %vm216_vm0, %v9630_v20 }
 0x3ee   :  { %4753 = vmatpush.bf16.msrb.mxu2 %v6999_v25 }
 0x3ef   :  { %4810 = vmatpush.bf16.msra.mxu1 %v7003_v39 }
 0x3f0   :  { %4714 = vmatpush.bf16.msrb.mxu0 %v6639_v49  ;;  %4771 = vmatpush.bf16.msrb.mxu3 %v6643_v44  ;;  %v4834_v49 = vld [vmem:[#allocation2 + $0x88] sm:$0xff] }
 0x3f4   :  { %4715 = vmatpush.bf16.msrb.mxu0 %v6615_v54  ;;  %4772 = vmatpush.bf16.msrb.mxu3 %v6619_v40  ;;  %v4822_v40 = vld [vmem:[#allocation2 + $0x8] sm:$0xff] }
 0x3f5   :  { %4735 = vmatmul.bf16.vlgmr.msrb.gmra.mxu1 %v9751_v45 }
 0x3f7   :  { %4716 = vmatmul.bf16.vlgmr.msrb.gmra.mxu0 %v9701_v32 }
 0x3f8   :  { %4784 = vmatpush.bf16.msra.mxu0 %v6979_v4  ;;  %v4527_v6 = vpop.f32.mrf.mxu2 }
 0x3f9   :  { %4683 = vmatmul.bf16.gmra.mxu2 %v9818_v26 }
 0x3fc   :  { %4785 = vmatpush.bf16.msra.mxu0 %v6955_v2 }
 0x3fd   :  { %7035 = vmatmul.msk.bf16.gmra.mxu3 %vm216_vm0, %v9696_v55 }
 0x400   :  { %4786 = vmatpush.bf16.msra.mxu0 %v6931_v1  ;;  %v4529_v38 = vpop.f32.mrf.mxu2 }
 0x404   :  { %4787 = vmatpush.bf16.msra.mxu0 %v6907_v24 }
 0x405   :  { %4740 = vmatmul.bf16.gmra.mxu1 %v9818_v26 }
 0x407   :  { %4721 = vmatmul.bf16.gmra.mxu0 %v9769_v36 }
 0x408   :  { %4788 = vmatpush.bf16.msra.mxu0 %v6883_v10  ;;  %v4489_v7 = vpop.f32.mrf.mxu0  ;;  %v4532_v11 = vpop.f32.mrf.mxu2 }
 0x409   :  { %7036 = vmatmul.msk.bf16.vlgmr.msrb.gmra.mxu2 %vm216_vm0, %v9630_v20  ;;  %v4490_v58 = vadd.f32 %v4489_v7, %v9977_v17 }
 0x40c   :  { %4789 = vmatpush.bf16.msra.mxu0 %v6859_v12 }
 0x40d   :  { %4773 = vmatmul.bf16.vlgmr.msrb.gmra.mxu3 %v9701_v32 }
 0x410   :  { %4790 = vmatpush.bf16.msra.mxu0 %v6835_v48  ;;  %v4491_v33 = vpop.f32.mrf.mxu0  ;;  %v4546_v39 = vpop.f32.mrf.mxu3 }
 0x411   :  { %v4534_v50 = vpop.f32.mrf.mxu2  ;;  %v4492_v30 = vadd.f32 %v4491_v33, %v9972_v46  ;;  %v4547_v33 = vadd.f32 %v4546_v39, %v9977_v17 }
 0x412   :  { %v4508_v23 = vpop.f32.mrf.mxu1 }
 0x413   :  { %v4509_v21 = vadd.f32 %v4508_v23, %v4490_v58 }
 0x414   :  { %4791 = vmatpush.bf16.msra.mxu0 %v6811_v34 }
 0x415   :  { %7038 = vmatmul.msk.bf16.vlgmr.msra.gmra.mxu1 %vm216_vm0, %v9630_v20  ;;  %v4528_v41 = vadd.f32 %v4527_v6, %v4509_v21 }
 0x417   :  { %4792 = vmatmul.bf16.vlgmr.msra.gmra.mxu0 %v9751_v45  ;;  %v4846_v4 = vadd.f32 %v4822_v40, %v4528_v41 }
 0x418   :  { %v4494_v29 = vpop.f32.mrf.mxu0  ;;  %v4548_v35 = vpop.f32.mrf.mxu3 }
 0x419   :  { %7037 = vmatmul.msk.bf16.gmra.mxu2 %vm216_vm0, %v9696_v55  ;;  %v4495_v20 = vadd.f32 %v4494_v29, %v9967_v28  ;;  %v4870_v22 = vmax.f32 %v4846_v4, 0.0  ;;  %v4549_v3 = vadd.f32 %v4548_v35, %v9972_v46 }
 0x41a   :  { %v4510_v60 = vpop.f32.mrf.mxu1 }
 0x41b   :  { %v4511_v27 = vadd.f32 %v4510_v60, %v4492_v30  ;;  %v4829_v60 = vld [vmem:[#allocation2 + $0x50] sm:$0xff] }
 0x41d   :  { %4778 = vmatmul.bf16.gmra.mxu3 %v9769_v36  ;;  %v4530_v44 = vadd.f32 %v4529_v38, %v4511_v27 }
 0x41f   :  { %v4852_v54 = vadd.f32 %v4828_v18, %v4530_v44 }
 0x420   :  { %v4496_v32 = vpop.f32.mrf.mxu0  ;;  %v4551_v59 = vpop.f32.mrf.mxu3 }
 0x421   :  { %v4497_v45 = vadd.f32 %v4496_v32, %v9965_v37  ;;  %v4876_v16 = vmax.f32 %v4852_v54, 0.0  ;;  %v4552_v24 = vadd.f32 %v4551_v59, %v9967_v28  ;;  %v4836_v59 = vld [vmem:[#allocation2 + $0x98] sm:$0xff] }
 0x422   :  { %v4513_v25 = vpop.f32.mrf.mxu1 }
 0x423   :  { %v4514_v43 = vadd.f32 %v4513_v25, %v4495_v20 }
 0x425   :  { %7039 = vmatmul.msk.bf16.gmra.mxu1 %vm216_vm0, %v9696_v55  ;;  %v4533_v42 = vadd.f32 %v4532_v11, %v4514_v43  ;;  %v4840_v55 = vld [vmem:[#allocation2 + $0xc8] sm:$0xff] }
 0x427   :  { %4797 = vmatmul.bf16.gmra.mxu0 %v9818_v26  ;;  %v4858_v56 = vadd.f32 %v4834_v49, %v4533_v42 }
 0x428   :  { %v4565_v13 = vpop.f32.mrf.mxu0  ;;  %v4553_v14 = vpop.f32.mrf.mxu3 }
 0x429   :  { %v4882_v0 = vmax.f32 %v4858_v56, 0.0  ;;  %v4554_v61 = vadd.f32 %v4553_v14, %v9965_v37  ;;  %v4566_v29 = vadd.f32 %v4565_v13, %v4547_v33 }
 0x42a   :  { %v4515_v36 = vpop.f32.mrf.mxu1 }
 0x42b   :  { %v4516_v8 = vadd.f32 %v4515_v36, %v4497_v45  ;;  %v4823_v36 = vld [vmem:[#allocation2 + $0x10] sm:$0xff] }
 0x42d   :  { %v4535_v57 = vadd.f32 %v4534_v50, %v4516_v8 }
 0x42f   :  { %v4864_v51 = vadd.f32 %v4840_v55, %v4535_v57 }
 0x430   :  { %v4567_v9 = vpop.f32.mrf.mxu0 }
 0x431   :  { %v4888_v26 = vmax.f32 %v4864_v51, 0.0  ;;  %v4568_v6 = vadd.f32 %v4567_v9, %v4549_v3  ;;  %v4824_v3 = vld [vmem:[#allocation2 + $0x18] sm:$0xff] }
 0x432   :  { %v4584_v53 = vpop.f32.mrf.mxu1 }
 0x433   :  { %4938 = vmatpush.xpose.msra.mxu2 %v4888_v26  ;;  %v4585_v25 = vadd.f32 %v4584_v53, %v4566_v29 }
 0x435   :  { %v4847_v50 = vadd.f32 %v4823_v36, %v4585_v25 }
 0x437   :  { %4939 = vmatpush.xpose.msra.mxu2 %v4882_v0  ;;  %v4871_v42 = vmax.f32 %v4847_v50, 0.0  ;;  %v4842_v0 = vld [vmem:[#allocation2 + $0xd8] sm:$0xff] }
 0x438   :  { %v4570_v15 = vpop.f32.mrf.mxu0 }
 0x439   :  { %v4571_v31 = vadd.f32 %v4570_v15, %v4552_v24 }
 0x43a   :  { %v4586_v2 = vpop.f32.mrf.mxu1 }
 0x43b   :  { %4940 = vmatpush.xpose.msra.mxu2 %v4876_v16  ;;  %v4587_v63 = vadd.f32 %v4586_v2, %v4568_v6 }
 0x43d   :  { %v4853_v20 = vadd.f32 %v4829_v60, %v4587_v63 }
 0x43f   :  { %4941 = vmatpush.xpose.msra.mxu2 %v4870_v22  ;;  %v4877_v30 = vmax.f32 %v4853_v20, 0.0 }
 0x440   :  { %v4572_v62 = vpop.f32.mrf.mxu0 }
 0x441   :  { %v4573_v10 = vadd.f32 %v4572_v62, %v4554_v61  ;;  %v4830_v62 = vld [vmem:[#allocation2 + $0x58] sm:$0xff] }
 0x442   :  { %v4589_v1 = vpop.f32.mrf.mxu1 }
 0x443   :  { %v4590_v7 = vadd.f32 %v4589_v1, %v4571_v31 }
 0x445   :  { %v4859_v34 = vadd.f32 %v4835_v52, %v4590_v7 }
 0x447   :  { %v4883_v45 = vmax.f32 %v4859_v34, 0.0 }
 0x44a   :  { %v4591_v5 = vpop.f32.mrf.mxu1 }
 0x44b   :  { %v4592_v12 = vadd.f32 %v4591_v5, %v4573_v10 }
 0x44c   :  { %v4603_v47 = vpop.f32.mrf.mxu2 }
 0x44d   :  { %v4865_v48 = vadd.f32 %v4841_v19, %v4592_v12  ;;  %v4604_v4 = vadd.f32 %v4603_v47, %v9977_v17 }
 0x44f   :  { %v4889_v23 = vmax.f32 %v4865_v48, 0.0 }
 0x450   :  { %v4622_v38 = vpop.f32.mrf.mxu3 }
 0x451   :  { %4958 = vmatpush.xpose.msra.mxu3 %v4889_v23  ;;  %v4623_v2 = vadd.f32 %v4622_v38, %v4604_v4 }
 0x452   :  { %v4641_v32 = vpop.f32.mrf.mxu0  ;;  %v9984_v11 = vpop.f32.mrf.mxu1 }
 0x453   :  { %v4642_v24 = vadd.f32 %v4641_v32, %v4623_v2 }
 0x454   :  { %v4605_v43 = vpop.f32.mrf.mxu2 }
 0x455   :  { %4959 = vmatpush.xpose.msra.mxu3 %v4883_v45  ;;  %v4606_v56 = vadd.f32 %v4605_v43, %v9972_v46  ;;  %v4848_v12 = vadd.f32 %v4824_v3, %v4642_v24  ;;  %v4894_v45 = vld [vmem:[%s10528_s10] sm:$0xff] }
 0x456   :  { %4898 = vst [vmem:[#allocation1] ss:$4 sm:$0xff] %v4894_v45 }
 0x457   :  { %v4872_v48 = vmax.f32 %v4848_v12, 0.0 }
 0x458   :  { %v4624_v8 = vpop.f32.mrf.mxu3 }
 0x459   :  { %4960 = vmatpush.xpose.msra.mxu3 %v4877_v30  ;;  %v4625_v53 = vadd.f32 %v4624_v8, %v4606_v56  ;;  %v4843_v30 = vld [vmem:[#allocation2 + $0xe0] sm:$0xff] }
 0x45a   :  { %v4643_v39 = vpop.f32.mrf.mxu0  ;;  %v4662_v27 = vpop.f32.mrf.mxu1 }
 0x45b   :  { %v4644_v15 = vadd.f32 %v4643_v39, %v4625_v53  ;;  %v4663_v43 = vadd.f32 %v4662_v27, %v9972_v46 }
 0x45c   :  { %v4608_v57 = vpop.f32.mrf.mxu2 }
 0x45d   :  { %4961 = vmatpush.xpose.msra.mxu3 %v4871_v42  ;;  %v4609_v35 = vadd.f32 %v4608_v57, %v9967_v28  ;;  %v4854_v61 = vadd.f32 %v4830_v62, %v4644_v15  ;;  %v4837_v57 = vld [vmem:[#allocation2 + $0xa0] sm:$0xff]  ;;  %v4901_v56 = vld.sshfl [vmem:[#allocation1] sm:$0xff pattern:$0x73625140] }
 0x45e   :  { %4942 = vmatmul.f32.vlgmr.msra.gmra.mxu2 %v4901_v56  ;;  %v4895_v15 = vld [vmem:[%s10528_s10 + $0x8] sm:$0xf] }
 0x45f   :  { %v4878_v19 = vmax.f32 %v4854_v61, 0.0  ;;  %4900 = vst [vmem:[#allocation1 + $0x20] ss:$4 sm:$0xff] %v4895_v15  ;;  %v7607_v15 = vld [vmem:[%s10525_s7 + $0x104] sm:$0xf] }
 0x460   :  { %v4627_v13 = vpop.f32.mrf.mxu3 }
 0x461   :  { %v4628_v49 = vadd.f32 %v4627_v13, %v4609_v35 }
 0x462   :  { %v4646_v55 = vpop.f32.mrf.mxu0  ;;  %v4665_v58 = vpop.f32.mrf.mxu1 }
 0x463   :  { %v4647_v18 = vadd.f32 %v4646_v55, %v4628_v49  ;;  %v4666_v38 = vadd.f32 %v4665_v58, %v9967_v28  ;;  %v4661_v55 = vadd.f32 %v9984_v11, %v9977_v17 }
 0x464   :  { %v4610_v51 = vpop.f32.mrf.mxu2 }
 0x465   :  { %v4611_v21 = vadd.f32 %v4610_v51, %v9965_v37  ;;  %v4860_v22 = vadd.f32 %v4836_v59, %v4647_v18  ;;  %v4902_v18 = vld.sshfl [vmem:[#allocation1 + $0x8] sm:$0xff pattern:$0x73625140] }
 0x466   :  { %4962 = vmatmul.f32.vlgmr.msra.gmra.mxu3 %v4902_v18  ;;  %v4905_v18 = vld.sshfl [vmem:[#allocation1 + $0x20] sm:$0xff pattern:$0x73625140] }
 0x467   :  { %v4884_v10 = vmax.f32 %v4860_v22, 0.0  ;;  %v4904_v22 = vld.sshfl [vmem:[#allocation1 + $0x18] sm:$0xff pattern:$0x73625140] }
 0x468   :  { %v4629_v44 = vpop.f32.mrf.mxu3 }
 0x469   :  { %v4630_v26 = vadd.f32 %v4629_v44, %v4611_v21  ;;  %v4831_v44 = vld [vmem:[#allocation2 + $0x60] sm:$0xff] }
 0x46a   :  { %v4648_v9 = vpop.f32.mrf.mxu0  ;;  %v4667_v54 = vpop.f32.mrf.mxu1 }
 0x46b   :  { %v4649_v41 = vadd.f32 %v4648_v9, %v4630_v26  ;;  %v4668_v29 = vadd.f32 %v4667_v54, %v9965_v37  ;;  %v4825_v54 = vld [vmem:[#allocation2 + $0x20] sm:$0xff] }
 0x46c   :  { %v4679_v40 = vpop.f32.mrf.mxu2 }
 0x46d   :  { %v4866_v16 = vadd.f32 %v4842_v0, %v4649_v41  ;;  %v4680_v21 = vadd.f32 %v4679_v40, %v4661_v55  ;;  %v4903_v40 = vld.sshfl [vmem:[#allocation1 + $0x10] sm:$0xff pattern:$0x73625140] }
 0x46f   :  { %v4890_v1 = vmax.f32 %v4866_v16, 0.0 }
 0x470   :  { %v4698_v14 = vpop.f32.mrf.mxu3 }
 0x471   :  { %4978 = vmatpush.xpose.msrb.mxu2 %v4890_v1  ;;  %v4699_v26 = vadd.f32 %v4698_v14, %v4680_v21  ;;  %v4845_v21 = vld [vmem:[#allocation2 + $0xf0] sm:$0xff] }
 0x472   :  { %v9990_v31 = vpop.f32.mrf.mxu1 }
 0x473   :  { %v4849_v0 = vadd.f32 %v4825_v54, %v4699_v26  ;;  %v4833_v54 = vld [vmem:[#allocation2 + $0x70] sm:$0xff] }
 0x474   :  { %v4681_v5 = vpop.f32.mrf.mxu2  ;;  %v9992_v7 = vpop.f32.mrf.mxu0 }
 0x475   :  { %4979 = vmatpush.xpose.msrb.mxu2 %v4884_v10  ;;  %v4682_v8 = vadd.f32 %v4681_v5, %v4663_v43  ;;  %v4873_v2 = vmax.f32 %v4849_v0, 0.0 }
 0x478   :  { %v4700_v47 = vpop.f32.mrf.mxu3 }
 0x479   :  { %4980 = vmatpush.xpose.msrb.mxu2 %v4878_v19  ;;  %v4701_v58 = vadd.f32 %v4700_v47, %v4682_v8 }
 0x47a   :  { %v9994_v6 = vpop.f32.mrf.mxu1 }
 0x47b   :  { %v4855_v9 = vadd.f32 %v4831_v44, %v4701_v58 }
 0x47c   :  { %v4684_v52 = vpop.f32.mrf.mxu2  ;;  %v4719_v33 = vpop.f32.mrf.mxu0 }
 0x47d   :  { %4981 = vmatpush.xpose.msrb.mxu2 %v4872_v48  ;;  %v4685_v32 = vadd.f32 %v4684_v52, %v4666_v38  ;;  %v4879_v4 = vmax.f32 %v4855_v9, 0.0  ;;  %v4720_v5 = vadd.f32 %v4719_v33, %v9972_v46  ;;  %v4718_v52 = vadd.f32 %v9992_v7, %v9977_v17 }
 0x47f   :  { %v4737_v33 = vadd.f32 %v9990_v31, %v4718_v52  ;;  %v7049_v52 = vld [vmem:[%s10525_s7 + $0x80] sm:$0xf0] }
 0x480   :  { %v4703_v63 = vpop.f32.mrf.mxu3  ;;  %4982 = vmatmul.f32.vlgmr.msrb.gmra.mxu2 %v4903_v40 }
 0x481   :  { %v4704_v36 = vadd.f32 %v4703_v63, %v4685_v32  ;;  %v4844_v63 = vld [vmem:[#allocation2 + $0xe8] sm:$0xff] }
 0x482   :  { %v4741_v34 = vpop.f32.mrf.mxu1 }
 0x483   :  { %v4861_v51 = vadd.f32 %v4837_v57, %v4704_v36 }
 0x484   :  { %v4686_v23 = vpop.f32.mrf.mxu2  ;;  %v4722_v60 = vpop.f32.mrf.mxu0 }
 0x485   :  { %v4687_v25 = vadd.f32 %v4686_v23, %v4668_v29  ;;  %v4885_v53 = vmax.f32 %v4861_v51, 0.0  ;;  %v4723_v24 = vadd.f32 %v4722_v60, %v9967_v28  ;;  %v4739_v29 = vadd.f32 %v9994_v6, %v4720_v5  ;;  %v4838_v60 = vld [vmem:[#allocation2 + $0xa8] sm:$0xff]  ;;  %v7185_v5 = vld [vmem:[%s10525_s7 + $0x188] sm:$0xf0] }
 0x486   :  { %v4826_v6 = vld [vmem:[#allocation2 + $0x28] sm:$0xff] }
 0x487   :  { %v4742_v3 = vadd.f32 %v4741_v34, %v4723_v24 }
 0x488   :  { %v4705_v20 = vpop.f32.mrf.mxu3 }
 0x489   :  { %v4706_v50 = vadd.f32 %v4705_v20, %v4687_v25 }
 0x48a   :  { %v4743_v42 = vpop.f32.mrf.mxu1 }
 0x48b   :  { %v4867_v39 = vadd.f32 %v4843_v30, %v4706_v50  ;;  %v4832_v50 = vld [vmem:[#allocation2 + $0x68] sm:$0xff] }
 0x48c   :  { %v4755_v13 = vpop.f32.mrf.mxu2  ;;  %v4724_v49 = vpop.f32.mrf.mxu0 }
 0x48d   :  { %v4891_v35 = vmax.f32 %v4867_v39, 0.0  ;;  %v4725_v61 = vadd.f32 %v4724_v49, %v9965_v37  ;;  %v4756_v36 = vadd.f32 %v4755_v13, %v4737_v33  ;;  %v7609_v33 = vld [vmem:[%s10525_s7 + $0x114] sm:$0xf] }
 0x48f   :  { %4998 = vmatpush.xpose.msrb.mxu3 %v4891_v35  ;;  %v4744_v12 = vadd.f32 %v4743_v42, %v4725_v61  ;;  %v4850_v58 = vadd.f32 %v4826_v6, %v4756_v36  ;;  %v7199_v36 = vld [vmem:[%s10525_s7 + $0x118] sm:$0xf] }
 0x490   :  { %v10004_v27 = vpop.f32.mrf.mxu3 }
 0x491   :  { %v4775_v13 = vadd.f32 %v10004_v27, %v9977_v17  ;;  %v4874_v56 = vmax.f32 %v4850_v58, 0.0  ;;  %v4827_v17 = vld [vmem:[#allocation2 + $0x30] sm:$0xff]  ;;  %v7065_v58 = vld [vmem:[%s10525_s7 + $0x90] sm:$0xf0] }
 0x492   :  { %v10006_v41 = vpop.f32.mrf.mxu1 }
 0x493   :  { %4999 = vmatpush.xpose.msrb.mxu3 %v4885_v53 }
 0x494   :  { %v4757_v11 = vpop.f32.mrf.mxu2  ;;  %v4793_v16 = vpop.f32.mrf.mxu0 }
 0x495   :  { %v4758_v25 = vadd.f32 %v4757_v11, %v4739_v29  ;;  %v4794_v26 = vadd.f32 %v4793_v16, %v4775_v13 }
 0x497   :  { %5000 = vmatpush.xpose.msrb.mxu3 %v4879_v4  ;;  %v4856_v30 = vadd.f32 %v4832_v50, %v4758_v25  ;;  %v4813_v11 = vadd.f32 %v10006_v41, %v4794_v26  ;;  %v7175_v41 = vld [vmem:[%s10525_s7 + $0x100] sm:$0xf]  ;;  %v7626_v50 = vld [vmem:[%s10525_s7 + $0x194] sm:$0xf0] }
 0x498   :  { %v4776_v59 = vpop.f32.mrf.mxu3 }
 0x499   :  { %v4777_v57 = vadd.f32 %v4776_v59, %v9972_v46  ;;  %v4880_v31 = vmax.f32 %v4856_v30, 0.0  ;;  %v4851_v27 = vadd.f32 %v4827_v17, %v4813_v11  ;;  %v4906_v59 = vld.sshfl [vmem:[#allocation1 + $0x28] sm:$0xff pattern:$0x73625140] }
 0x49a   :  { %v4814_v14 = vpop.f32.mrf.mxu1 }
 0x49b   :  { %5001 = vmatpush.xpose.msrb.mxu3 %v4873_v2  ;;  %v4875_v16 = vmax.f32 %v4851_v27, 0.0  ;;  %v7623_v2 = vld [vmem:[%s10525_s7 + $0x17c] sm:$0xf0]  ;;  %v7611_v27 = vld [vmem:[%s10525_s7 + $0x124] sm:$0xf] }
 0x49c   :  { %v4760_v1 = vpop.f32.mrf.mxu2  ;;  %v4795_v62 = vpop.f32.mrf.mxu0 }
 0x49d   :  { %v4761_v47 = vadd.f32 %v4760_v1, %v4742_v3  ;;  %v4796_v35 = vadd.f32 %v4795_v62, %v4777_v57  ;;  %v7177_v1 = vld [vmem:[%s10525_s7 + $0x180] sm:$0xf0]  ;;  %v7624_v62 = vld [vmem:[%s10525_s7 + $0x184] sm:$0xf0]  ;;  %v7593_v57 = vld [vmem:[%s10525_s7 + $0x8c] sm:$0xf0] }
 0x49e   :  { %5002 = vmatmul.f32.vlgmr.msrb.gmra.mxu3 %v4904_v22  ;;  %v7176_v22 = vor.u32 %v7623_v2, %v7175_v41  ;;  %v7180_v24 = vor.u32 %v7607_v15, %v7177_v1  ;;  %v7628_v41 = vld [vmem:[%s10525_s7 + $0x1a4] sm:$0xf0]  ;;  %v7612_v2 = vld [vmem:[%s10525_s7 + $0x12c] sm:$0xf] }
 0x49f   :  { %v4862_v20 = vadd.f32 %v4838_v60, %v4761_v47  ;;  %v4815_v9 = vadd.f32 %v4814_v14, %v4796_v35  ;;  %v7183_v14 = vld [vmem:[%s10525_s7 + $0x108] sm:$0xf]  ;;  %v7575_v47 = vld [vmem:[%s10525_s7 + $0x4] sm:$0xf]  ;;  %v7057_v60 = vld [vmem:[%s10525_s7 + $0x88] sm:$0xf0] }
 0x4a0   :  { %v4779_v10 = vpop.f32.mrf.mxu3  ;;  %v7184_v61 = vor.u32 %v7624_v62, %v7183_v14  ;;  %5512 = vmatpush.bf16.msra.mxu2 %v7176_v22  ;;  %5525 = vmatpush.bf16.msra.mxu3 %v7180_v24  ;;  %v7217_v15 = vld [vmem:[%s10525_s7 + $0x1a8] sm:$0xf0]  ;;  %v7079_v62 = vld [vmem:[%s10525_s7 + $0x20] sm:$0xf] }
 0x4a1   :  { %v4780_v43 = vadd.f32 %v4779_v10, %v9967_v28  ;;  %v4886_v7 = vmax.f32 %v4862_v20, 0.0  ;;  %v4857_v0 = vadd.f32 %v4833_v54, %v4815_v9  ;;  %v7608_v10 = vld [vmem:[%s10525_s7 + $0x10c] sm:$0xf]  ;;  %v7191_v20 = vld [vmem:[%s10525_s7 + $0x110] sm:$0xf] }
 0x4a2   :  { %v4817_v23 = vpop.f32.mrf.mxu1  ;;  %v7188_v3 = vor.u32 %v7608_v10, %v7185_v5  ;;  %v7595_v24 = vld [vmem:[%s10525_s7 + $0x9c] sm:$0xf0]  ;;  %v7220_v10 = vor.u32 %v7612_v2, %v7217_v15  ;;  %v7579_v5 = vld [vmem:[%s10525_s7 + $0x24] sm:$0xf] }
 0x4a3   :  { %v4881_v40 = vmax.f32 %v4857_v0, 0.0  ;;  %v7207_v0 = vld [vmem:[%s10525_s7 + $0x120] sm:$0xf] }
 0x4a4   :  { %v4762_v19 = vpop.f32.mrf.mxu2  ;;  %v4798_v38 = vpop.f32.mrf.mxu0 }
 0x4a5   :  { %v4763_v48 = vadd.f32 %v4762_v19, %v4744_v12  ;;  %v4799_v8 = vadd.f32 %v4798_v38, %v4780_v43  ;;  %v7047_v12 = vld [vmem:[%s10525_s7] sm:$0xf]  ;;  %v7052_v38 = vor.u32 %v7575_v47, %v7049_v52  ;;  %v7193_v43 = vld [vmem:[%s10525_s7 + $0x190] sm:$0xf0]  ;;  %v7580_v47 = vld [vmem:[%s10525_s7 + $0x2c] sm:$0xf]  ;;  %v7080_v52 = vor.u32 %v7595_v24, %v7079_v62 }
 0x4a6   :  { %v7591_v19 = vld [vmem:[%s10525_s7 + $0x7c] sm:$0xf0]  ;;  %v7196_v30 = vor.u32 %v7609_v33, %v7193_v43  ;;  %v7614_v33 = vld [vmem:[%s10525_s7 + $0x13c] sm:$0xf]  ;;  %v7633_v62 = vld [vmem:[%s10525_s7 + $0x1cc] sm:$0xf0] }
 0x4a7   :  { %v4868_v32 = vadd.f32 %v4844_v63, %v4763_v48  ;;  %v4818_v49 = vadd.f32 %v4817_v23, %v4799_v8  ;;  %v7048_v48 = vor.u32 %v7591_v19, %v7047_v12  ;;  %v7055_v63 = vld [vmem:[%s10525_s7 + $0x8] sm:$0xf]  ;;  %5526 = vmatpush.bf16.msra.mxu3 %v7052_v38  ;;  %v7610_v8 = vld [vmem:[%s10525_s7 + $0x11c] sm:$0xf]  ;;  %v7617_v24 = vld [vmem:[%s10525_s7 + $0x154] sm:$0xf] }
 0x4a8   :  { %v4781_v34 = vpop.f32.mrf.mxu3  ;;  %v7592_v23 = vld [vmem:[%s10525_s7 + $0x84] sm:$0xf0] }
 0x4a9   :  { %v4892_v45 = vmax.f32 %v4868_v32, 0.0  ;;  %v4782_v39 = vadd.f32 %v4781_v34, %v9965_v37  ;;  %v4839_v37 = vld [vmem:[#allocation2 + $0xb0] sm:$0xff]  ;;  %v7056_v29 = vor.u32 %v7592_v23, %v7055_v63  ;;  %v7576_v32 = vld [vmem:[%s10525_s7 + $0xc] sm:$0xf]  ;;  %5513 = vmatpush.bf16.msra.mxu2 %v7048_v48  ;;  %v7087_v12 = vld [vmem:[%s10525_s7 + $0x28] sm:$0xf] }
 0x4aa   :  { %v4819_v51 = vpop.f32.mrf.mxu1  ;;  %v4863_v53 = vadd.f32 %v4839_v37, %v4818_v49  ;;  %v7060_v25 = vor.u32 %v7576_v32, %v7057_v60  ;;  %v7071_v49 = vld [vmem:[%s10525_s7 + $0x18] sm:$0xf]  ;;  %v7596_v19 = vld [vmem:[%s10525_s7 + $0xa4] sm:$0xf0]  ;;  %v7089_v48 = vld [vmem:[%s10525_s7 + $0xa8] sm:$0xf0] }
 0x4ab   :  { %5018 = vmatpush.xpose.msrb.mxu0 %v4892_v45  ;;  %v7625_v45 = vld [vmem:[%s10525_s7 + $0x18c] sm:$0xf0]  ;;  %5577 = vmatpush.bf16.msrb.mxu3 %v7196_v30  ;;  %v7088_v23 = vor.u32 %v7596_v19, %v7087_v12  ;;  %v7092_v38 = vor.u32 %v7580_v47, %v7089_v48  ;;  %v7613_v60 = vld [vmem:[%s10525_s7 + $0x134] sm:$0xf]  ;;  %v7265_v12 = vld [vmem:[%s10525_s7 + $0x1d8] sm:$0xf0] }
 0x4ac   :  { %v4800_v42 = vpop.f32.mrf.mxu0  ;;  %v4887_v4 = vmax.f32 %v4863_v53, 0.0  ;;  %v7192_v34 = vor.u32 %v7625_v45, %v7191_v20  ;;  %v7629_v32 = vld [vmem:[%s10525_s7 + $0x1ac] sm:$0xf0]  ;;  %v7231_v20 = vld [vmem:[%s10525_s7 + $0x138] sm:$0xf] }
 0x4ad   :  { %v4801_v55 = vadd.f32 %v4800_v42, %v4782_v39  ;;  %v7201_v39 = vld [vmem:[%s10525_s7 + $0x198] sm:$0xf0]  ;;  %v7063_v42 = vld [vmem:[%s10525_s7 + $0x10] sm:$0xf]  ;;  %v7630_v45 = vld [vmem:[%s10525_s7 + $0x1b4] sm:$0xf0] }
 0x4ae   :  { %5564 = vmatpush.bf16.msrb.mxu2 %v7192_v34  ;;  %v7204_v6 = vor.u32 %v7610_v8, %v7201_v39  ;;  %v7233_v34 = vld [vmem:[%s10525_s7 + $0x1b8] sm:$0xf0]  ;;  %v7597_v30 = vld [vmem:[%s10525_s7 + $0xac] sm:$0xf0]  ;;  %v7581_v39 = vld [vmem:[%s10525_s7 + $0x34] sm:$0xf] }
 0x4af   :  { %5019 = vmatpush.xpose.msrb.mxu0 %v4886_v7  ;;  %v4820_v28 = vadd.f32 %v4819_v51, %v4801_v55  ;;  %v7200_v7 = vor.u32 %v7626_v50, %v7199_v36  ;;  %v7577_v55 = vld [vmem:[%s10525_s7 + $0x14] sm:$0xf]  ;;  %v7095_v50 = vld [vmem:[%s10525_s7 + $0x30] sm:$0xf]  ;;  %v7236_v8 = vor.u32 %v7614_v33, %v7233_v34 }
 0x4b0   :  { %v7068_v35 = vor.u32 %v7577_v55, %v7065_v58  ;;  %v7582_v55 = vld [vmem:[%s10525_s7 + $0x3c] sm:$0xf]  ;;  %v7127_v48 = vld [vmem:[%s10525_s7 + $0x50] sm:$0xf] }
 0x4b1   :  { %v4869_v44 = vadd.f32 %v4845_v21, %v4820_v28  ;;  %v7594_v28 = vld [vmem:[%s10525_s7 + $0x94] sm:$0xf0]  ;;  %v7578_v21 = vld [vmem:[%s10525_s7 + $0x1c] sm:$0xf] }
 0x4b2   :  { %v7072_v13 = vor.u32 %v7594_v28, %v7071_v49  ;;  %5578 = vmatpush.bf16.msrb.mxu3 %v7068_v35  ;;  %v7105_v58 = vld [vmem:[%s10525_s7 + $0xb8] sm:$0xf0]  ;;  %v7239_v28 = vld [vmem:[%s10525_s7 + $0x140] sm:$0xf] }
 0x4b3   :  { %5020 = vmatpush.xpose.msrb.mxu0 %v4880_v31  ;;  %v4893_v46 = vmax.f32 %v4869_v44, 0.0  ;;  %v7064_v31 = vor.u32 %v7593_v57, %v7063_v42  ;;  %v7073_v44 = vld [vmem:[%s10525_s7 + $0x98] sm:$0xf0]  ;;  %v7097_v42 = vld [vmem:[%s10525_s7 + $0xb0] sm:$0xf0]  ;;  %v7108_v49 = vor.u32 %v7582_v55, %v7105_v58 }
 0x4b4   :  { %v7598_v57 = vld [vmem:[%s10525_s7 + $0xb4] sm:$0xf0]  ;;  %v7143_v58 = vld [vmem:[%s10525_s7 + $0x60] sm:$0xf] }
 0x4b5   :  { %7040 = vmatpush.xpose.msk.msrb.mxu1 %vm47_vm1, %v4893_v46  ;;  %5565 = vmatpush.bf16.msrb.mxu2 %v7064_v31  ;;  %v7100_v31 = vor.u32 %v7581_v39, %v7097_v42  ;;  %v7636_v39 = vld [vmem:[%s10525_s7 + $0x1e4] sm:$0xf0]  ;;  %v7620_v42 = vld [vmem:[%s10525_s7 + $0x16c] sm:$0xf] }
 0x4b7   :  { %5021 = vmatpush.xpose.msrb.mxu0 %v4874_v56  ;;  %v7076_v56 = vor.u32 %v7578_v21, %v7073_v44  ;;  %v7631_v21 = vld [vmem:[%s10525_s7 + $0x1bc] sm:$0xf0]  ;;  %v7241_v44 = vld [vmem:[%s10525_s7 + $0x1c0] sm:$0xf0] }
 0x4b9   :  { %7041 = vmatpush.xpose.msk.msrb.mxu1 %vm47_vm1, %v4887_v4  ;;  %v7627_v4 = vld [vmem:[%s10525_s7 + $0x19c] sm:$0xf0] }
 0x4ba   :  { %5022 = vmatmul.f32.vlgmr.msrb.gmra.mxu0 %v4905_v18  ;;  %v7208_v1 = vor.u32 %v7627_v4, %v7207_v0  ;;  %v7583_v4 = vld [vmem:[%s10525_s7 + $0x44] sm:$0xf] }
 0x4bb   :  { %5538 = vmatpush.bf16.msra.mxu0 %v7184_v61 }
 0x4bd   :  { %7042 = vmatpush.xpose.msk.msrb.mxu1 %vm47_vm1, %v4881_v40  ;;  %v7209_v40 = vld [vmem:[%s10525_s7 + $0x1a0] sm:$0xf0] }
 0x4be   :  { %v7212_v14 = vor.u32 %v7611_v27, %v7209_v40  ;;  %v7119_v27 = vld [vmem:[%s10525_s7 + $0x48] sm:$0xf] }
 0x4bf   :  { %5539 = vmatpush.bf16.msra.mxu0 %v7056_v29  ;;  %v7223_v29 = vld [vmem:[%s10525_s7 + $0x130] sm:$0xf]  ;;  %v7600_v40 = vld [vmem:[%s10525_s7 + $0xc4] sm:$0xf0] }
 0x4c0   :  { %v7224_v43 = vor.u32 %v7629_v32, %v7223_v29  ;;  %v7120_v15 = vor.u32 %v7600_v40, %v7119_v27  ;;  %v7129_v29 = vld [vmem:[%s10525_s7 + $0xd0] sm:$0xf0]  ;;  %v7135_v32 = vld [vmem:[%s10525_s7 + $0x58] sm:$0xf]  ;;  %v7297_v27 = vld [vmem:[%s10525_s7 + $0x1f8] sm:$0xf0] }
 0x4c1   :  { %7043 = vmatpush.xpose.msk.msrb.mxu1 %vm47_vm1, %v4875_v16  ;;  %v7215_v16 = vld [vmem:[%s10525_s7 + $0x128] sm:$0xf] }
 0x4c2   :  { %v7216_v61 = vor.u32 %v7628_v41, %v7215_v16  ;;  %v7584_v16 = vld [vmem:[%s10525_s7 + $0x4c] sm:$0xf] }
 0x4c3   :  { %5590 = vmatpush.bf16.msrb.mxu0 %v7200_v7  ;;  %v7232_v7 = vor.u32 %v7630_v45, %v7231_v20  ;;  %v7137_v20 = vld [vmem:[%s10525_s7 + $0xd8] sm:$0xf0] }
 0x4c4   :  { %7044 = vmatmul.msk.f32.vlgmr.msrb.gmra.mxu1 %vm47_vm1, %v4906_v59 }
 0x4c5   :  { %5551 = vmatpush.bf16.msra.mxu1 %v7188_v3  ;;  %v7081_v3 = vld [vmem:[%s10525_s7 + $0xa0] sm:$0xf0] }
 0x4c6   :  { %v7084_v63 = vor.u32 %v7579_v5, %v7081_v3  ;;  %v7634_v5 = vld [vmem:[%s10525_s7 + $0x1d4] sm:$0xf0]  ;;  %v7618_v3 = vld [vmem:[%s10525_s7 + $0x15c] sm:$0xf] }
 0x4c7   :  { %5591 = vmatpush.bf16.msrb.mxu0 %v7072_v13  ;;  %v7615_v13 = vld [vmem:[%s10525_s7 + $0x144] sm:$0xf] }
 0x4c9   :  { %5552 = vmatpush.bf16.msra.mxu1 %v7060_v25  ;;  %v7225_v25 = vld [vmem:[%s10525_s7 + $0x1b0] sm:$0xf0] }
 0x4ca   :  { %v7228_v36 = vor.u32 %v7613_v60, %v7225_v25  ;;  %v7602_v60 = vld [vmem:[%s10525_s7 + $0xd4] sm:$0xf0]  ;;  %v7586_v25 = vld [vmem:[%s10525_s7 + $0x5c] sm:$0xf] }
 0x4cb   :  { %v7136_v34 = vor.u32 %v7602_v60, %v7135_v32 }
 0x4cd   :  { %5603 = vmatpush.bf16.msrb.mxu1 %v7204_v6  ;;  %v7103_v6 = vld [vmem:[%s10525_s7 + $0x38] sm:$0xf] }
 0x4ce   :  { %v7104_v35 = vor.u32 %v7598_v57, %v7103_v6  ;;  %v7281_v6 = vld [vmem:[%s10525_s7 + $0x1e8] sm:$0xf0] }
 0x4d1   :  { %5604 = vmatpush.bf16.msrb.mxu1 %v7076_v56  ;;  %v7247_v56 = vld [vmem:[%s10525_s7 + $0x148] sm:$0xf] }
 0x4e1   :  { %v4943_v51 = vpop.f32.mrf.mxu2 }
 0x4e9   :  { %v4963_v37 = vpop.f32.mrf.mxu3 }
 0x4ea   :  { %v4964_v26 = vadd.f32 %v4963_v37, %v4943_v51  ;;  %v7096_v51 = vor.u32 %v7597_v30, %v7095_v50  ;;  %v7632_v37 = vld [vmem:[%s10525_s7 + $0x1c4] sm:$0xf0]  ;;  %v7635_v50 = vld [vmem:[%s10525_s7 + $0x1dc] sm:$0xf0]  ;;  %v7619_v30 = vld [vmem:[%s10525_s7 + $0x164] sm:$0xf] }
 0x503   :  { %v4983_v9 = vpop.f32.mrf.mxu2 }
 0x504   :  { %v4984_v53 = vadd.f32 %v4983_v9, %v4964_v26  ;;  %v7616_v26 = vld [vmem:[%s10525_s7 + $0x14c] sm:$0xf] }
 0x505   :  { %v7249_v9 = vld [vmem:[%s10525_s7 + $0x1c8] sm:$0xf0] }
 0x506   :  { %v7252_v0 = vor.u32 %v7616_v26, %v7249_v9 }
 0x521   :  { %v5003_v46 = vpop.f32.mrf.mxu3 }
 0x522   :  { %v5004_v18 = vadd.f32 %v5003_v46, %v4984_v53  ;;  %v7240_v53 = vor.u32 %v7631_v21, %v7239_v28  ;;  %v7244_v46 = vor.u32 %v7615_v13, %v7241_v44  ;;  %v7145_v28 = vld [vmem:[%s10525_s7 + $0xe0] sm:$0xf0]  ;;  %v7151_v21 = vld [vmem:[%s10525_s7 + $0x68] sm:$0xf]  ;;  %v7588_v44 = vld [vmem:[%s10525_s7 + $0x6c] sm:$0xf] }
 0x523   :  { %v7604_v13 = vld [vmem:[%s10525_s7 + $0xe4] sm:$0xf0] }
 0x524   :  { %v7152_v9 = vor.u32 %v7604_v13, %v7151_v21 }
 0x537   :  { %v5023_v54 = vpop.f32.mrf.mxu0 }
 0x538   :  { %v5024_v11 = vadd.f32 %v5023_v54, %v5004_v18  ;;  %v7111_v18 = vld [vmem:[%s10525_s7 + $0x40] sm:$0xf] }
 0x539   :  { %v7599_v54 = vld [vmem:[%s10525_s7 + $0xbc] sm:$0xf0] }
 0x53a   :  { %v7112_v41 = vor.u32 %v7599_v54, %v7111_v18  ;;  %v7637_v18 = vld [vmem:[%s10525_s7 + $0x1ec] sm:$0xf0]  ;;  %v7621_v54 = vld [vmem:[%s10525_s7 + $0x174] sm:$0xf] }
 0x541   :  { %v5043_v17 = vpop.f32.mrf.mxu1 }
 0x542   :  { %v5044_v59 = vadd.f32 %v5043_v17, %v5024_v11  ;;  %v7248_v11 = vor.u32 %v7632_v37, %v7247_v56  ;;  %v7113_v17 = vld [vmem:[%s10525_s7 + $0xc0] sm:$0xf0]  ;;  %v7153_v56 = vld [vmem:[%s10525_s7 + $0xe8] sm:$0xf0] }
 0x543   :  { %v7116_v2 = vor.u32 %v7583_v4, %v7113_v17  ;;  %v7638_v4 = vld [vmem:[%s10525_s7 + $0x1f4] sm:$0xf0]  ;;  %v7622_v17 = vld [vmem:[%s10525_s7 + $0x17c] sm:$0xf] }
 0x544   :  { %v10149_v22 = vpack.c.bf16 %v5044_v59, %v5044_v59  ;;  %v7121_v59 = vld [vmem:[%s10525_s7 + $0xc8] sm:$0xf0] }
 0x546   :  { %7301 = vmatmul.msk.bf16.vlgmr.msra.gmra.mxu2 %vm216_vm0, %v10149_v22  ;;  %7302 = vmatmul.msk.bf16.vlgmr.msra.gmra.mxu3 %vm216_vm0, %v10149_v22 }
 0x547   :  { %7303 = vmatmul.msk.bf16.vlgmr.msra.gmra.mxu0 %vm216_vm0, %v10149_v22  ;;  %7304 = vmatmul.msk.bf16.vlgmr.msra.gmra.mxu1 %vm216_vm0, %v10149_v22 }
 0x548   :  { %5616 = vmatpush.bf16.msra.mxu2 %v7208_v1  ;;  %5629 = vmatpush.bf16.msra.mxu3 %v7212_v14  ;;  %v7124_v1 = vor.u32 %v7584_v16, %v7121_v59  ;;  %v7255_v14 = vld [vmem:[%s10525_s7 + $0x150] sm:$0xf] }
 0x549   :  { %5642 = vmatpush.bf16.msra.mxu0 %v7216_v61  ;;  %5655 = vmatpush.bf16.msra.mxu1 %v7220_v10  ;;  %v7257_v61 = vld [vmem:[%s10525_s7 + $0x1d0] sm:$0xf0]  ;;  %v7263_v10 = vld [vmem:[%s10525_s7 + $0x158] sm:$0xf]  ;;  %v7256_v19 = vor.u32 %v7633_v62, %v7255_v14  ;;  %v7159_v59 = vld [vmem:[%s10525_s7 + $0x70] sm:$0xf] }
 0x54a   :  { %v7260_v47 = vor.u32 %v7617_v24, %v7257_v61  ;;  %v7161_v14 = vld [vmem:[%s10525_s7 + $0xf0] sm:$0xf0]  ;;  %v7167_v62 = vld [vmem:[%s10525_s7 + $0x78] sm:$0xf]  ;;  %v7590_v61 = vld [vmem:[%s10525_s7 + $0x7c] sm:$0xf] }
 0x54b   :  { %v7606_v24 = vld [vmem:[%s10525_s7 + $0xf4] sm:$0xf0] }
 0x54c   :  { %5617 = vmatpush.bf16.msra.mxu2 %v7080_v52  ;;  %5630 = vmatpush.bf16.msra.mxu3 %v7084_v63  ;;  %v7601_v52 = vld [vmem:[%s10525_s7 + $0xcc] sm:$0xf0]  ;;  %v7264_v63 = vor.u32 %v7634_v5, %v7263_v10  ;;  %v7169_v10 = vld [vmem:[%s10525_s7 + $0xf8] sm:$0xf0] }
 0x54d   :  { %5643 = vmatpush.bf16.msra.mxu0 %v7088_v23  ;;  %5656 = vmatpush.bf16.msra.mxu1 %v7092_v38  ;;  %v7268_v23 = vor.u32 %v7618_v3, %v7265_v12  ;;  %v7585_v38 = vld [vmem:[%s10525_s7 + $0x54] sm:$0xf]  ;;  %v7128_v45 = vor.u32 %v7601_v52, %v7127_v48  ;;  %v7168_v12 = vor.u32 %v7606_v24, %v7167_v62 }
 0x54e   :  { %v7132_v33 = vor.u32 %v7585_v38, %v7129_v29 }
 0x556   :  { %7305 = vmatmul.msk.bf16.vlgmr.msrb.gmra.mxu2 %vm216_vm0, %v10149_v22  ;;  %7306 = vmatmul.msk.bf16.vlgmr.msrb.gmra.mxu3 %vm216_vm0, %v10149_v22 }
 0x557   :  { %7307 = vmatmul.msk.bf16.vlgmr.msrb.gmra.mxu0 %vm216_vm0, %v10149_v22  ;;  %7308 = vmatmul.msk.bf16.vlgmr.msrb.gmra.mxu1 %vm216_vm0, %v10149_v22 }
 0x558   :  { %5668 = vmatpush.bf16.msrb.mxu2 %v7224_v43  ;;  %5681 = vmatpush.bf16.msrb.mxu3 %v7228_v36  ;;  %v7140_v43 = vor.u32 %v7586_v25, %v7137_v20  ;;  %v7271_v36 = vld [vmem:[%s10525_s7 + $0x160] sm:$0xf] }
 0x559   :  { %5694 = vmatpush.bf16.msrb.mxu0 %v7232_v7  ;;  %5707 = vmatpush.bf16.msrb.mxu1 %v7236_v8  ;;  %v7273_v7 = vld [vmem:[%s10525_s7 + $0x1e0] sm:$0xf0]  ;;  %v7279_v8 = vld [vmem:[%s10525_s7 + $0x168] sm:$0xf]  ;;  %v7272_v57 = vor.u32 %v7635_v50, %v7271_v36 }
 0x55a   :  { %v7276_v55 = vor.u32 %v7619_v30, %v7273_v7 }
 0x55c   :  { %5669 = vmatpush.bf16.msrb.mxu2 %v7096_v51  ;;  %5682 = vmatpush.bf16.msrb.mxu3 %v7100_v31  ;;  %v7603_v51 = vld [vmem:[%s10525_s7 + $0xdc] sm:$0xf0]  ;;  %v7280_v31 = vor.u32 %v7636_v39, %v7279_v8 }
 0x55d   :  { %5695 = vmatpush.bf16.msrb.mxu0 %v7104_v35  ;;  %5708 = vmatpush.bf16.msrb.mxu1 %v7108_v49  ;;  %v7284_v35 = vor.u32 %v7620_v42, %v7281_v6  ;;  %v7587_v49 = vld [vmem:[%s10525_s7 + $0x64] sm:$0xf]  ;;  %v7144_v37 = vor.u32 %v7603_v51, %v7143_v58 }
 0x55e   :  { %v7148_v26 = vor.u32 %v7587_v49, %v7145_v28 }
 0x566   :  { %7309 = vmatmul.msk.bf16.vlgmr.msra.gmra.mxu2 %vm216_vm0, %v10149_v22  ;;  %7310 = vmatmul.msk.bf16.vlgmr.msra.gmra.mxu3 %vm216_vm0, %v10149_v22 }
 0x567   :  { %7311 = vmatmul.msk.bf16.vlgmr.msra.gmra.mxu0 %vm216_vm0, %v10149_v22  ;;  %7312 = vmatmul.msk.bf16.vlgmr.msra.gmra.mxu1 %vm216_vm0, %v10149_v22 }
 0x568   :  { %5720 = vmatpush.bf16.msra.mxu2 %v7240_v53  ;;  %5733 = vmatpush.bf16.msra.mxu3 %v7244_v46  ;;  %v7156_v53 = vor.u32 %v7588_v44, %v7153_v56  ;;  %v7287_v46 = vld [vmem:[%s10525_s7 + $0x170] sm:$0xf] }
 0x569   :  { %5746 = vmatpush.bf16.msra.mxu0 %v7248_v11  ;;  %5759 = vmatpush.bf16.msra.mxu1 %v7252_v0  ;;  %v7289_v11 = vld [vmem:[%s10525_s7 + $0x1f0] sm:$0xf0]  ;;  %v7295_v0 = vld [vmem:[%s10525_s7 + $0x178] sm:$0xf]  ;;  %v7288_v40 = vor.u32 %v7637_v18, %v7287_v46 }
 0x56a   :  { %v7292_v16 = vor.u32 %v7621_v54, %v7289_v11  ;;  %v5112_v11 = vld [vmem:[%s10526_s8 + $0x8] sm:$0xff] }
 0x56c   :  { %5721 = vmatpush.bf16.msra.mxu2 %v7112_v41  ;;  %5734 = vmatpush.bf16.msra.mxu3 %v7116_v2  ;;  %v7605_v41 = vld [vmem:[%s10525_s7 + $0xec] sm:$0xf0]  ;;  %v7296_v2 = vor.u32 %v7638_v4, %v7295_v0 }
 0x56d   :  { %5747 = vmatpush.bf16.msra.mxu0 %v7120_v15  ;;  %5760 = vmatpush.bf16.msra.mxu1 %v7124_v1  ;;  %v7300_v15 = vor.u32 %v7622_v17, %v7297_v27  ;;  %v7589_v1 = vld [vmem:[%s10525_s7 + $0x74] sm:$0xf]  ;;  %v7160_v5 = vor.u32 %v7605_v41, %v7159_v59  ;;  %v5129_v17 = vperm.slane %v5112_v11, 2  ;;  %v5130_v27 = vperm.slane %v5112_v11, 3 }
 0x56e   :  { %v7164_v3 = vor.u32 %v7589_v1, %v7161_v14 }
 0x576   :  { %7313 = vmatmul.msk.bf16.vlgmr.msrb.gmra.mxu2 %vm216_vm0, %v10149_v22  ;;  %7314 = vmatmul.msk.bf16.vlgmr.msrb.gmra.mxu3 %vm216_vm0, %v10149_v22 }
 0x577   :  { %7315 = vmatmul.msk.bf16.vlgmr.msrb.gmra.mxu0 %vm216_vm0, %v10149_v22  ;;  %7316 = vmatmul.msk.bf16.vlgmr.msrb.gmra.mxu1 %vm216_vm0, %v10149_v22 }
 0x578   :  { %5772 = vmatpush.bf16.msrb.mxu2 %v7256_v19  ;;  %5785 = vmatpush.bf16.msrb.mxu3 %v7260_v47  ;;  %v7172_v19 = vor.u32 %v7590_v61, %v7169_v10  ;;  %v5111_v47 = vld [vmem:[%s10526_s8] sm:$0xff] }
 0x579   :  { %5798 = vmatpush.bf16.msrb.mxu0 %v7264_v63  ;;  %5811 = vmatpush.bf16.msrb.mxu1 %v7268_v23  ;;  %v5121_v48 = vperm.slane %v5111_v47, 2  ;;  %v5122_v52 = vperm.slane %v5111_v47, 3  ;;  %v5120_v32 = vperm.slane %v5111_v47, 1  ;;  %v5119_v60 = vperm.slane %v5111_v47, 0 }
 0x57a   :  { %v5125_v6 = vperm.slane %v5111_v47, 6  ;;  %v5123_v49 = vperm.slane %v5111_v47, 4 }
 0x57c   :  { %5773 = vmatpush.bf16.msrb.mxu2 %v7128_v45  ;;  %5786 = vmatpush.bf16.msrb.mxu3 %v7132_v33 }
 0x57d   :  { %5799 = vmatpush.bf16.msrb.mxu0 %v7136_v34  ;;  %5812 = vmatpush.bf16.msrb.mxu1 %v7140_v43 }
 0x586   :  { %7317 = vmatmul.msk.bf16.vlgmr.msra.gmra.mxu2 %vm216_vm0, %v10149_v22  ;;  %7318 = vmatmul.msk.bf16.vlgmr.msra.gmra.mxu3 %vm216_vm0, %v10149_v22 }
 0x587   :  { %7319 = vmatmul.msk.bf16.vlgmr.msra.gmra.mxu0 %vm216_vm0, %v10149_v22  ;;  %7320 = vmatmul.msk.bf16.vlgmr.msra.gmra.mxu1 %vm216_vm0, %v10149_v22 }
 0x588   :  { %5824 = vmatpush.bf16.msra.mxu2 %v7272_v57  ;;  %5837 = vmatpush.bf16.msra.mxu3 %v7276_v55  ;;  %v5126_v57 = vperm.slane %v5111_v47, 7 }
 0x589   :  { %5850 = vmatpush.bf16.msra.mxu0 %v7280_v31  ;;  %5863 = vmatpush.bf16.msra.mxu1 %v7284_v35  ;;  %v5124_v35 = vperm.slane %v5111_v47, 5 }
 0x58c   :  { %5825 = vmatpush.bf16.msra.mxu2 %v7144_v37  ;;  %5838 = vmatpush.bf16.msra.mxu3 %v7148_v26 }
 0x58d   :  { %5851 = vmatpush.bf16.msra.mxu0 %v7152_v9  ;;  %5864 = vmatpush.bf16.msra.mxu1 %v7156_v53 }
 0x596   :  { %7321 = vmatmul.msk.bf16.vlgmr.msrb.gmra.mxu2 %vm216_vm0, %v10149_v22  ;;  %7322 = vmatmul.msk.bf16.vlgmr.msrb.gmra.mxu3 %vm216_vm0, %v10149_v22 }
 0x597   :  { %7323 = vmatmul.msk.bf16.vlgmr.msrb.gmra.mxu0 %vm216_vm0, %v10149_v22  ;;  %7324 = vmatmul.msk.bf16.vlgmr.msrb.gmra.mxu1 %vm216_vm0, %v10149_v22 }
 0x598   :  { %5876 = vmatpush.bf16.msrb.mxu2 %v7288_v40  ;;  %5889 = vmatpush.bf16.msrb.mxu3 %v7292_v16 }
 0x599   :  { %5902 = vmatpush.bf16.msrb.mxu0 %v7296_v2  ;;  %5915 = vmatpush.bf16.msrb.mxu1 %v7300_v15  ;;  %v5128_v2 = vperm.slane %v5112_v11, 1  ;;  %v5127_v15 = vperm.slane %v5112_v11, 0 }
 0x59c   :  { %5877 = vmatpush.bf16.msrb.mxu2 %v7160_v5  ;;  %5890 = vmatpush.bf16.msrb.mxu3 %v7164_v3 }
 0x59d   :  { %5903 = vmatpush.bf16.msrb.mxu0 %v7168_v12  ;;  %5916 = vmatpush.bf16.msrb.mxu1 %v7172_v19 }
 0x5a6   :  { %7325 = vmatmul.msk.bf16.vlgmr.msra.gmra.mxu2 %vm216_vm0, %v10149_v22  ;;  %7326 = vmatmul.msk.bf16.vlgmr.msra.gmra.mxu3 %vm216_vm0, %v10149_v22 }
 0x5a7   :  { %7327 = vmatmul.msk.bf16.vlgmr.msra.gmra.mxu0 %vm216_vm0, %v10149_v22  ;;  %7328 = vmatmul.msk.bf16.vlgmr.msra.gmra.mxu1 %vm216_vm0, %v10149_v22 }
 0x5b6   :  { %7329 = vmatmul.msk.bf16.vlgmr.msrb.gmra.mxu2 %vm216_vm0, %v10149_v22  ;;  %7330 = vmatmul.msk.bf16.vlgmr.msrb.gmra.mxu3 %vm216_vm0, %v10149_v22 }
 0x5b7   :  { %7331 = vmatmul.msk.bf16.vlgmr.msrb.gmra.mxu0 %vm216_vm0, %v10149_v22  ;;  %7332 = vmatmul.msk.bf16.vlgmr.msrb.gmra.mxu1 %vm216_vm0, %v10149_v22 }
 0x5c4   :  { %v5541_v63 = vpop.f32.mrf.mxu0  ;;  %v5554_v23 = vpop.f32.mrf.mxu1 }
 0x5c5   :  { %v5542_v38 = vadd.f32 %v5541_v63, %v5121_v48  ;;  %v5555_v29 = vadd.f32 %v5554_v23, %v5122_v52  ;;  %v5133_v23 = vperm.slane %v5112_v11, 6 }
 0x5c7   :  { %v5955_v45 = vrot.slane %v5542_v38, 4  ;;  %v5956_v33 = vrot.slane %v5555_v29, 2  ;;  %v5134_v38 = vperm.slane %v5112_v11, 7 }
 0x5c9   :  { %v5515_v25 = vpop.f32.mrf.mxu2  ;;  %v5528_v20 = vpop.f32.mrf.mxu3  ;;  %v5981_v30 = vsel %vm5980_vm13, %v5955_v45, %v5956_v33  ;;  %v5131_v45 = vperm.slane %v5112_v11, 4 }
 0x5ca   :  { %v5529_v34 = vadd.f32 %v5528_v20, %v5120_v32  ;;  %v5516_v22 = vadd.f32 %v5515_v25, %v5119_v60  ;;  %v5132_v20 = vperm.slane %v5112_v11, 5 }
 0x5cc   :  { %v5954_v43 = vrot.slane %v5529_v34, 6  ;;  %v5543_v36 = vpop.f32.mrf.mxu0  ;;  %v5556_v50 = vpop.f32.mrf.mxu1 }
 0x5ce   :  { %v5979_v7 = vsel %vm5978_vm14, %v5516_v22, %v5954_v43 }
 0x5cf   :  { %v5982_v8 = vsel %vm506_vm2, %v5979_v7, %v5981_v30 }
 0x5d0   :  { %6012 = vst [vmem:[#allocation5] sm:$0xff] %v5982_v8 }
 0x5d1   :  { %v5517_v39 = vpop.f32.mrf.mxu2  ;;  %v5530_v42 = vpop.f32.mrf.mxu3 }
 0x5d4   :  { %v5593_v55 = vpop.f32.mrf.mxu0  ;;  %v5606_v58 = vpop.f32.mrf.mxu1 }
 0x5d5   :  { %v5594_v51 = vadd.f32 %v5593_v55, %v5125_v6  ;;  %v5607_v31 = vadd.f32 %v5606_v58, %v5126_v57  ;;  %v5113_v57 = vld [vmem:[%s10526_s8 + $0x10] sm:$0xff] }
 0x5d7   :  { %v5958_v13 = vrot.slane %v5594_v51, 4  ;;  %v5959_v44 = vrot.slane %v5607_v31, 2  ;;  %v5137_v51 = vperm.slane %v5113_v57, 2  ;;  %v5138_v31 = vperm.slane %v5113_v57, 3 }
 0x5d9   :  { %v5567_v28 = vpop.f32.mrf.mxu2  ;;  %v5580_v21 = vpop.f32.mrf.mxu3  ;;  %v5984_v46 = vsel %vm5980_vm13, %v5958_v13, %v5959_v44  ;;  %v5136_v13 = vperm.slane %v5113_v57, 1  ;;  %v5135_v44 = vperm.slane %v5113_v57, 0 }
 0x5da   :  { %v5581_v56 = vadd.f32 %v5580_v21, %v5124_v35  ;;  %v5568_v37 = vadd.f32 %v5567_v28, %v5123_v49 }
 0x5dc   :  { %v5957_v26 = vrot.slane %v5581_v56, 6  ;;  %v5595_v9 = vpop.f32.mrf.mxu0  ;;  %v5608_v53 = vpop.f32.mrf.mxu1 }
 0x5de   :  { %v5983_v18 = vsel %vm5978_vm14, %v5568_v37, %v5957_v26 }
 0x5df   :  { %v5985_v54 = vsel %vm506_vm2, %v5983_v18, %v5984_v46 }
 0x5e0   :  { %6013 = vst [vmem:[#allocation5 + $0x8] sm:$0xff] %v5985_v54 }
 0x5e1   :  { %v5569_v0 = vpop.f32.mrf.mxu2  ;;  %v5582_v4 = vpop.f32.mrf.mxu3 }
 0x5e4   :  { %v5645_v40 = vpop.f32.mrf.mxu0  ;;  %v5658_v16 = vpop.f32.mrf.mxu1 }
 0x5e5   :  { %v5646_v59 = vadd.f32 %v5645_v40, %v5129_v17  ;;  %v5659_v41 = vadd.f32 %v5658_v16, %v5130_v27  ;;  %v5141_v16 = vperm.slane %v5113_v57, 6 }
 0x5e7   :  { %v5961_v62 = vrot.slane %v5646_v59, 4  ;;  %v5962_v24 = vrot.slane %v5659_v41, 2  ;;  %v5142_v59 = vperm.slane %v5113_v57, 7 }
 0x5e9   :  { %v5619_v1 = vpop.f32.mrf.mxu2  ;;  %v5632_v14 = vpop.f32.mrf.mxu3  ;;  %v5987_v19 = vsel %vm5980_vm13, %v5961_v62, %v5962_v24  ;;  %v5139_v62 = vperm.slane %v5113_v57, 4 }
 0x5ea   :  { %v5633_v61 = vadd.f32 %v5632_v14, %v5128_v2  ;;  %v5620_v10 = vadd.f32 %v5619_v1, %v5127_v15  ;;  %v5140_v14 = vperm.slane %v5113_v57, 5 }
 0x5ec   :  { %v5960_v5 = vrot.slane %v5633_v61, 6  ;;  %v5647_v3 = vpop.f32.mrf.mxu0  ;;  %v5660_v12 = vpop.f32.mrf.mxu1 }
 0x5ee   :  { %v5986_v47 = vsel %vm5978_vm14, %v5620_v10, %v5960_v5 }
 0x5ef   :  { %v5988_v48 = vsel %vm506_vm2, %v5986_v47, %v5987_v19 }
 0x5f0   :  { %6014 = vst [vmem:[#allocation5 + $0x10] sm:$0xff] %v5988_v48 }
 0x5f1   :  { %v5621_v52 = vpop.f32.mrf.mxu2  ;;  %v5634_v63 = vpop.f32.mrf.mxu3 }
 0x5f4   :  { %v5697_v29 = vpop.f32.mrf.mxu0  ;;  %v5710_v32 = vpop.f32.mrf.mxu1 }
 0x5f5   :  { %v5698_v60 = vadd.f32 %v5697_v29, %v5133_v23  ;;  %v5711_v25 = vadd.f32 %v5710_v32, %v5134_v38  ;;  %v5114_v38 = vld [vmem:[%s10526_s8 + $0x18] sm:$0xff]  ;;  %s7690_s8 = smov [#allocation5]  }
 0x5f6   :  { %s6025_s16 = sshll.u32 %s7690_s8, 4  ;;  %s6026_s16 = int_to_ptr.vmem [resolvable:$true] %s6025_s16 }
 0x5f7   :  { %v5964_v22 = vrot.slane %v5698_v60, 4  ;;  %v5965_v43 = vrot.slane %v5711_v25, 2  ;;  %v5145_v60 = vperm.slane %v5114_v38, 2  ;;  %v5146_v25 = vperm.slane %v5114_v38, 3 }
 0x5f9   :  { %v5671_v33 = vpop.f32.mrf.mxu2  ;;  %v5684_v34 = vpop.f32.mrf.mxu3  ;;  %v5990_v39 = vsel %vm5980_vm13, %v5964_v22, %v5965_v43  ;;  %v5144_v22 = vperm.slane %v5114_v38, 1  ;;  %v5143_v43 = vperm.slane %v5114_v38, 0 }
 0x5fa   :  { %v5685_v36 = vadd.f32 %v5684_v34, %v5132_v20  ;;  %v5672_v50 = vadd.f32 %v5671_v33, %v5131_v45 }
 0x5fc   :  { %v5963_v30 = vrot.slane %v5685_v36, 6  ;;  %v5699_v7 = vpop.f32.mrf.mxu0  ;;  %v5712_v8 = vpop.f32.mrf.mxu1 }
 0x5fe   :  { %v5989_v42 = vsel %vm5978_vm14, %v5672_v50, %v5963_v30 }
 0x5ff   :  { %v5991_v6 = vsel %vm506_vm2, %v5989_v42, %v5990_v39 }
 0x600   :  { %6015 = vst [vmem:[#allocation5 + $0x18] sm:$0xff] %v5991_v6 }
 0x601   :  { %v5673_v55 = vpop.f32.mrf.mxu2  ;;  %v5686_v58 = vpop.f32.mrf.mxu3 }
 0x604   :  { %v5749_v35 = vpop.f32.mrf.mxu0  ;;  %v5762_v49 = vpop.f32.mrf.mxu1 }
 0x605   :  { %v5750_v28 = vadd.f32 %v5749_v35, %v5137_v51  ;;  %v5763_v21 = vadd.f32 %v5762_v49, %v5138_v31  ;;  %v5149_v49 = vperm.slane %v5114_v38, 6 }
 0x607   :  { %v5967_v26 = vrot.slane %v5750_v28, 4  ;;  %v5968_v9 = vrot.slane %v5763_v21, 2  ;;  %v5150_v28 = vperm.slane %v5114_v38, 7 }
 0x609   :  { %v5723_v56 = vpop.f32.mrf.mxu2  ;;  %v5736_v37 = vpop.f32.mrf.mxu3  ;;  %v5993_v0 = vsel %vm5980_vm13, %v5967_v26, %v5968_v9  ;;  %v5147_v26 = vperm.slane %v5114_v38, 4 }
 0x60a   :  { %v5737_v53 = vadd.f32 %v5736_v37, %v5136_v13  ;;  %v5724_v46 = vadd.f32 %v5723_v56, %v5135_v44  ;;  %v5148_v37 = vperm.slane %v5114_v38, 5 }
 0x60c   :  { %v5966_v18 = vrot.slane %v5737_v53, 6  ;;  %v5751_v54 = vpop.f32.mrf.mxu0  ;;  %v5764_v11 = vpop.f32.mrf.mxu1 }
 0x60e   :  { %v5992_v4 = vsel %vm5978_vm14, %v5724_v46, %v5966_v18 }
 0x60f   :  { %v5994_v17 = vsel %vm506_vm2, %v5992_v4, %v5993_v0 }
 0x610   :  { %6016 = vst [vmem:[#allocation5 + $0x20] sm:$0xff] %v5994_v17 }
 0x611   :  { %v5725_v27 = vpop.f32.mrf.mxu2  ;;  %v5738_v40 = vpop.f32.mrf.mxu3 }
 0x614   :  { %v5801_v41 = vpop.f32.mrf.mxu0  ;;  %v5814_v2 = vpop.f32.mrf.mxu1 }
 0x615   :  { %v5802_v15 = vadd.f32 %v5801_v41, %v5141_v16  ;;  %v5815_v1 = vadd.f32 %v5814_v2, %v5142_v59 }
 0x617   :  { %v5970_v10 = vrot.slane %v5802_v15, 4  ;;  %v5971_v5 = vrot.slane %v5815_v1, 2 }
 0x619   :  { %v5775_v24 = vpop.f32.mrf.mxu2  ;;  %v5788_v61 = vpop.f32.mrf.mxu3  ;;  %v5996_v52 = vsel %vm5980_vm13, %v5970_v10, %v5971_v5 }
 0x61a   :  { %v5789_v3 = vadd.f32 %v5788_v61, %v5140_v14  ;;  %v5776_v12 = vadd.f32 %v5775_v24, %v5139_v62 }
 0x61c   :  { %v5969_v19 = vrot.slane %v5789_v3, 6  ;;  %v5803_v47 = vpop.f32.mrf.mxu0  ;;  %v5816_v48 = vpop.f32.mrf.mxu1 }
 0x61e   :  { %v5995_v63 = vsel %vm5978_vm14, %v5776_v12, %v5969_v19 }
 0x61f   :  { %v5997_v23 = vsel %vm506_vm2, %v5995_v63, %v5996_v52 }
 0x620   :  { %6017 = vst [vmem:[#allocation5 + $0x28] sm:$0xff] %v5997_v23 }
 0x621   :  { %v5777_v29 = vpop.f32.mrf.mxu2  ;;  %v5790_v32 = vpop.f32.mrf.mxu3 }
 0x624   :  { %v5853_v20 = vpop.f32.mrf.mxu0  ;;  %v5866_v45 = vpop.f32.mrf.mxu1 }
 0x625   :  { %v5854_v33 = vadd.f32 %v5853_v20, %v5145_v60  ;;  %v5867_v34 = vadd.f32 %v5866_v45, %v5146_v25 }
 0x627   :  { %v5973_v30 = vrot.slane %v5854_v33, 4  ;;  %v5974_v7 = vrot.slane %v5867_v34, 2 }
 0x629   :  { %v5827_v36 = vpop.f32.mrf.mxu2  ;;  %v5840_v50 = vpop.f32.mrf.mxu3  ;;  %v5999_v55 = vsel %vm5980_vm13, %v5973_v30, %v5974_v7 }
 0x62a   :  { %v5841_v8 = vadd.f32 %v5840_v50, %v5144_v22  ;;  %v5828_v39 = vadd.f32 %v5827_v36, %v5143_v43 }
 0x62c   :  { %v5972_v42 = vrot.slane %v5841_v8, 6  ;;  %v5855_v6 = vpop.f32.mrf.mxu0  ;;  %v5868_v57 = vpop.f32.mrf.mxu1 }
 0x62e   :  { %v5998_v58 = vsel %vm5978_vm14, %v5828_v39, %v5972_v42 }
 0x62f   :  { %v6000_v51 = vsel %vm506_vm2, %v5998_v58, %v5999_v55 }
 0x630   :  { %6018 = vst [vmem:[#allocation5 + $0x30] sm:$0xff] %v6000_v51 }
 0x631   :  { %v5829_v31 = vpop.f32.mrf.mxu2  ;;  %v5842_v35 = vpop.f32.mrf.mxu3 }
 0x634   :  { %v5905_v21 = vpop.f32.mrf.mxu0  ;;  %v5918_v13 = vpop.f32.mrf.mxu1 }
 0x635   :  { %v5906_v44 = vadd.f32 %v5905_v21, %v5149_v49  ;;  %v5919_v56 = vadd.f32 %v5918_v13, %v5150_v28 }
 0x637   :  { %v5976_v46 = vrot.slane %v5906_v44, 4  ;;  %v5977_v18 = vrot.slane %v5919_v56, 2 }
 0x639   :  { %v5879_v9 = vpop.f32.mrf.mxu2  ;;  %v5892_v53 = vpop.f32.mrf.mxu3  ;;  %v6002_v27 = vsel %vm5980_vm13, %v5976_v46, %v5977_v18 }
 0x63a   :  { %v5893_v54 = vadd.f32 %v5892_v53, %v5148_v37  ;;  %v5880_v11 = vadd.f32 %v5879_v9, %v5147_v26 }
 0x63c   :  { %v5975_v0 = vrot.slane %v5893_v54, 6  ;;  %v5907_v4 = vpop.f32.mrf.mxu0  ;;  %v5920_v17 = vpop.f32.mrf.mxu1 }
 0x63e   :  { %v6001_v40 = vsel %vm5978_vm14, %v5880_v11, %v5975_v0 }
 0x63f   :  { %v6003_v16 = vsel %vm506_vm2, %v6001_v40, %v6002_v27 }
 0x640   :  { %6019 = vst [vmem:[#allocation5 + $0x38] sm:$0xff] %v6003_v16 }
 0x641   :  { %v5881_v59 = vpop.f32.mrf.mxu2  ;;  %v5894_v41 = vpop.f32.mrf.mxu3  ;;  %6030 = dma.vmem_to_hbm [thread:$0]  %s6026_s16, 1024, %s6028_s1, [#allocation6]  }
 0x642   :  { %7678 = dma.done.wait [#allocation6], 1024  }
 0x643   :  { %7679 = vsyncadd [#allocation6], 4294966272 }
 0x644   :  { %6035 = vsyncpa [#allocation6], 1 }

</bundles_post_ra>
